<compile_context>
chip_gen: v6e
topology: v6e:2x2x1
jax: 0.10.0
libtpu: 0.0.40
codegen_flags: <defaults>
</compile_context>

<pallas_src>
import jax
import jax.numpy as jnp
from jax.experimental import pallas as pl
from jax.experimental.pallas import tpu as pltpu

SELU_ALPHA = 1.6732632423543772
SELU_SCALE = 1.0507009873554805
BN_EPS = 1e-5


def _selu(v):
    # exp only on the clamped (non-positive) values -> no inf on the dead branch.
    neg = SELU_ALPHA * (jnp.exp(jnp.minimum(v, 0.0)) - 1.0)
    return SELU_SCALE * jnp.where(v > 0.0, v, neg)


def _make_resblock_kernel(N, H, W, C):
    M = N * H * W
    inv_m = 1.0 / float(M)

    def kernel(x_ref, w1_ref, g1_ref, b1_ref, w2_ref, g2_ref, b2_ref,
               out_ref, pad_ref):
        # x_ref  : (N, H, W, C)     f32   (unpadded NHWC)
        # w*_ref : (9, C, C)        bf16  (tap-major conv weights, HWIO per tap)
        # g*/b*  : (1, C)           f32   (BN gamma / beta)
        # out_ref: (N, H, W, C)     f32
        # pad_ref: (N, H+2, WP, C)  bf16  halo scratch, WP = W+2 rounded up to 8

        # Zero the scratch once per call; the halo ring (and the alignment
        # columns) stay zero for both convs, the interior is overwritten.
        # (For large activations you would zero only the ring instead.)
        pad_ref[...] = jnp.zeros_like(pad_ref)

        def conv_bn(src_f32, w_ref, g_ref, b_ref):
            # Single f32->bf16 cast per conv, written once into the halo buffer.
            pad_ref[:, 1:H + 1, 1:W + 1, :] = src_f32.astype(jnp.bfloat16)

            # Per-tap accumulation: 9 small MXU matmuls, f32 accumulator.
            acc = jnp.zeros((M, C), jnp.float32)
            for ky in range(3):
                for kx in range(3):
                    tap = pad_ref[:, ky:ky + H, kx:kx + W, :].reshape(M, C)
                    acc = acc + jnp.dot(tap, w_ref[ky * 3 + kx],
                                        preferred_element_type=jnp.float32)

            # Training-mode BatchNorm over (N, H, W): biased variance, eps=1e-5.
            # Centered two-pass variance (better parity with PyTorch BN).
            # Conv bias is cancelled by the mean subtraction -> not added.
            mean = jnp.sum(acc, axis=0, keepdims=True) * inv_m
            cent = acc - mean
            var = jnp.sum(cent * cent, axis=0, keepdims=True) * inv_m
            scale = g_ref[...] * jax.lax.rsqrt(var + BN_EPS)
            return cent * scale + b_ref[...]                        # (M, C) f32

        x = x_ref[...]                                              # (N,H,W,C) f32
        x_flat = x.reshape(M, C)

        h = _selu(conv_bn(x, w1_ref, g1_ref, b1_ref))               # conv1+bn1+selu
        h = conv_bn(h.reshape(N, H, W, C), w2_ref, g2_ref, b2_ref)  # conv2+bn2
        h = _selu(h + x_flat)                                       # residual+selu

        out_ref[...] = h.reshape(N, H, W, C)

    return kernel


@jax.jit
def residual_block_forward(x_nchw, params):
    N, C, H, W = x_nchw.shape
    WP = ((W + 2 + 7) // 8) * 8            # sublane-align the halo width

    # NCHW -> NHWC; channels stay unpadded (no lane zero-padding of activations).
    x = jnp.transpose(x_nchw, (0, 2, 3, 1)).astype(jnp.float32)

    def pack_w(w_hwio):
        # (3, 3, Cin, Cout) -> (9, Cin, Cout) bf16, tap-major (t = ky*3 + kx).
        return w_hwio.reshape(9, C, C).astype(jnp.bfloat16)

    w1 = pack_w(params["w1"])
    w2 = pack_w(params["w2"])
    g1 = params["g1"].reshape(1, C).astype(jnp.float32)
    b1 = params["be1"].reshape(1, C).astype(jnp.float32)
    g2 = params["g2"].reshape(1, C).astype(jnp.float32)
    b2 = params["be2"].reshape(1, C).astype(jnp.float32)
    # NOTE: conv biases (params["b1"], params["b2"]) are cancelled exactly by
    # the training-mode BN mean subtraction -> intentionally not passed.

    scratch_bytes = N * (H + 2) * WP * C * 2                        # bf16 halo
    io_bytes = 2 * (N * H * W * C) * 4                              # x + out, f32
    w_bytes = (w1.size + w2.size) * 2 + 4 * (g1.size + b1.size + g2.size + b2.size)
    vmem_limit = int(min(100 * 2 ** 20,
                         max(4 * 2 ** 20, 4 * (scratch_bytes + io_bytes + w_bytes))))

    vmem = pl.BlockSpec(memory_space=pltpu.MemorySpace.VMEM)
    kernel = _make_resblock_kernel(N, H, W, C)

    out = pl.pallas_call(
        kernel,
        out_shape=jax.ShapeDtypeStruct((N, H, W, C), jnp.float32),
        in_specs=[vmem] * 7,
        out_specs=vmem,
        scratch_shapes=[pltpu.VMEM((N, H + 2, WP, C), jnp.bfloat16)],
        compiler_params=pltpu.CompilerParams(vmem_limit_bytes=vmem_limit),
    )(x, w1, g1, b1, w2, g2, b2)

    return jnp.transpose(out, (0, 3, 1, 2))                         # back to NCHW


def init_params(key, hidden_size):
    k1, k2, k3, k4 = jax.random.split(key, 4)
    hs = hidden_size
    return {
        # conv weights in HWIO layout: (3, 3, Cin, Cout)
        "w1": jax.random.normal(k1, (3, 3, hs, hs), jnp.float32) * 0.05,
        "b1": jax.random.normal(k2, (hs,), jnp.float32) * 0.01,   # cancelled by BN
        "w2": jax.random.normal(k3, (3, 3, hs, hs), jnp.float32) * 0.05,
        "b2": jax.random.normal(k4, (hs,), jnp.float32) * 0.01,   # cancelled by BN
        # BatchNorm2d defaults: weight=1, bias=0
        "g1": jnp.ones((hs,), jnp.float32),
        "be1": jnp.zeros((hs,), jnp.float32),
        "g2": jnp.ones((hs,), jnp.float32),
        "be2": jnp.zeros((hs,), jnp.float32),
    }


def _reference_forward(x_nchw, params):
    # Pure-JAX f32 reference of the PyTorch module (training-mode BN),
    # including the conv biases (to validate the cancellation).
    x = jnp.transpose(x_nchw, (0, 2, 3, 1)).astype(jnp.float32)

    def conv_bn(h, w, bias, g, b):
        y = jax.lax.conv_general_dilated(
            h, w, window_strides=(1, 1), padding="SAME",
            dimension_numbers=("NHWC", "HWIO", "NHWC"),
            precision=jax.lax.Precision.HIGHEST) + bias
        mean = jnp.mean(y, axis=(0, 1, 2))
        var = jnp.mean((y - mean) ** 2, axis=(0, 1, 2))
        return g * (y - mean) * jax.lax.rsqrt(var + BN_EPS) + b

    h = jax.nn.selu(conv_bn(x, params["w1"], params["b1"], params["g1"], params["be1"]))
    h = conv_bn(h, params["w2"], params["b2"], params["g2"], params["be2"])
    h = jax.nn.selu(h + x)
    return jnp.transpose(h, (0, 3, 1, 2))


if __name__ == "__main__":
    key = jax.random.PRNGKey(0)
    k_x, k_p = jax.random.split(key)

    # hidden_size channels in == out; chess-board-like 8x8 spatial.
    N, HIDDEN, H, W = 2, 32, 8, 8

    x = jax.random.normal(k_x, (N, HIDDEN, H, W), jnp.float32)
    params = init_params(k_p, hidden_size=HIDDEN)

    out = residual_block_forward(x, params)
    jax.block_until_ready(out)

    assert out.shape == (N, HIDDEN, H, W), out.shape
    assert bool(jnp.all(jnp.isfinite(out)))

    # Loose-tolerance check vs. an f32 reference (kernel matmuls run in bf16).
    ref = _reference_forward(x, params)
    max_err = float(jnp.max(jnp.abs(out - ref)))
    assert max_err < 1e-1, max_err

    print("KERNEL_OK")
</pallas_src>

<mosaic_0001>
module attributes {stable_mosaic.version = 11 : i64} {
  func.func @kernel(%arg0: memref<2x8x8x32xf32, #tpu.memory_space<vmem>>, %arg1: memref<9x32x32xbf16, #tpu.memory_space<vmem>>, %arg2: memref<1x32xf32, #tpu.memory_space<vmem>>, %arg3: memref<1x32xf32, #tpu.memory_space<vmem>>, %arg4: memref<9x32x32xbf16, #tpu.memory_space<vmem>>, %arg5: memref<1x32xf32, #tpu.memory_space<vmem>>, %arg6: memref<1x32xf32, #tpu.memory_space<vmem>>, %arg7: memref<2x8x8x32xf32, #tpu.memory_space<vmem>>, %arg8: memref<2x10x16x32xbf16, #tpu.memory_space<vmem>>) attributes {dimension_semantics = [], scalar_prefetch = 0 : i64, scratch_operands = 1 : i64, tpu.core_type = #tpu.core_type<tc>} {
    %cst = arith.constant 0.000000e+00 : bf16
    %0 = vector.broadcast %cst : bf16 to vector<2x10x16x32xbf16>
    %c0 = arith.constant 0 : index
    %c0_0 = arith.constant 0 : index
    %c0_1 = arith.constant 0 : index
    %c0_2 = arith.constant 0 : index
    %1 = vector.load %arg8[%c0, %c0_0, %c0_1, %c0_2] : memref<2x10x16x32xbf16, #tpu.memory_space<vmem>>, vector<2x10x16x32xbf16>
    tpu.vector_store %arg8[%c0, %c0_0, %c0_1, %c0_2], %0 {strides = array<i32>} : memref<2x10x16x32xbf16, #tpu.memory_space<vmem>>, vector<2x10x16x32xbf16>,
    %c0_3 = arith.constant 0 : index
    %c0_4 = arith.constant 0 : index
    %c0_5 = arith.constant 0 : index
    %c0_6 = arith.constant 0 : index
    %2 = vector.load %arg0[%c0_3, %c0_4, %c0_5, %c0_6] : memref<2x8x8x32xf32, #tpu.memory_space<vmem>>, vector<2x8x8x32xf32>
    %3 = vector.shape_cast %2 : vector<2x8x8x32xf32> to vector<128x32xf32>
    %4 = arith.truncf %2 : vector<2x8x8x32xf32> to vector<2x8x8x32xbf16>
    %c0_7 = arith.constant 0 : index
    %c1 = arith.constant 1 : index
    %c1_8 = arith.constant 1 : index
    %c0_9 = arith.constant 0 : index
    %5 = vector.load %arg8[%c0_7, %c1, %c1_8, %c0_9] : memref<2x10x16x32xbf16, #tpu.memory_space<vmem>>, vector<2x8x8x32xbf16>
    tpu.vector_store %arg8[%c0_7, %c1, %c1_8, %c0_9], %4 {strides = array<i32>} : memref<2x10x16x32xbf16, #tpu.memory_space<vmem>>, vector<2x8x8x32xbf16>,
    %cst_10 = arith.constant 0.000000e+00 : f32
    %6 = vector.broadcast %cst_10 : f32 to vector<128x32xf32>
    %c0_11 = arith.constant 0 : index
    %c0_12 = arith.constant 0 : index
    %c0_13 = arith.constant 0 : index
    %c0_14 = arith.constant 0 : index
    %7 = vector.load %arg8[%c0_11, %c0_12, %c0_13, %c0_14] : memref<2x10x16x32xbf16, #tpu.memory_space<vmem>>, vector<2x8x8x32xbf16>
    %8 = vector.shape_cast %7 : vector<2x8x8x32xbf16> to vector<128x32xbf16>
    %c0_15 = arith.constant 0 : index
    %c0_16 = arith.constant 0 : index
    %c0_17 = arith.constant 0 : index
    %9 = vector.load %arg1[%c0_15, %c0_16, %c0_17] : memref<9x32x32xbf16, #tpu.memory_space<vmem>>, vector<1x32x32xbf16>
    %10 = vector.shape_cast %9 : vector<1x32x32xbf16> to vector<32x32xbf16>
    %cst_18 = arith.constant dense<0.000000e+00> : vector<128x32xf32>
    %11 = tpu.matmul %8, %10, %cst_18 {dimension_numbers = #tpu.dot_dimension_numbers<[1], [0], [0], [1], [0, 0, 1, 1], [], []>} : vector<128x32xbf16>, vector<32x32xbf16>, vector<128x32xf32> -> vector<128x32xf32>
    %12 = arith.addf %6, %11 : vector<128x32xf32>
    %c0_19 = arith.constant 0 : index
    %c0_20 = arith.constant 0 : index
    %c1_21 = arith.constant 1 : index
    %c0_22 = arith.constant 0 : index
    %13 = vector.load %arg8[%c0_19, %c0_20, %c1_21, %c0_22] : memref<2x10x16x32xbf16, #tpu.memory_space<vmem>>, vector<2x8x8x32xbf16>
    %14 = vector.shape_cast %13 : vector<2x8x8x32xbf16> to vector<128x32xbf16>
    %c1_23 = arith.constant 1 : index
    %c0_24 = arith.constant 0 : index
    %c0_25 = arith.constant 0 : index
    %15 = vector.load %arg1[%c1_23, %c0_24, %c0_25] : memref<9x32x32xbf16, #tpu.memory_space<vmem>>, vector<1x32x32xbf16>
    %16 = vector.shape_cast %15 : vector<1x32x32xbf16> to vector<32x32xbf16>
    %cst_26 = arith.constant dense<0.000000e+00> : vector<128x32xf32>
    %17 = tpu.matmul %14, %16, %cst_26 {dimension_numbers = #tpu.dot_dimension_numbers<[1], [0], [0], [1], [0, 0, 1, 1], [], []>} : vector<128x32xbf16>, vector<32x32xbf16>, vector<128x32xf32> -> vector<128x32xf32>
    %18 = arith.addf %12, %17 : vector<128x32xf32>
    %c0_27 = arith.constant 0 : index
    %c0_28 = arith.constant 0 : index
    %c2 = arith.constant 2 : index
    %c0_29 = arith.constant 0 : index
    %19 = vector.load %arg8[%c0_27, %c0_28, %c2, %c0_29] : memref<2x10x16x32xbf16, #tpu.memory_space<vmem>>, vector<2x8x8x32xbf16>
    %20 = vector.shape_cast %19 : vector<2x8x8x32xbf16> to vector<128x32xbf16>
    %c2_30 = arith.constant 2 : index
    %c0_31 = arith.constant 0 : index
    %c0_32 = arith.constant 0 : index
    %21 = vector.load %arg1[%c2_30, %c0_31, %c0_32] : memref<9x32x32xbf16, #tpu.memory_space<vmem>>, vector<1x32x32xbf16>
    %22 = vector.shape_cast %21 : vector<1x32x32xbf16> to vector<32x32xbf16>
    %cst_33 = arith.constant dense<0.000000e+00> : vector<128x32xf32>
    %23 = tpu.matmul %20, %22, %cst_33 {dimension_numbers = #tpu.dot_dimension_numbers<[1], [0], [0], [1], [0, 0, 1, 1], [], []>} : vector<128x32xbf16>, vector<32x32xbf16>, vector<128x32xf32> -> vector<128x32xf32>
    %24 = arith.addf %18, %23 : vector<128x32xf32>
    %c0_34 = arith.constant 0 : index
    %c1_35 = arith.constant 1 : index
    %c0_36 = arith.constant 0 : index
    %c0_37 = arith.constant 0 : index
    %25 = vector.load %arg8[%c0_34, %c1_35, %c0_36, %c0_37] : memref<2x10x16x32xbf16, #tpu.memory_space<vmem>>, vector<2x8x8x32xbf16>
    %26 = vector.shape_cast %25 : vector<2x8x8x32xbf16> to vector<128x32xbf16>
    %c3 = arith.constant 3 : index
    %c0_38 = arith.constant 0 : index
    %c0_39 = arith.constant 0 : index
    %27 = vector.load %arg1[%c3, %c0_38, %c0_39] : memref<9x32x32xbf16, #tpu.memory_space<vmem>>, vector<1x32x32xbf16>
    %28 = vector.shape_cast %27 : vector<1x32x32xbf16> to vector<32x32xbf16>
    %cst_40 = arith.constant dense<0.000000e+00> : vector<128x32xf32>
    %29 = tpu.matmul %26, %28, %cst_40 {dimension_numbers = #tpu.dot_dimension_numbers<[1], [0], [0], [1], [0, 0, 1, 1], [], []>} : vector<128x32xbf16>, vector<32x32xbf16>, vector<128x32xf32> -> vector<128x32xf32>
    %30 = arith.addf %24, %29 : vector<128x32xf32>
    %c0_41 = arith.constant 0 : index
    %c1_42 = arith.constant 1 : index
    %c1_43 = arith.constant 1 : index
    %c0_44 = arith.constant 0 : index
    %31 = vector.load %arg8[%c0_41, %c1_42, %c1_43, %c0_44] : memref<2x10x16x32xbf16, #tpu.memory_space<vmem>>, vector<2x8x8x32xbf16>
    %32 = vector.shape_cast %31 : vector<2x8x8x32xbf16> to vector<128x32xbf16>
    %c4 = arith.constant 4 : index
    %c0_45 = arith.constant 0 : index
    %c0_46 = arith.constant 0 : index
    %33 = vector.load %arg1[%c4, %c0_45, %c0_46] : memref<9x32x32xbf16, #tpu.memory_space<vmem>>, vector<1x32x32xbf16>
    %34 = vector.shape_cast %33 : vector<1x32x32xbf16> to vector<32x32xbf16>
    %cst_47 = arith.constant dense<0.000000e+00> : vector<128x32xf32>
    %35 = tpu.matmul %32, %34, %cst_47 {dimension_numbers = #tpu.dot_dimension_numbers<[1], [0], [0], [1], [0, 0, 1, 1], [], []>} : vector<128x32xbf16>, vector<32x32xbf16>, vector<128x32xf32> -> vector<128x32xf32>
    %36 = arith.addf %30, %35 : vector<128x32xf32>
    %c0_48 = arith.constant 0 : index
    %c1_49 = arith.constant 1 : index
    %c2_50 = arith.constant 2 : index
    %c0_51 = arith.constant 0 : index
    %37 = vector.load %arg8[%c0_48, %c1_49, %c2_50, %c0_51] : memref<2x10x16x32xbf16, #tpu.memory_space<vmem>>, vector<2x8x8x32xbf16>
    %38 = vector.shape_cast %37 : vector<2x8x8x32xbf16> to vector<128x32xbf16>
    %c5 = arith.constant 5 : index
    %c0_52 = arith.constant 0 : index
    %c0_53 = arith.constant 0 : index
    %39 = vector.load %arg1[%c5, %c0_52, %c0_53] : memref<9x32x32xbf16, #tpu.memory_space<vmem>>, vector<1x32x32xbf16>
    %40 = vector.shape_cast %39 : vector<1x32x32xbf16> to vector<32x32xbf16>
    %cst_54 = arith.constant dense<0.000000e+00> : vector<128x32xf32>
    %41 = tpu.matmul %38, %40, %cst_54 {dimension_numbers = #tpu.dot_dimension_numbers<[1], [0], [0], [1], [0, 0, 1, 1], [], []>} : vector<128x32xbf16>, vector<32x32xbf16>, vector<128x32xf32> -> vector<128x32xf32>
    %42 = arith.addf %36, %41 : vector<128x32xf32>
    %c0_55 = arith.constant 0 : index
    %c2_56 = arith.constant 2 : index
    %c0_57 = arith.constant 0 : index
    %c0_58 = arith.constant 0 : index
    %43 = vector.load %arg8[%c0_55, %c2_56, %c0_57, %c0_58] : memref<2x10x16x32xbf16, #tpu.memory_space<vmem>>, vector<2x8x8x32xbf16>
    %44 = vector.shape_cast %43 : vector<2x8x8x32xbf16> to vector<128x32xbf16>
    %c6 = arith.constant 6 : index
    %c0_59 = arith.constant 0 : index
    %c0_60 = arith.constant 0 : index
    %45 = vector.load %arg1[%c6, %c0_59, %c0_60] : memref<9x32x32xbf16, #tpu.memory_space<vmem>>, vector<1x32x32xbf16>
    %46 = vector.shape_cast %45 : vector<1x32x32xbf16> to vector<32x32xbf16>
    %cst_61 = arith.constant dense<0.000000e+00> : vector<128x32xf32>
    %47 = tpu.matmul %44, %46, %cst_61 {dimension_numbers = #tpu.dot_dimension_numbers<[1], [0], [0], [1], [0, 0, 1, 1], [], []>} : vector<128x32xbf16>, vector<32x32xbf16>, vector<128x32xf32> -> vector<128x32xf32>
    %48 = arith.addf %42, %47 : vector<128x32xf32>
    %c0_62 = arith.constant 0 : index
    %c2_63 = arith.constant 2 : index
    %c1_64 = arith.constant 1 : index
    %c0_65 = arith.constant 0 : index
    %49 = vector.load %arg8[%c0_62, %c2_63, %c1_64, %c0_65] : memref<2x10x16x32xbf16, #tpu.memory_space<vmem>>, vector<2x8x8x32xbf16>
    %50 = vector.shape_cast %49 : vector<2x8x8x32xbf16> to vector<128x32xbf16>
    %c7 = arith.constant 7 : index
    %c0_66 = arith.constant 0 : index
    %c0_67 = arith.constant 0 : index
    %51 = vector.load %arg1[%c7, %c0_66, %c0_67] : memref<9x32x32xbf16, #tpu.memory_space<vmem>>, vector<1x32x32xbf16>
    %52 = vector.shape_cast %51 : vector<1x32x32xbf16> to vector<32x32xbf16>
    %cst_68 = arith.constant dense<0.000000e+00> : vector<128x32xf32>
    %53 = tpu.matmul %50, %52, %cst_68 {dimension_numbers = #tpu.dot_dimension_numbers<[1], [0], [0], [1], [0, 0, 1, 1], [], []>} : vector<128x32xbf16>, vector<32x32xbf16>, vector<128x32xf32> -> vector<128x32xf32>
    %54 = arith.addf %48, %53 : vector<128x32xf32>
    %c0_69 = arith.constant 0 : index
    %c2_70 = arith.constant 2 : index
    %c2_71 = arith.constant 2 : index
    %c0_72 = arith.constant 0 : index
    %55 = vector.load %arg8[%c0_69, %c2_70, %c2_71, %c0_72] : memref<2x10x16x32xbf16, #tpu.memory_space<vmem>>, vector<2x8x8x32xbf16>
    %56 = vector.shape_cast %55 : vector<2x8x8x32xbf16> to vector<128x32xbf16>
    %c8 = arith.constant 8 : index
    %c0_73 = arith.constant 0 : index
    %c0_74 = arith.constant 0 : index
    %57 = vector.load %arg1[%c8, %c0_73, %c0_74] : memref<9x32x32xbf16, #tpu.memory_space<vmem>>, vector<1x32x32xbf16>
    %58 = vector.shape_cast %57 : vector<1x32x32xbf16> to vector<32x32xbf16>
    %cst_75 = arith.constant dense<0.000000e+00> : vector<128x32xf32>
    %59 = tpu.matmul %56, %58, %cst_75 {dimension_numbers = #tpu.dot_dimension_numbers<[1], [0], [0], [1], [0, 0, 1, 1], [], []>} : vector<128x32xbf16>, vector<32x32xbf16>, vector<128x32xf32> -> vector<128x32xf32>
    %60 = arith.addf %54, %59 : vector<128x32xf32>
    %cst_76 = arith.constant dense<0.000000e+00> : vector<32xf32>
    %61 = vector.multi_reduction <add>, %60, %cst_76 [0] : vector<128x32xf32> to vector<32xf32>
    %62 = vector.shape_cast %61 : vector<32xf32> to vector<1x32xf32>
    %cst_77 = arith.constant 7.812500e-03 : f32
    %63 = vector.broadcast %cst_77 : f32 to vector<1x32xf32>
    %64 = arith.mulf %62, %63 : vector<1x32xf32>
    %65 = vector.broadcast %64 : vector<1x32xf32> to vector<128x32xf32>
    %66 = arith.subf %60, %65 : vector<128x32xf32>
    %67 = arith.mulf %66, %66 : vector<128x32xf32>
    %cst_78 = arith.constant dense<0.000000e+00> : vector<32xf32>
    %68 = vector.multi_reduction <add>, %67, %cst_78 [0] : vector<128x32xf32> to vector<32xf32>
    %69 = vector.shape_cast %68 : vector<32xf32> to vector<1x32xf32>
    %cst_79 = arith.constant 7.812500e-03 : f32
    %70 = vector.broadcast %cst_79 : f32 to vector<1x32xf32>
    %71 = arith.mulf %69, %70 : vector<1x32xf32>
    %c0_80 = arith.constant 0 : index
    %c0_81 = arith.constant 0 : index
    %72 = vector.load %arg2[%c0_80, %c0_81] : memref<1x32xf32, #tpu.memory_space<vmem>>, vector<1x32xf32>
    %cst_82 = arith.constant 9.99999974E-6 : f32
    %73 = vector.broadcast %cst_82 : f32 to vector<1x32xf32>
    %74 = arith.addf %71, %73 : vector<1x32xf32>
    %75 = math.rsqrt %74 : vector<1x32xf32>
    %76 = arith.mulf %72, %75 : vector<1x32xf32>
    %77 = vector.broadcast %76 : vector<1x32xf32> to vector<128x32xf32>
    %78 = arith.mulf %66, %77 : vector<128x32xf32>
    %c0_83 = arith.constant 0 : index
    %c0_84 = arith.constant 0 : index
    %79 = vector.load %arg3[%c0_83, %c0_84] : memref<1x32xf32, #tpu.memory_space<vmem>>, vector<1x32xf32>
    %80 = vector.broadcast %79 : vector<1x32xf32> to vector<128x32xf32>
    %81 = arith.addf %78, %80 : vector<128x32xf32>
    %cst_85 = arith.constant 0.000000e+00 : f32
    %82 = vector.broadcast %cst_85 : f32 to vector<128x32xf32>
    %83 = arith.minimumf %81, %82 : vector<128x32xf32>
    %84 = math.exp %83 : vector<128x32xf32>
    %cst_86 = arith.constant 1.000000e+00 : f32
    %85 = vector.broadcast %cst_86 : f32 to vector<128x32xf32>
    %86 = arith.subf %84, %85 : vector<128x32xf32>
    %cst_87 = arith.constant 1.67326319 : f32
    %87 = vector.broadcast %cst_87 : f32 to vector<128x32xf32>
    %88 = arith.mulf %87, %86 : vector<128x32xf32>
    %cst_88 = arith.constant 0.000000e+00 : f32
    %89 = vector.broadcast %cst_88 : f32 to vector<128x32xf32>
    %90 = arith.cmpf ogt, %81, %89 : vector<128x32xf32>
    %91 = arith.select %90, %81, %88 : vector<128x32xi1>, vector<128x32xf32>
    %cst_89 = arith.constant 1.05070102 : f32
    %92 = vector.broadcast %cst_89 : f32 to vector<128x32xf32>
    %93 = arith.mulf %92, %91 : vector<128x32xf32>
    %94 = vector.shape_cast %93 : vector<128x32xf32> to vector<2x8x8x32xf32>
    %95 = arith.truncf %94 : vector<2x8x8x32xf32> to vector<2x8x8x32xbf16>
    %c0_90 = arith.constant 0 : index
    %c1_91 = arith.constant 1 : index
    %c1_92 = arith.constant 1 : index
    %c0_93 = arith.constant 0 : index
    %96 = vector.load %arg8[%c0_90, %c1_91, %c1_92, %c0_93] : memref<2x10x16x32xbf16, #tpu.memory_space<vmem>>, vector<2x8x8x32xbf16>
    tpu.vector_store %arg8[%c0_90, %c1_91, %c1_92, %c0_93], %95 {strides = array<i32>} : memref<2x10x16x32xbf16, #tpu.memory_space<vmem>>, vector<2x8x8x32xbf16>,
    %cst_94 = arith.constant 0.000000e+00 : f32
    %97 = vector.broadcast %cst_94 : f32 to vector<128x32xf32>
    %c0_95 = arith.constant 0 : index
    %c0_96 = arith.constant 0 : index
    %c0_97 = arith.constant 0 : index
    %c0_98 = arith.constant 0 : index
    %98 = vector.load %arg8[%c0_95, %c0_96, %c0_97, %c0_98] : memref<2x10x16x32xbf16, #tpu.memory_space<vmem>>, vector<2x8x8x32xbf16>
    %99 = vector.shape_cast %98 : vector<2x8x8x32xbf16> to vector<128x32xbf16>
    %c0_99 = arith.constant 0 : index
    %c0_100 = arith.constant 0 : index
    %c0_101 = arith.constant 0 : index
    %100 = vector.load %arg4[%c0_99, %c0_100, %c0_101] : memref<9x32x32xbf16, #tpu.memory_space<vmem>>, vector<1x32x32xbf16>
    %101 = vector.shape_cast %100 : vector<1x32x32xbf16> to vector<32x32xbf16>
    %cst_102 = arith.constant dense<0.000000e+00> : vector<128x32xf32>
    %102 = tpu.matmul %99, %101, %cst_102 {dimension_numbers = #tpu.dot_dimension_numbers<[1], [0], [0], [1], [0, 0, 1, 1], [], []>} : vector<128x32xbf16>, vector<32x32xbf16>, vector<128x32xf32> -> vector<128x32xf32>
    %103 = arith.addf %97, %102 : vector<128x32xf32>
    %c0_103 = arith.constant 0 : index
    %c0_104 = arith.constant 0 : index
    %c1_105 = arith.constant 1 : index
    %c0_106 = arith.constant 0 : index
    %104 = vector.load %arg8[%c0_103, %c0_104, %c1_105, %c0_106] : memref<2x10x16x32xbf16, #tpu.memory_space<vmem>>, vector<2x8x8x32xbf16>
    %105 = vector.shape_cast %104 : vector<2x8x8x32xbf16> to vector<128x32xbf16>
    %c1_107 = arith.constant 1 : index
    %c0_108 = arith.constant 0 : index
    %c0_109 = arith.constant 0 : index
    %106 = vector.load %arg4[%c1_107, %c0_108, %c0_109] : memref<9x32x32xbf16, #tpu.memory_space<vmem>>, vector<1x32x32xbf16>
    %107 = vector.shape_cast %106 : vector<1x32x32xbf16> to vector<32x32xbf16>
    %cst_110 = arith.constant dense<0.000000e+00> : vector<128x32xf32>
    %108 = tpu.matmul %105, %107, %cst_110 {dimension_numbers = #tpu.dot_dimension_numbers<[1], [0], [0], [1], [0, 0, 1, 1], [], []>} : vector<128x32xbf16>, vector<32x32xbf16>, vector<128x32xf32> -> vector<128x32xf32>
    %109 = arith.addf %103, %108 : vector<128x32xf32>
    %c0_111 = arith.constant 0 : index
    %c0_112 = arith.constant 0 : index
    %c2_113 = arith.constant 2 : index
    %c0_114 = arith.constant 0 : index
    %110 = vector.load %arg8[%c0_111, %c0_112, %c2_113, %c0_114] : memref<2x10x16x32xbf16, #tpu.memory_space<vmem>>, vector<2x8x8x32xbf16>
    %111 = vector.shape_cast %110 : vector<2x8x8x32xbf16> to vector<128x32xbf16>
    %c2_115 = arith.constant 2 : index
    %c0_116 = arith.constant 0 : index
    %c0_117 = arith.constant 0 : index
    %112 = vector.load %arg4[%c2_115, %c0_116, %c0_117] : memref<9x32x32xbf16, #tpu.memory_space<vmem>>, vector<1x32x32xbf16>
    %113 = vector.shape_cast %112 : vector<1x32x32xbf16> to vector<32x32xbf16>
    %cst_118 = arith.constant dense<0.000000e+00> : vector<128x32xf32>
    %114 = tpu.matmul %111, %113, %cst_118 {dimension_numbers = #tpu.dot_dimension_numbers<[1], [0], [0], [1], [0, 0, 1, 1], [], []>} : vector<128x32xbf16>, vector<32x32xbf16>, vector<128x32xf32> -> vector<128x32xf32>
    %115 = arith.addf %109, %114 : vector<128x32xf32>
    %c0_119 = arith.constant 0 : index
    %c1_120 = arith.constant 1 : index
    %c0_121 = arith.constant 0 : index
    %c0_122 = arith.constant 0 : index
    %116 = vector.load %arg8[%c0_119, %c1_120, %c0_121, %c0_122] : memref<2x10x16x32xbf16, #tpu.memory_space<vmem>>, vector<2x8x8x32xbf16>
    %117 = vector.shape_cast %116 : vector<2x8x8x32xbf16> to vector<128x32xbf16>
    %c3_123 = arith.constant 3 : index
    %c0_124 = arith.constant 0 : index
    %c0_125 = arith.constant 0 : index
    %118 = vector.load %arg4[%c3_123, %c0_124, %c0_125] : memref<9x32x32xbf16, #tpu.memory_space<vmem>>, vector<1x32x32xbf16>
    %119 = vector.shape_cast %118 : vector<1x32x32xbf16> to vector<32x32xbf16>
    %cst_126 = arith.constant dense<0.000000e+00> : vector<128x32xf32>
    %120 = tpu.matmul %117, %119, %cst_126 {dimension_numbers = #tpu.dot_dimension_numbers<[1], [0], [0], [1], [0, 0, 1, 1], [], []>} : vector<128x32xbf16>, vector<32x32xbf16>, vector<128x32xf32> -> vector<128x32xf32>
    %121 = arith.addf %115, %120 : vector<128x32xf32>
    %c0_127 = arith.constant 0 : index
    %c1_128 = arith.constant 1 : index
    %c1_129 = arith.constant 1 : index
    %c0_130 = arith.constant 0 : index
    %122 = vector.load %arg8[%c0_127, %c1_128, %c1_129, %c0_130] : memref<2x10x16x32xbf16, #tpu.memory_space<vmem>>, vector<2x8x8x32xbf16>
    %123 = vector.shape_cast %122 : vector<2x8x8x32xbf16> to vector<128x32xbf16>
    %c4_131 = arith.constant 4 : index
    %c0_132 = arith.constant 0 : index
    %c0_133 = arith.constant 0 : index
    %124 = vector.load %arg4[%c4_131, %c0_132, %c0_133] : memref<9x32x32xbf16, #tpu.memory_space<vmem>>, vector<1x32x32xbf16>
    %125 = vector.shape_cast %124 : vector<1x32x32xbf16> to vector<32x32xbf16>
    %cst_134 = arith.constant dense<0.000000e+00> : vector<128x32xf32>
    %126 = tpu.matmul %123, %125, %cst_134 {dimension_numbers = #tpu.dot_dimension_numbers<[1], [0], [0], [1], [0, 0, 1, 1], [], []>} : vector<128x32xbf16>, vector<32x32xbf16>, vector<128x32xf32> -> vector<128x32xf32>
    %127 = arith.addf %121, %126 : vector<128x32xf32>
    %c0_135 = arith.constant 0 : index
    %c1_136 = arith.constant 1 : index
    %c2_137 = arith.constant 2 : index
    %c0_138 = arith.constant 0 : index
    %128 = vector.load %arg8[%c0_135, %c1_136, %c2_137, %c0_138] : memref<2x10x16x32xbf16, #tpu.memory_space<vmem>>, vector<2x8x8x32xbf16>
    %129 = vector.shape_cast %128 : vector<2x8x8x32xbf16> to vector<128x32xbf16>
    %c5_139 = arith.constant 5 : index
    %c0_140 = arith.constant 0 : index
    %c0_141 = arith.constant 0 : index
    %130 = vector.load %arg4[%c5_139, %c0_140, %c0_141] : memref<9x32x32xbf16, #tpu.memory_space<vmem>>, vector<1x32x32xbf16>
    %131 = vector.shape_cast %130 : vector<1x32x32xbf16> to vector<32x32xbf16>
    %cst_142 = arith.constant dense<0.000000e+00> : vector<128x32xf32>
    %132 = tpu.matmul %129, %131, %cst_142 {dimension_numbers = #tpu.dot_dimension_numbers<[1], [0], [0], [1], [0, 0, 1, 1], [], []>} : vector<128x32xbf16>, vector<32x32xbf16>, vector<128x32xf32> -> vector<128x32xf32>
    %133 = arith.addf %127, %132 : vector<128x32xf32>
    %c0_143 = arith.constant 0 : index
    %c2_144 = arith.constant 2 : index
    %c0_145 = arith.constant 0 : index
    %c0_146 = arith.constant 0 : index
    %134 = vector.load %arg8[%c0_143, %c2_144, %c0_145, %c0_146] : memref<2x10x16x32xbf16, #tpu.memory_space<vmem>>, vector<2x8x8x32xbf16>
    %135 = vector.shape_cast %134 : vector<2x8x8x32xbf16> to vector<128x32xbf16>
    %c6_147 = arith.constant 6 : index
    %c0_148 = arith.constant 0 : index
    %c0_149 = arith.constant 0 : index
    %136 = vector.load %arg4[%c6_147, %c0_148, %c0_149] : memref<9x32x32xbf16, #tpu.memory_space<vmem>>, vector<1x32x32xbf16>
    %137 = vector.shape_cast %136 : vector<1x32x32xbf16> to vector<32x32xbf16>
    %cst_150 = arith.constant dense<0.000000e+00> : vector<128x32xf32>
    %138 = tpu.matmul %135, %137, %cst_150 {dimension_numbers = #tpu.dot_dimension_numbers<[1], [0], [0], [1], [0, 0, 1, 1], [], []>} : vector<128x32xbf16>, vector<32x32xbf16>, vector<128x32xf32> -> vector<128x32xf32>
    %139 = arith.addf %133, %138 : vector<128x32xf32>
    %c0_151 = arith.constant 0 : index
    %c2_152 = arith.constant 2 : index
    %c1_153 = arith.constant 1 : index
    %c0_154 = arith.constant 0 : index
    %140 = vector.load %arg8[%c0_151, %c2_152, %c1_153, %c0_154] : memref<2x10x16x32xbf16, #tpu.memory_space<vmem>>, vector<2x8x8x32xbf16>
    %141 = vector.shape_cast %140 : vector<2x8x8x32xbf16> to vector<128x32xbf16>
    %c7_155 = arith.constant 7 : index
    %c0_156 = arith.constant 0 : index
    %c0_157 = arith.constant 0 : index
    %142 = vector.load %arg4[%c7_155, %c0_156, %c0_157] : memref<9x32x32xbf16, #tpu.memory_space<vmem>>, vector<1x32x32xbf16>
    %143 = vector.shape_cast %142 : vector<1x32x32xbf16> to vector<32x32xbf16>
    %cst_158 = arith.constant dense<0.000000e+00> : vector<128x32xf32>
    %144 = tpu.matmul %141, %143, %cst_158 {dimension_numbers = #tpu.dot_dimension_numbers<[1], [0], [0], [1], [0, 0, 1, 1], [], []>} : vector<128x32xbf16>, vector<32x32xbf16>, vector<128x32xf32> -> vector<128x32xf32>
    %145 = arith.addf %139, %144 : vector<128x32xf32>
    %c0_159 = arith.constant 0 : index
    %c2_160 = arith.constant 2 : index
    %c2_161 = arith.constant 2 : index
    %c0_162 = arith.constant 0 : index
    %146 = vector.load %arg8[%c0_159, %c2_160, %c2_161, %c0_162] : memref<2x10x16x32xbf16, #tpu.memory_space<vmem>>, vector<2x8x8x32xbf16>
    %147 = vector.shape_cast %146 : vector<2x8x8x32xbf16> to vector<128x32xbf16>
    %c8_163 = arith.constant 8 : index
    %c0_164 = arith.constant 0 : index
    %c0_165 = arith.constant 0 : index
    %148 = vector.load %arg4[%c8_163, %c0_164, %c0_165] : memref<9x32x32xbf16, #tpu.memory_space<vmem>>, vector<1x32x32xbf16>
    %149 = vector.shape_cast %148 : vector<1x32x32xbf16> to vector<32x32xbf16>
    %cst_166 = arith.constant dense<0.000000e+00> : vector<128x32xf32>
    %150 = tpu.matmul %147, %149, %cst_166 {dimension_numbers = #tpu.dot_dimension_numbers<[1], [0], [0], [1], [0, 0, 1, 1], [], []>} : vector<128x32xbf16>, vector<32x32xbf16>, vector<128x32xf32> -> vector<128x32xf32>
    %151 = arith.addf %145, %150 : vector<128x32xf32>
    %cst_167 = arith.constant dense<0.000000e+00> : vector<32xf32>
    %152 = vector.multi_reduction <add>, %151, %cst_167 [0] : vector<128x32xf32> to vector<32xf32>
    %153 = vector.shape_cast %152 : vector<32xf32> to vector<1x32xf32>
    %cst_168 = arith.constant 7.812500e-03 : f32
    %154 = vector.broadcast %cst_168 : f32 to vector<1x32xf32>
    %155 = arith.mulf %153, %154 : vector<1x32xf32>
    %156 = vector.broadcast %155 : vector<1x32xf32> to vector<128x32xf32>
    %157 = arith.subf %151, %156 : vector<128x32xf32>
    %158 = arith.mulf %157, %157 : vector<128x32xf32>
    %cst_169 = arith.constant dense<0.000000e+00> : vector<32xf32>
    %159 = vector.multi_reduction <add>, %158, %cst_169 [0] : vector<128x32xf32> to vector<32xf32>
    %160 = vector.shape_cast %159 : vector<32xf32> to vector<1x32xf32>
    %cst_170 = arith.constant 7.812500e-03 : f32
    %161 = vector.broadcast %cst_170 : f32 to vector<1x32xf32>
    %162 = arith.mulf %160, %161 : vector<1x32xf32>
    %c0_171 = arith.constant 0 : index
    %c0_172 = arith.constant 0 : index
    %163 = vector.load %arg5[%c0_171, %c0_172] : memref<1x32xf32, #tpu.memory_space<vmem>>, vector<1x32xf32>
    %cst_173 = arith.constant 9.99999974E-6 : f32
    %164 = vector.broadcast %cst_173 : f32 to vector<1x32xf32>
    %165 = arith.addf %162, %164 : vector<1x32xf32>
    %166 = math.rsqrt %165 : vector<1x32xf32>
    %167 = arith.mulf %163, %166 : vector<1x32xf32>
    %168 = vector.broadcast %167 : vector<1x32xf32> to vector<128x32xf32>
    %169 = arith.mulf %157, %168 : vector<128x32xf32>
    %c0_174 = arith.constant 0 : index
    %c0_175 = arith.constant 0 : index
    %170 = vector.load %arg6[%c0_174, %c0_175] : memref<1x32xf32, #tpu.memory_space<vmem>>, vector<1x32xf32>
    %171 = vector.broadcast %170 : vector<1x32xf32> to vector<128x32xf32>
    %172 = arith.addf %169, %171 : vector<128x32xf32>
    %173 = arith.addf %172, %3 : vector<128x32xf32>
    %cst_176 = arith.constant 0.000000e+00 : f32
    %174 = vector.broadcast %cst_176 : f32 to vector<128x32xf32>
    %175 = arith.minimumf %173, %174 : vector<128x32xf32>
    %176 = math.exp %175 : vector<128x32xf32>
    %cst_177 = arith.constant 1.000000e+00 : f32
    %177 = vector.broadcast %cst_177 : f32 to vector<128x32xf32>
    %178 = arith.subf %176, %177 : vector<128x32xf32>
    %cst_178 = arith.constant 1.67326319 : f32
    %179 = vector.broadcast %cst_178 : f32 to vector<128x32xf32>
    %180 = arith.mulf %179, %178 : vector<128x32xf32>
    %cst_179 = arith.constant 0.000000e+00 : f32
    %181 = vector.broadcast %cst_179 : f32 to vector<128x32xf32>
    %182 = arith.cmpf ogt, %173, %181 : vector<128x32xf32>
    %183 = arith.select %182, %173, %180 : vector<128x32xi1>, vector<128x32xf32>
    %cst_180 = arith.constant 1.05070102 : f32
    %184 = vector.broadcast %cst_180 : f32 to vector<128x32xf32>
    %185 = arith.mulf %184, %183 : vector<128x32xf32>
    %186 = vector.shape_cast %185 : vector<128x32xf32> to vector<2x8x8x32xf32>
    %c0_181 = arith.constant 0 : index
    %c0_182 = arith.constant 0 : index
    %c0_183 = arith.constant 0 : index
    %c0_184 = arith.constant 0 : index
    %187 = vector.load %arg7[%c0_181, %c0_182, %c0_183, %c0_184] : memref<2x8x8x32xf32, #tpu.memory_space<vmem>>, vector<2x8x8x32xf32>
    tpu.vector_store %arg7[%c0_181, %c0_182, %c0_183, %c0_184], %186 {strides = array<i32>} : memref<2x8x8x32xf32, #tpu.memory_space<vmem>>, vector<2x8x8x32xf32>,
    return
  }
}

</mosaic_0001>

<bundles_post_ra>
// kernel: residual_block_forward.1
= control target key start
LH: loop header
LB: loop body
LE: loop exit
PB: predicated region body
PF: predicated region fallthrough
CT: control target
= control target key end

     0   :  { %vm28_vm0 = vcmask 257024   ;;  %v8180_v3 = vmov 0   ;;  %vm311_vm1 = vsmask.f32 7938  ;;  %vm316_vm2 = vcmask 253952   ;;  %s11085_s0 = inlined_call_operand.vmem [shape: f32[2,8,8,32], index: 0, kind: input, shape index: {}]   ;;  %s11086_s1 = inlined_call_operand.vmem [shape: bf16[9,32,32], index: 1, kind: input, shape index: {}]   ;;  %s11087_s2 = inlined_call_operand.vmem [shape: f32[1,32], index: 2, kind: input, shape index: {}]   ;;  %s11088_s3 = inlined_call_operand.vmem [shape: f32[1,32], index: 3, kind: input, shape index: {}]   ;;  %s11089_s4 = inlined_call_operand.vmem [shape: bf16[9,32,32], index: 4, kind: input, shape index: {}]   ;;  %s11090_s5 = inlined_call_operand.vmem [shape: f32[1,32], index: 5, kind: input, shape index: {}]   ;;  %s11091_s6 = inlined_call_operand.vmem [shape: f32[1,32], index: 6, kind: input, shape index: {}]   ;;  %s11092_s7 = inlined_call_operand.hbm [shape: f32[2,8,8,32], index: 7, kind: output, shape index: {}]  }
   0x1   :  { %v7989_v0 = vld [vmem:[%s11086_s1 + $0x18] sm:$0xff]   ;;  %v7990_v1 = vld [vmem:[%s11086_s1 + $0x8] sm:$0xff]   ;;  %v7991_v2 = vld [vmem:[%s11086_s1 + $0x10] sm:$0xff]   ;;  %29 = vst.msk [vmem:[#allocation2] sm:$0xf] %vm28_vm0, %v8180_v3  ;;  %v11107_v19 = vmov 0 }
   0x2   :  { %7625 = vmatprep.subr.bf16.mxu0 %v7989_v0  ;;  %30 = vst.msk [vmem:[#allocation2 + $0x4] sm:$0xf] %vm28_vm0, %v8180_v3  ;;  %31 = vst.msk [vmem:[#allocation2 + $0x8] sm:$0xf] %vm28_vm0, %v8180_v3  ;;  %7645 = vmatprep.subr.bf16.mxu1 %v7990_v1  ;;  %v7992_v4 = vld [vmem:[%s11086_s1] sm:$0xff]   ;;  %v8282_v6 = vld [vmem:[%s11086_s1 + $0x28] sm:$0xff]  }
   0x3   :  { %32 = vst.msk [vmem:[#allocation2 + $0xc] sm:$0xf] %vm28_vm0, %v8180_v3  ;;  %33 = vst.msk [vmem:[#allocation2 + $0x10] sm:$0xf] %vm28_vm0, %v8180_v3  ;;  %7626 = vmatpush3.bf16.msra.mxu0 %v7989_v0  ;;  %7646 = vmatpush3.bf16.msra.mxu1 %v7990_v1  ;;  %v69_v5 = vld [vmem:[%s11085_s0] sm:$0xff]  ;;  %v70_v8 = vld [vmem:[%s11085_s0 + $0x8] sm:$0xff] }
   0x4   :  { %34 = vst.msk [vmem:[#allocation2 + $0x14] sm:$0xf] %vm28_vm0, %v8180_v3  ;;  %35 = vst.msk [vmem:[#allocation2 + $0x18] sm:$0xf] %vm28_vm0, %v8180_v3  ;;  %7627 = vmatprep.subr.bf16.mxu0 %v7991_v2  ;;  %7647 = vmatprep.subr.bf16.mxu1 %v7992_v4  ;;  %v7413_v7 = vpack.c.bf16 %v69_v5, %v69_v5  ;;  %vm317_vm3 = vsmask.f32 256  ;;  %v7414_v12 = vpack.c.bf16 %v70_v8, %v70_v8 }
   0x5   :  { %36 = vst.msk [vmem:[#allocation2 + $0x1c] sm:$0xf] %vm28_vm0, %v8180_v3  ;;  %37 = vst.msk [vmem:[#allocation2 + $0x20] sm:$0xf] %vm28_vm0, %v8180_v3  ;;  %vm448_vm4 = vsmask.f32 3328 }
   0x6   :  { %38 = vst.msk [vmem:[#allocation2 + $0x24] sm:$0xf] %vm28_vm0, %v8180_v3  ;;  %39 = vst.msk [vmem:[#allocation2 + $0x28] sm:$0xf] %vm28_vm0, %v8180_v3  ;;  %v150_v9 = vshrl.u32 %v7413_v7, 16  ;;  %v153_v10 = vshll.u32 %v7413_v7, 16 }
   0x7   :  { %40 = vst.msk [vmem:[#allocation2 + $0x2c] sm:$0xf] %vm28_vm0, %v8180_v3  ;;  %41 = vst.msk [vmem:[#allocation2 + $0x30] sm:$0xf] %vm28_vm0, %v8180_v3  ;;  %7628 = vmatpush3.bf16.msra.mxu0 %v7991_v2  ;;  %v71_v11 = vld [vmem:[%s11085_s0 + $0x10] sm:$0xff]  ;;  %v72_v13 = vld [vmem:[%s11085_s0 + $0x18] sm:$0xff]  ;;  %7648 = vmatpush3.bf16.msra.mxu1 %v7992_v4 }
   0x8   :  { %42 = vst.msk [vmem:[#allocation2 + $0x34] sm:$0xf] %vm28_vm0, %v8180_v3  ;;  %43 = vst.msk [vmem:[#allocation2 + $0x38] sm:$0xf] %vm28_vm0, %v8180_v3  ;;  %vm449_vm5 = vsmask.f32 7440  ;;  %7665 = vmatprep.subr.bf16.mxu0 %v8282_v6  ;;  %v7415_v14 = vpack.c.bf16 %v71_v11, %v71_v11  ;;  %v7416_v23 = vpack.c.bf16 %v72_v13, %v72_v13 }
   0x9   :  { %44 = vst.msk [vmem:[#allocation2 + $0x3c] sm:$0xf] %vm28_vm0, %v8180_v3  ;;  %45 = vst.msk [vmem:[#allocation2 + $0x40] sm:$0xf] %vm28_vm0, %v8180_v3  ;;  %v73_v15 = vld [vmem:[%s11085_s0 + $0x20] sm:$0xff]  ;;  %v74_v16 = vld [vmem:[%s11085_s0 + $0x28] sm:$0xff] }
   0xa   :  { %46 = vst.msk [vmem:[#allocation2 + $0x44] sm:$0xf] %vm28_vm0, %v8180_v3  ;;  %47 = vst.msk [vmem:[#allocation2 + $0x48] sm:$0xf] %vm28_vm0, %v8180_v3  ;;  %v75_v17 = vld [vmem:[%s11085_s0 + $0x30] sm:$0xff]  ;;  %v152_v18 = vrot.slane %v150_v9, 7  ;;  %v7417_v24 = vpack.c.bf16 %v73_v15, %v73_v15  ;;  %v8319_v30 = vpack.c.bf16 %v74_v16, %v74_v16 }
   0xb   :  { %48 = vst.msk [vmem:[#allocation2 + $0x4c] sm:$0xf] %vm28_vm0, %v8180_v3  ;;  %49 = vst.msk [vmem:[#allocation2 + $0x50] sm:$0xf] %vm28_vm0, %v8180_v3  ;;  %v313_v20 = vld [vmem:[#allocation2 + $0x8] sm:$0xf]  ;;  %v8321_v31 = vpack.c.bf16 %v75_v17, %v75_v17 }
   0xc   :  { %50 = vst.msk [vmem:[#allocation2 + $0x54] sm:$0xf] %vm28_vm0, %v8180_v3  ;;  %51 = vst.msk [vmem:[#allocation2 + $0x58] sm:$0xf] %vm28_vm0, %v8180_v3  ;;  %v319_v21 = vld [vmem:[#allocation2 + $0xc] sm:$0x1]  ;;  %v155_v32 = vor.u32 %v153_v10, %v152_v18 }
   0xd   :  { %52 = vst.msk [vmem:[#allocation2 + $0x5c] sm:$0xf] %vm28_vm0, %v8180_v3  ;;  %53 = vst.msk [vmem:[#allocation2 + $0x60] sm:$0xf] %vm28_vm0, %v8180_v3  ;;  %v158_v22 = vshrl.u32 %v7414_v12, 16  ;;  %v11110_v25 = vmov 0 }
   0xe   :  { %54 = vst.msk [vmem:[#allocation2 + $0x64] sm:$0xf] %vm28_vm0, %v8180_v3  ;;  %55 = vst.msk [vmem:[#allocation2 + $0x68] sm:$0xf] %vm28_vm0, %v8180_v3  ;;  %v8315_v26 = vld [vmem:[#allocation2] sm:$0xf] }
   0xf   :  { %56 = vst.msk [vmem:[#allocation2 + $0x6c] sm:$0xf] %vm28_vm0, %v8180_v3  ;;  %57 = vst.msk [vmem:[#allocation2 + $0x70] sm:$0xf] %vm28_vm0, %v8180_v3  ;;  %v8317_v27 = vld [vmem:[#allocation2 + $0x4] sm:$0x1] }
  0x10   :  { %58 = vst.msk [vmem:[#allocation2 + $0x74] sm:$0xf] %vm28_vm0, %v8180_v3  ;;  %59 = vst.msk [vmem:[#allocation2 + $0x78] sm:$0xf] %vm28_vm0, %v8180_v3  ;;  %v161_v28 = vshll.u32 %v7414_v12, 16  ;;  %v166_v29 = vshrl.u32 %v7415_v14, 16 }
  0x11   :  { %60 = vst.msk [vmem:[#allocation2 + $0x7c] sm:$0xf] %vm28_vm0, %v8180_v3  ;;  %61 = vst.msk [vmem:[#allocation2 + $0x80] sm:$0xf] %vm28_vm0, %v8180_v3  ;;  %v156_v33 = vrot.slane %v152_v18, 4  ;;  %v452_v34 = vshrl.u32 %v8315_v26, 16 }
  0x12   :  { %62 = vst.msk [vmem:[#allocation2 + $0x84] sm:$0xf] %vm28_vm0, %v8180_v3  ;;  %63 = vst.msk [vmem:[#allocation2 + $0x88] sm:$0xf] %vm28_vm0, %v8180_v3  ;;  %v455_v35 = vshll.u32 %v8315_v26, 16  ;;  %v461_v36 = vshll.u32 %v8317_v27, 16 }
  0x13   :  { %64 = vst.msk [vmem:[#allocation2 + $0x8c] sm:$0xf] %vm28_vm0, %v8180_v3  ;;  %65 = vst.msk [vmem:[#allocation2 + $0x90] sm:$0xf] %vm28_vm0, %v8180_v3  ;;  %v1064_v37 = vrot.slane %v8317_v27, 5  ;;  %v160_v38 = vrot.slane %v158_v22, 7 }
  0x14   :  { %66 = vst.msk [vmem:[#allocation2 + $0x94] sm:$0xf] %vm28_vm0, %v8180_v3  ;;  %67 = vst.msk [vmem:[#allocation2 + $0x98] sm:$0xf] %vm28_vm0, %v8180_v3  ;;  %v168_v39 = vrot.slane %v166_v29, 7  ;;  %v454_v42 = vrot.slane %v452_v34, 4 }
  0x15   :  { %68 = vst.msk [vmem:[#allocation2 + $0x9c] sm:$0xf] %vm28_vm0, %v8180_v3  ;;  %vm8305_vm6 = vmand %vm28_vm0, %vm311_vm1  ;;  %v457_v43 = vrot.slane %v455_v35, 5  ;;  %v322_v44 = vld [vmem:[#allocation2 + $0x10] sm:$0xf]  ;;  %v8331_v46 = vrot.slane %v461_v36, 5  ;;  %v163_v47 = vor.u32 %v161_v28, %v160_v38 }
  0x16   :  { %v11108_v19 = vsel %vm8305_vm6, 4294967295, %v11107_v19  ;;  %vm8311_vm7 = vmand %vm316_vm2, %vm317_vm3  ;;  %v314_v40 = vsel %vm8305_vm6, %v155_v32, %v313_v20  ;;  %v325_v45 = vld [vmem:[#allocation2 + $0x14] sm:$0x1]  ;;  %vm11101_vm8 = vcmask 261120   ;;  %v164_v48 = vrot.slane %v160_v38, 4  ;;  %v77_v17 = vld [vmem:[%s11085_s0 + $0x40] sm:$0xff] }
  0x17   :  { %11109 = vst [vmem:[#allocation6_spill] sm:$0xff] %v11108_v19  ;;  %v11111_v25 = vsel %vm8311_vm7, 4294967295, %v11110_v25  ;;  %v320_v41 = vsel %vm8311_vm7, %v156_v33, %v319_v21  ;;  %315 = vst [vmem:[#allocation2 + $0x8] sm:$0xf] %v314_v40  ;;  %v169_v49 = vshll.u32 %v7415_v14, 16  ;;  %v458_v51 = vor.u32 %v457_v43, %v454_v42 }
  0x18   :  { %11112 = vst [vmem:[#allocation7_spill] sm:$0xff] %v11111_v25  ;;  %321 = vst [vmem:[#allocation2 + $0xc] sm:$0x1] %v320_v41  ;;  %v331_v50 = vld [vmem:[#allocation2 + $0x1c] sm:$0x1]  ;;  %v172_v52 = vrot.slane %v168_v39, 4  ;;  %v323_v57 = vsel %vm8305_vm6, %v163_v47, %v322_v44  ;;  %v326_v58 = vsel %vm8311_vm7, %v164_v48, %v325_v45  ;;  %v8386_v48 = vpack.c.bf16 %v77_v17, %v77_v17 }
  0x19   :  { %v328_v53 = vld [vmem:[#allocation2 + $0x18] sm:$0xf]  ;;  %v174_v54 = vshrl.u32 %v7416_v23, 16  ;;  %v177_v55 = vshll.u32 %v7416_v23, 16  ;;  %v171_v56 = vor.u32 %v169_v49, %v168_v39  ;;  %v182_v59 = vshrl.u32 %v7417_v24, 16  ;;  %vm8339_vm9 = vmor %vm448_vm4, %vm449_vm5 }
  0x1a   :  { %v11113_v60 = vmov 0  ;;  %v8343_v61 = vrot.slane %v458_v51, 4  ;;  %324 = vst [vmem:[#allocation2 + $0x10] sm:$0xf] %v323_v57  ;;  %327 = vst [vmem:[#allocation2 + $0x14] sm:$0x1] %v326_v58  ;;  %v332_v62 = vsel %vm8311_vm7, %v172_v52, %v331_v50 }
  0x1b   :  { %v11114_v60 = vsel %vm8339_vm9, 4294967295, %v11113_v60  ;;  %v176_v63 = vrot.slane %v174_v54, 7  ;;  %v185_v0 = vshll.u32 %v7417_v24, 16  ;;  %v329_v1 = vsel %vm8305_vm6, %v171_v56, %v328_v53  ;;  %333 = vst [vmem:[#allocation2 + $0x1c] sm:$0x1] %v332_v62  ;;  %v8002_v54 = vld [vmem:[%s11086_s1 + $0x38] sm:$0xff]  }
  0x1c   :  { %11115 = vst [vmem:[#allocation8_spill] sm:$0xff] %v11114_v60  ;;  %v184_v2 = vrot.slane %v182_v59, 7  ;;  %v334_v3 = vld [vmem:[#allocation2 + $0x20] sm:$0xf]  ;;  %v337_v4 = vld [vmem:[#allocation2 + $0x24] sm:$0x1]  ;;  %v464_v11 = vsel %vm8339_vm9, %v8343_v61, %v8331_v46  ;;  %7685 = vmatprep.subr.bf16.mxu1 %v8002_v54 }
  0x1d   :  { %v190_v5 = vshrl.u32 %v8319_v30, 16  ;;  %330 = vst [vmem:[#allocation2 + $0x18] sm:$0xf] %v329_v1  ;;  %v179_v7 = vor.u32 %v177_v55, %v176_v63  ;;  %v180_v8 = vrot.slane %v176_v63, 4  ;;  %v193_v9 = vshll.u32 %v8319_v30, 16 }
  0x1e   :  { %v198_v10 = vshrl.u32 %v8321_v31, 16  ;;  %v187_v12 = vor.u32 %v185_v0, %v184_v2  ;;  %v188_v13 = vrot.slane %v184_v2, 4  ;;  %v340_v14 = vld [vmem:[#allocation2 + $0x28] sm:$0xf]  ;;  %v343_v15 = vld [vmem:[#allocation2 + $0x2c] sm:$0x1] }
  0x1f   :  { %v8356_v16 = vrot.slane %v190_v5, 7  ;;  %v413_v18 = vld [vmem:[#allocation2 + $0x8] sm:$0xf]  ;;  %v8361_v20 = vld [vmem:[#allocation2 + $0xc] sm:$0x1]  ;;  %v335_v21 = vsel %vm8305_vm6, %v179_v7, %v334_v3  ;;  %v338_v22 = vsel %vm8311_vm7, %v180_v8, %v337_v4  ;;  %v201_v24 = vshll.u32 %v8321_v31, 16 }
  0x20   :  { %v8367_v23 = vrot.slane %v198_v10, 7  ;;  %v466_v28 = vshrl.u32 %v413_v18, 16  ;;  %v469_v29 = vshll.u32 %v413_v18, 16  ;;  %v475_v30 = vshll.u32 %v8361_v20, 16  ;;  %336 = vst [vmem:[#allocation2 + $0x20] sm:$0xf] %v335_v21 }
  0x21   :  { %v1068_v32 = vrot.slane %v8361_v20, 5  ;;  %339 = vst [vmem:[#allocation2 + $0x24] sm:$0x1] %v338_v22  ;;  %v346_v33 = vld [vmem:[#allocation2 + $0x30] sm:$0xf]  ;;  %v6901_v34 = vcombine.low %v8315_v26, %v413_v18  ;;  %v341_v35 = vsel %vm8305_vm6, %v187_v12, %v340_v14  ;;  %v344_v36 = vsel %vm8311_vm7, %v188_v13, %v343_v15 }
  0x22   :  { %v195_v38 = vor.u32 %v193_v9, %v8356_v16  ;;  %v468_v31 = vrot.slane %v466_v28, 4  ;;  %v471_v39 = vrot.slane %v469_v29, 5  ;;  %v477_v40 = vrot.slane %v475_v30, 5  ;;  %v414_v41 = vld [vmem:[#allocation2 + $0x10] sm:$0xf] }
  0x23   :  { %342 = vst [vmem:[#allocation2 + $0x28] sm:$0xf] %v341_v35  ;;  %345 = vst [vmem:[#allocation2 + $0x2c] sm:$0x1] %v344_v36  ;;  %v196_v42 = vrot.slane %v8356_v16, 4  ;;  %7649 = vmatprep.mubr.msk.bf16.mxu1 %vm11101_vm8, %v6901_v34  ;;  %v480_v44 = vshrl.u32 %v414_v41, 16  ;;  %v203_v53 = vor.u32 %v201_v24, %v8367_v23 }
  0x24   :  { %v8380_v43 = vld [vmem:[#allocation2 + $0x14] sm:$0x1]  ;;  %v8382_v26 = vld [vmem:[#allocation2 + $0x1c] sm:$0x1]  ;;  %v483_v45 = vshll.u32 %v414_v41, 16  ;;  %v347_v47 = vsel %vm8305_vm6, %v195_v38, %v346_v33  ;;  %v472_v49 = vor.u32 %v471_v39, %v468_v31  ;;  %v204_v24 = vrot.slane %v8367_v23, 4 }
  0x25   :  { %v415_v50 = vld [vmem:[#allocation2 + $0x18] sm:$0xf]  ;;  %v489_v51 = vshll.u32 %v8380_v43, 16  ;;  %v503_v52 = vshll.u32 %v8382_v26, 16  ;;  %348 = vst [vmem:[#allocation2 + $0x30] sm:$0xf] %v347_v47 }
  0x26   :  { %v482_v55 = vrot.slane %v480_v44, 4  ;;  %v485_v56 = vrot.slane %v483_v45, 5  ;;  %v494_v57 = vshrl.u32 %v415_v50, 16  ;;  %v497_v58 = vshll.u32 %v415_v50, 16  ;;  %v349_v8 = vld [vmem:[#allocation2 + $0x34] sm:$0x1] }
  0x27   :  { %v473_v59 = vrot.slane %v472_v49, 4  ;;  %v491_v62 = vrot.slane %v489_v51, 5  ;;  %v505_v63 = vrot.slane %v503_v52, 5  ;;  %v1072_v0 = vrot.slane %v8380_v43, 5  ;;  %v416_v5 = vld [vmem:[#allocation2 + $0x20] sm:$0xf] }
  0x28   :  { %v486_v1 = vor.u32 %v485_v56, %v482_v55  ;;  %v496_v2 = vrot.slane %v494_v57, 4  ;;  %v499_v3 = vrot.slane %v497_v58, 5  ;;  %v6902_v4 = vcombine.low %v414_v41, %v415_v50  ;;  %v8395_v7 = vld [vmem:[#allocation2 + $0x24] sm:$0x1]  ;;  %v352_v14 = vld [vmem:[#allocation2 + $0x38] sm:$0xf] }
  0x29   :  { %v478_v9 = vsel %vm8339_vm9, %v473_v59, %v477_v40  ;;  %v508_v10 = vshrl.u32 %v416_v5, 16  ;;  %v511_v12 = vshll.u32 %v416_v5, 16  ;;  %v517_v13 = vshll.u32 %v8395_v7, 16  ;;  %v8003_v15 = vld [vmem:[%s11086_s1 + $0x30] sm:$0xff]   ;;  %v355_v34 = vld [vmem:[#allocation2 + $0x3c] sm:$0x1] }
  0x2a   :  { %v6883_v16 = vcombine.low %v464_v11, %v478_v9  ;;  %v487_v17 = vrot.slane %v486_v1, 4  ;;  %v500_v18 = vor.u32 %v499_v3, %v496_v2  ;;  %7650 = vmatmul.mubr.msk.bf16.vlgmr.msra.gmra.mxu1 %vm11101_vm8, %v6902_v4  ;;  %v417_v21 = vld [vmem:[#allocation2 + $0x28] sm:$0xf]  ;;  %v8409_v22 = vld [vmem:[#allocation2 + $0x2c] sm:$0x1]  ;;  %v350_v39 = vsel %vm8311_vm7, %v196_v42, %v349_v8  ;;  %v7998_v52 = vld [vmem:[%s11086_s1 + $0x20] sm:$0xff]  }
  0x2b   :  { %v510_v28 = vrot.slane %v508_v10, 4  ;;  %v513_v29 = vrot.slane %v511_v12, 5  ;;  %v519_v30 = vrot.slane %v517_v13, 5  ;;  %v522_v33 = vshrl.u32 %v417_v21, 16  ;;  %7686 = vmatpush3.bf16.msra.mxu1 %v8002_v54  ;;  %351 = vst [vmem:[#allocation2 + $0x34] sm:$0x1] %v350_v39 }
  0x2c   :  { %7629 = vmatprep.mubr.msk.bf16.mxu0 %vm11101_vm8, %v6883_v16  ;;  %v492_v46 = vsel %vm8339_vm9, %v487_v17, %v491_v62  ;;  %v501_v61 = vrot.slane %v500_v18, 4  ;;  %v525_v11 = vshll.u32 %v417_v21, 16  ;;  %v531_v35 = vshll.u32 %v8409_v22, 16  ;;  %v8416_v36 = vld [vmem:[#allocation2 + $0x30] sm:$0xf]  ;;  %7687 = vmatprep.subr.bf16.mxu1 %v8003_v15  ;;  %v78_v57 = vld [vmem:[%s11085_s0 + $0x48] sm:$0xff] }
  0x2d   :  { %v514_v38 = vor.u32 %v513_v29, %v510_v28  ;;  %v524_v23 = vrot.slane %v522_v33, 4  ;;  %v6903_v31 = vcombine.low %v416_v5, %v417_v21  ;;  %v353_v45 = vsel %vm8305_vm6, %v203_v53, %v352_v14  ;;  %v8424_v47 = vld [vmem:[#allocation2 + $0x50] sm:$0xf]  ;;  %v367_v1 = vld [vmem:[#allocation2 + $0x5c] sm:$0x1]  ;;  %v8454_v10 = vld [vmem:[%s11086_s1 + $0x48] sm:$0xff]  }
  0x2e   :  { %v506_v40 = vsel %vm8339_vm9, %v501_v61, %v505_v63  ;;  %v527_v41 = vrot.slane %v525_v11, 5  ;;  %v533_v44 = vrot.slane %v531_v35, 5  ;;  %354 = vst [vmem:[#allocation2 + $0x38] sm:$0xf] %v353_v45  ;;  %v356_v51 = vsel %vm8311_vm7, %v204_v24, %v355_v34  ;;  %v79_v58 = vld [vmem:[%s11085_s0 + $0x50] sm:$0xff]  ;;  %v8461_v18 = vld [vmem:[%s11086_s1 + $0x58] sm:$0xff]  }
  0x2f   :  { %v6884_v49 = vcombine.low %v492_v46, %v506_v40  ;;  %v515_v50 = vrot.slane %v514_v38, 4  ;;  %7653 = vmatprep.mubr.msk.bf16.mxu1 %vm11101_vm8, %v6903_v31  ;;  %v536_v42 = vshrl.u32 %v8416_v36, 16  ;;  %7688 = vmatpush3.bf16.msra.mxu1 %v8003_v15  ;;  %357 = vst [vmem:[#allocation2 + $0x3c] sm:$0x1] %v356_v51  ;;  %v539_v53 = vshll.u32 %v8416_v36, 16  ;;  %v80_v35 = vld [vmem:[%s11085_s0 + $0x58] sm:$0xff] }
  0x30   :  { %v528_v54 = vor.u32 %v527_v41, %v524_v23  ;;  %v214_v55 = vshrl.u32 %v8386_v48, 16  ;;  %v217_v56 = vshll.u32 %v8386_v48, 16  ;;  %v1076_v59 = vrot.slane %v8382_v26, 5  ;;  %v364_v63 = vld [vmem:[#allocation2 + $0x58] sm:$0xf]  ;;  %7725 = vmatprep.subr.bf16.mxu1 %v8461_v18  ;;  %v81_v45 = vld [vmem:[%s11085_s0 + $0x60] sm:$0xff] }
  0x31   :  { %7630 = vmatmul.mubr.msk.bf16.vlgmr.msra.gmra.mxu0 %vm11101_vm8, %v6884_v49  ;;  %v538_v62 = vrot.slane %v536_v42, 4  ;;  %v564_v2 = vshrl.u32 %v8424_v47, 16  ;;  %v567_v3 = vshll.u32 %v8424_v47, 16  ;;  %v520_v48 = vsel %vm8339_vm9, %v515_v50, %v519_v30  ;;  %v8449_v9 = vld [vmem:[#allocation2 + $0x54] sm:$0x1] }
  0x32   :  { %7666 = vmatpush3.bf16.msra.mxu0 %v8282_v6  ;;  %v529_v4 = vrot.slane %v528_v54, 4  ;;  %v541_v5 = vrot.slane %v539_v53, 5  ;;  %v216_v8 = vrot.slane %v214_v55, 7  ;;  %v7422_v14 = vpack.c.bf16 %v78_v57, %v78_v57  ;;  %v8463_v24 = vld [vmem:[#allocation2 + $0x34] sm:$0x1] }
  0x33   :  { %v566_v12 = vrot.slane %v564_v2, 4  ;;  %v569_v13 = vrot.slane %v567_v3, 5  ;;  %7667 = vmatprep.subr.bf16.mxu0 %v7998_v52  ;;  %v573_v28 = vshll.u32 %v8449_v9, 16  ;;  %v7423_v29 = vpack.c.bf16 %v79_v58, %v79_v58  ;;  %v370_v41 = vld [vmem:[#allocation2 + $0x60] sm:$0xf] }
  0x34   :  { %v534_v6 = vsel %vm8339_vm9, %v529_v4, %v533_v44  ;;  %v542_v15 = vor.u32 %v541_v5, %v538_v62  ;;  %v219_v16 = vor.u32 %v217_v56, %v216_v8  ;;  %v220_v17 = vrot.slane %v216_v8, 4  ;;  %v373_v44 = vld [vmem:[#allocation2 + $0x64] sm:$0x1]  ;;  %v82_v62 = vld [vmem:[%s11085_s0 + $0x68] sm:$0xff] }
  0x35   :  { %v6885_v21 = vcombine.low %v520_v48, %v534_v6  ;;  %v222_v30 = vshrl.u32 %v7422_v14, 16  ;;  %v419_v33 = vld [vmem:[#allocation2 + $0x38] sm:$0xf]  ;;  %v545_v34 = vshll.u32 %v8463_v24, 16  ;;  %v570_v11 = vor.u32 %v569_v13, %v566_v12  ;;  %v376_v12 = vld [vmem:[#allocation2 + $0x68] sm:$0xf] }
  0x36   :  { %v365_v46 = vsel %vm8305_vm6, %v219_v16, %v364_v63  ;;  %v368_v61 = vsel %vm8311_vm7, %v220_v17, %v367_v1  ;;  %7668 = vmatpush3.bf16.msra.mxu0 %v7998_v52  ;;  %v8476_v38 = vld [vmem:[#allocation2 + $0x3c] sm:$0x1]  ;;  %v543_v23 = vrot.slane %v542_v15, 4  ;;  %v550_v31 = vshrl.u32 %v419_v33, 16  ;;  %v83_v63 = vld [vmem:[%s11085_s0 + $0x70] sm:$0xff] }
  0x37   :  { %7633 = vmatprep.mubr.msk.bf16.mxu0 %vm11101_vm8, %v6885_v21  ;;  %v553_v39 = vshll.u32 %v419_v33, 16  ;;  %v6904_v40 = vcombine.low %v8416_v36, %v419_v33  ;;  %366 = vst [vmem:[#allocation2 + $0x58] sm:$0xf] %v365_v46  ;;  %369 = vst [vmem:[#allocation2 + $0x5c] sm:$0x1] %v368_v61  ;;  %7705 = vmatprep.subr.bf16.mxu0 %v8454_v10  ;;  %v547_v49 = vrot.slane %v545_v34, 5 }
  0x38   :  { %v559_v50 = vshll.u32 %v8476_v38, 16  ;;  %v224_v51 = vrot.slane %v222_v30, 7  ;;  %v225_v42 = vshll.u32 %v7422_v14, 16  ;;  %v552_v52 = vrot.slane %v550_v31, 4  ;;  %v379_v16 = vld [vmem:[#allocation2 + $0x6c] sm:$0x1] }
  0x39   :  { %v555_v54 = vrot.slane %v553_v39, 5  ;;  %7654 = vmatmul.mubr.msk.bf16.gmra.mxu1 %vm11101_vm8, %v6904_v40  ;;  %v8485_v36 = vrot.slane %v573_v28, 5  ;;  %v230_v53 = vshrl.u32 %v7423_v29, 16  ;;  %v8487_v56 = vrot.slane %v570_v11, 4 }
  0x3a   :  { %v561_v55 = vrot.slane %v559_v50, 5  ;;  %v227_v57 = vor.u32 %v225_v42, %v224_v51  ;;  %v228_v58 = vrot.slane %v224_v51, 4  ;;  %v233_v3 = vshll.u32 %v7423_v29, 16  ;;  %v382_v50 = vld [vmem:[#allocation2 + $0x70] sm:$0xf] }
  0x3b   :  { %v556_v1 = vor.u32 %v555_v54, %v552_v52  ;;  %v232_v2 = vrot.slane %v230_v53, 7  ;;  %v7424_v48 = vpack.c.bf16 %v80_v35, %v80_v35  ;;  %v548_v4 = vsel %vm8339_vm9, %v543_v23, %v547_v49  ;;  %v385_v51 = vld [vmem:[#allocation2 + $0x74] sm:$0x1] }
  0x3c   :  { %v371_v5 = vsel %vm8305_vm6, %v227_v57, %v370_v41  ;;  %v374_v8 = vsel %vm8311_vm7, %v228_v58, %v373_v44  ;;  %v7425_v13 = vpack.c.bf16 %v81_v45, %v81_v45  ;;  %v8503_v33 = vpack.c.bf16 %v82_v62, %v82_v62  ;;  %v388_v58 = vld [vmem:[#allocation2 + $0x78] sm:$0xf]  ;;  %v391_v62 = vld [vmem:[#allocation2 + $0x7c] sm:$0x1] }
  0x3d   :  { %v557_v14 = vrot.slane %v556_v1, 4  ;;  %v235_v6 = vor.u32 %v233_v3, %v232_v2  ;;  %v236_v15 = vrot.slane %v232_v2, 4  ;;  %372 = vst [vmem:[#allocation2 + $0x60] sm:$0xf] %v371_v5  ;;  %375 = vst [vmem:[#allocation2 + $0x64] sm:$0x1] %v374_v8  ;;  %v8505_v34 = vpack.c.bf16 %v83_v63, %v83_v63 }
  0x3e   :  { %v238_v17 = vshrl.u32 %v7424_v48, 16  ;;  %v421_v21 = vld [vmem:[#allocation2 + $0x58] sm:$0xf]  ;;  %v8501_v28 = vld [vmem:[#allocation2 + $0x5c] sm:$0x1]  ;;  %v241_v29 = vshll.u32 %v7424_v48, 16  ;;  %v576_v1 = vsel %vm8339_vm9, %v8487_v56, %v8485_v36 }
  0x3f   :  { %v246_v30 = vshrl.u32 %v7425_v13, 16  ;;  %v562_v46 = vsel %vm8339_vm9, %v557_v14, %v561_v55  ;;  %v578_v61 = vshrl.u32 %v421_v21, 16  ;;  %v581_v11 = vshll.u32 %v421_v21, 16 }
  0x40   :  { %v587_v35 = vshll.u32 %v8501_v28, 16  ;;  %v6886_v23 = vcombine.low %v548_v4, %v562_v46  ;;  %v6905_v31 = vcombine.low %v8424_v47, %v421_v21  ;;  %v377_v39 = vsel %vm8305_vm6, %v235_v6, %v376_v12  ;;  %v403_v46 = vld [vmem:[#allocation2 + $0x8c] sm:$0x1] }
  0x41   :  { %v380_v40 = vsel %vm8311_vm7, %v236_v15, %v379_v16  ;;  %vm1059_vm10 = vcmask 1042432   ;;  %vm1060_vm11 = vcmask 1046532   ;;  %v580_v41 = vrot.slane %v578_v61, 4  ;;  %378 = vst [vmem:[#allocation2 + $0x68] sm:$0xf] %v377_v39 }
  0x42   :  { %v583_v44 = vrot.slane %v581_v11, 5  ;;  %v589_v45 = vrot.slane %v587_v35, 5  ;;  %381 = vst [vmem:[#allocation2 + $0x6c] sm:$0x1] %v380_v40  ;;  %v240_v49 = vrot.slane %v238_v17, 7  ;;  %7634 = vmatmul.mubr.msk.bf16.gmra.mxu0 %vm11101_vm8, %v6886_v23  ;;  %7657 = vmatprep.mubr.msk.bf16.mxu1 %vm11101_vm8, %v6905_v31  ;;  %v248_v47 = vrot.slane %v246_v30, 7  ;;  %vm8551_vm12 = vmor %vm1059_vm10, %vm1060_vm11 }
  0x43   :  { %v249_v42 = vshll.u32 %v7425_v13, 16  ;;  %v254_v52 = vshrl.u32 %v8503_v33, 16  ;;  %v257_v54 = vshll.u32 %v8503_v33, 16  ;;  %v262_v63 = vshrl.u32 %v8505_v34, 16  ;;  %v394_v16 = vld [vmem:[#allocation2 + $0x80] sm:$0xf] }
  0x44   :  { %v584_v53 = vor.u32 %v583_v44, %v580_v41  ;;  %v243_v55 = vor.u32 %v241_v29, %v240_v49  ;;  %v244_v57 = vrot.slane %v240_v49, 4  ;;  %v422_v2 = vld [vmem:[#allocation2 + $0x60] sm:$0xf]  ;;  %v8524_v3 = vld [vmem:[#allocation2 + $0x64] sm:$0x1]  ;;  %v252_v4 = vrot.slane %v248_v47, 4 }
  0x45   :  { %v251_v48 = vor.u32 %v249_v42, %v248_v47  ;;  %v256_v5 = vrot.slane %v254_v52, 7  ;;  %v592_v12 = vshrl.u32 %v422_v2, 16  ;;  %v595_v13 = vshll.u32 %v422_v2, 16  ;;  %v397_v33 = vld [vmem:[#allocation2 + $0x84] sm:$0x1]  ;;  %v76_v11 = vld [vmem:[%s11085_s0 + $0x38] sm:$0xff] }
  0x46   :  { %v585_v8 = vrot.slane %v584_v53, 4  ;;  %v601_v14 = vshll.u32 %v8524_v3, 16  ;;  %v383_v6 = vsel %vm8305_vm6, %v243_v55, %v382_v50  ;;  %v386_v15 = vsel %vm8311_vm7, %v244_v57, %v385_v51  ;;  %v1011_v61 = vld [vmem:[#allocation2] sm:$0xe]  ;;  %v400_v51 = vld [vmem:[#allocation2 + $0x88] sm:$0xf] }
  0x47   :  { %v389_v36 = vsel %vm8305_vm6, %v251_v48, %v388_v58  ;;  %v392_v56 = vsel %vm8311_vm7, %v252_v4, %v391_v62  ;;  %v594_v21 = vrot.slane %v592_v12, 4  ;;  %v597_v29 = vrot.slane %v595_v13, 5  ;;  %384 = vst [vmem:[#allocation2 + $0x70] sm:$0xf] %v383_v6  ;;  %387 = vst [vmem:[#allocation2 + $0x74] sm:$0x1] %v386_v15 }
  0x48   :  { %v590_v17 = vsel %vm8339_vm9, %v585_v8, %v589_v45  ;;  %v8537_v30 = vrot.slane %v601_v14, 5  ;;  %390 = vst [vmem:[#allocation2 + $0x78] sm:$0xf] %v389_v36  ;;  %393 = vst [vmem:[#allocation2 + $0x7c] sm:$0x1] %v392_v56  ;;  %v259_v39 = vor.u32 %v257_v54, %v256_v5  ;;  %v260_v40 = vrot.slane %v256_v5, 4 }
  0x49   :  { %v6887_v35 = vcombine.low %v576_v1, %v590_v17  ;;  %v423_v23 = vld [vmem:[#allocation2 + $0x68] sm:$0xf]  ;;  %v8542_v31 = vld [vmem:[#allocation2 + $0x6c] sm:$0x1]  ;;  %v264_v41 = vrot.slane %v262_v63, 7  ;;  %v598_v44 = vor.u32 %v597_v29, %v594_v21  ;;  %v265_v52 = vshll.u32 %v8505_v34, 16 }
  0x4a   :  { %v606_v45 = vshrl.u32 %v423_v23, 16  ;;  %v609_v49 = vshll.u32 %v423_v23, 16  ;;  %v615_v50 = vshll.u32 %v8542_v31, 16  ;;  %v1012_v47 = vld [vmem:[#allocation2 + $0x8] sm:$0xe]  ;;  %v6906_v42 = vcombine.low %v422_v2, %v423_v23  ;;  %v84_v34 = vld [vmem:[%s11085_s0 + $0x78] sm:$0xff] }
  0x4b   :  { %7637 = vmatprep.mubr.msk.bf16.mxu0 %vm11101_vm8, %v6887_v35  ;;  %v268_v53 = vrot.slane %v264_v41, 4  ;;  %v395_v55 = vsel %vm8305_vm6, %v259_v39, %v394_v16  ;;  %v1013_v57 = vld [vmem:[#allocation2 + $0x10] sm:$0xe]  ;;  %v599_v54 = vrot.slane %v598_v44, 4  ;;  %v11116_v63 = vmov 0 }
  0x4c   :  { %v608_v58 = vrot.slane %v606_v45, 4  ;;  %v611_v62 = vrot.slane %v609_v49, 5  ;;  %396 = vst [vmem:[#allocation2 + $0x80] sm:$0xf] %v395_v55  ;;  %v11117_v63 = vsel %vm8551_vm12, 4294967295, %v11116_v63  ;;  %v8555_v1 = vpack.c.bf16 %v76_v11, %v76_v11  ;;  %7658 = vmatmul.mubr.msk.bf16.gmra.mxu1 %vm11101_vm8, %v6906_v42 }
  0x4d   :  { %11118 = vst [vmem:[#allocation9_spill] sm:$0xff] %v11117_v63  ;;  %v267_v2 = vor.u32 %v265_v52, %v264_v41  ;;  %v398_v48 = vsel %vm8311_vm7, %v260_v40, %v397_v33  ;;  %v404_v4 = vsel %vm8311_vm7, %v268_v53, %v403_v46  ;;  %v6919_v5 = vrot.slane %v1011_v61, 9  ;;  %v1014_v44 = vld [vmem:[#allocation2 + $0x18] sm:$0xe] }
  0x4e   :  { %v612_v8 = vor.u32 %v611_v62, %v608_v58  ;;  %v617_v12 = vrot.slane %v615_v50, 5  ;;  %399 = vst [vmem:[#allocation2 + $0x84] sm:$0x1] %v398_v48  ;;  %405 = vst [vmem:[#allocation2 + $0x8c] sm:$0x1] %v404_v4  ;;  %v6920_v13 = vrot.slane %v1012_v47, 9  ;;  %v604_v6 = vsel %vm8339_vm9, %v599_v54, %v8537_v30 }
  0x4f   :  { %v6921_v14 = vrot.slane %v1013_v57, 9  ;;  %v424_v15 = vld [vmem:[#allocation2 + $0x70] sm:$0xf]  ;;  %v425_v36 = vld [vmem:[#allocation2 + $0x78] sm:$0xf]  ;;  %v401_v16 = vsel %vm8305_vm6, %v267_v2, %v400_v51  ;;  %v8576_v17 = vsel %vm8551_vm12, %v6919_v5, %v1064_v37  ;;  %v8578_v21 = vpack.c.bf16 %v84_v34, %v84_v34 }
  0x50   :  { %v8568_v56 = vld [vmem:[#allocation2 + $0x74] sm:$0x1]  ;;  %v613_v29 = vrot.slane %v612_v8, 4  ;;  %v8580_v33 = vld [vmem:[#allocation2 + $0x7c] sm:$0x1]  ;;  %v620_v46 = vshrl.u32 %v424_v15, 16  ;;  %v6907_v39 = vcombine.low %v424_v15, %v425_v36  ;;  %v8591_v55 = vsel %vm8551_vm12, %v6920_v13, %v1068_v32 }
  0x51   :  { %v623_v30 = vshll.u32 %v424_v15, 16  ;;  %v629_v61 = vshll.u32 %v8568_v56, 16  ;;  %402 = vst [vmem:[#allocation2 + $0x88] sm:$0xf] %v401_v16  ;;  %v634_v11 = vshrl.u32 %v425_v36, 16  ;;  %v637_v35 = vshll.u32 %v425_v36, 16 }
  0x52   :  { %v643_v23 = vshll.u32 %v8580_v33, 16  ;;  %v618_v27 = vsel %vm8339_vm9, %v613_v29, %v617_v12  ;;  %v622_v37 = vrot.slane %v620_v46, 4  ;;  %7661 = vmatprep.mubr.msk.bf16.mxu1 %vm11101_vm8, %v6907_v39  ;;  %v1015_v57 = vld [vmem:[#allocation2 + $0x20] sm:$0xe]  ;;  %v6939_v34 = vcombine.low %v8576_v17, %v8591_v55  ;;  %v8005_v8 = vld [vmem:[#allocation2 + $0x8] ss:$8 sps:$4 sm:$0xff]  }
  0x53   :  { %v625_v40 = vrot.slane %v623_v30, 5  ;;  %v631_v41 = vrot.slane %v629_v61, 5  ;;  %v6888_v45 = vcombine.low %v604_v6, %v618_v27  ;;  %v636_v49 = vrot.slane %v634_v11, 4  ;;  %v426_v47 = vld [vmem:[#allocation2 + $0x80] sm:$0xf] }
  0x54   :  { %v639_v50 = vrot.slane %v637_v35, 5  ;;  %v645_v51 = vrot.slane %v643_v23, 5  ;;  %v648_v52 = vshrl.u32 %v426_v47, 16  ;;  %v651_v53 = vshll.u32 %v426_v47, 16  ;;  %v1016_v12 = vld [vmem:[#allocation2 + $0x28] sm:$0xe] }
  0x55   :  { %v626_v42 = vor.u32 %v625_v40, %v622_v37  ;;  %7638 = vmatmul.mubr.msk.bf16.gmra.mxu0 %vm11101_vm8, %v6888_v45  ;;  %v8594_v58 = vld [vmem:[#allocation2 + $0x84] sm:$0x1]  ;;  %v8596_v62 = vld [vmem:[#allocation2 + $0x8c] sm:$0x1]  ;;  %v8604_v20 = vsel %vm8551_vm12, %v6921_v14, %v1072_v0  ;;  %v6922_v2 = vrot.slane %v1014_v44, 9  ;;  %v6923_v0 = vrot.slane %v1015_v57, 9 }
  0x56   :  { %v640_v54 = vor.u32 %v639_v50, %v636_v49  ;;  %v650_v48 = vrot.slane %v648_v52, 4  ;;  %v653_v4 = vrot.slane %v651_v53, 5  ;;  %v657_v5 = vshll.u32 %v8594_v58, 16  ;;  %v1017_v46 = vld [vmem:[#allocation2 + $0x30] sm:$0xe] }
  0x57   :  { %v627_v32 = vrot.slane %v626_v42, 4  ;;  %v671_v15 = vshll.u32 %v8596_v62, 16  ;;  %v8612_v43 = vsel %vm8551_vm12, %v6922_v2, %v1076_v59  ;;  %v1018_v23 = vld [vmem:[#allocation2 + $0x38] sm:$0xe]  ;;  %v1019_v37 = vld [vmem:[#allocation2 + $0x50] sm:$0xe] }
  0x58   :  { %v641_v13 = vrot.slane %v640_v54, 4  ;;  %v427_v6 = vld [vmem:[#allocation2 + $0x88] sm:$0xf]  ;;  %v654_v36 = vor.u32 %v653_v4, %v650_v48  ;;  %v659_v16 = vrot.slane %v657_v5, 5  ;;  %v6940_v59 = vcombine.low %v8604_v20, %v8612_v43  ;;  %v8006_v52 = vld [vmem:[#allocation2 + $0x18] ss:$8 sps:$4 sm:$0xff]  }
  0x59   :  { %v632_v14 = vsel %vm8339_vm9, %v627_v32, %v631_v41  ;;  %v662_v29 = vshrl.u32 %v427_v6, 16  ;;  %v665_v61 = vshll.u32 %v427_v6, 16  ;;  %v673_v11 = vrot.slane %v671_v15, 5  ;;  %v1020_v57 = vld [vmem:[#allocation2 + $0x58] sm:$0xe] }
  0x5a   :  { %v646_v30 = vsel %vm8339_vm9, %v641_v13, %v645_v51  ;;  %v6908_v35 = vcombine.low %v426_v47, %v427_v6  ;;  %v655_v39 = vrot.slane %v654_v36, 4  ;;  %v1080_v41 = vrot.slane %v8395_v7, 5  ;;  %v8007_v2 = vld [vmem:[#allocation2 + $0x28] ss:$8 sps:$4 sm:$0xff]   ;;  %v1021_v4 = vld [vmem:[#allocation2 + $0x60] sm:$0xe] }
  0x5b   :  { %v6889_v26 = vcombine.low %v632_v14, %v646_v30  ;;  %v664_v27 = vrot.slane %v662_v29, 4  ;;  %v667_v40 = vrot.slane %v665_v61, 5  ;;  %v6924_v44 = vrot.slane %v1016_v12, 9  ;;  %v1022_v5 = vld [vmem:[#allocation2 + $0x68] sm:$0xe] }
  0x5c   :  { %7662 = vmatmul.mubr.msk.bf16.gmra.mxu1 %vm11101_vm8, %v6908_v35  ;;  %v1084_v45 = vrot.slane %v8409_v22, 5  ;;  %v660_v49 = vsel %vm8339_vm9, %v655_v39, %v659_v16  ;;  %v6925_v50 = vrot.slane %v1017_v46, 9  ;;  %v1088_v51 = vrot.slane %v8463_v24, 5  ;;  %v1023_v30 = vld [vmem:[#allocation2 + $0x70] sm:$0xe] }
  0x5d   :  { %7641 = vmatprep.mubr.msk.bf16.mxu0 %vm11101_vm8, %v6889_v26  ;;  %7689 = vmatprep.mubr.msk.bf16.mxu1 %vm11101_vm8, %v8005_v8  ;;  %v6926_v47 = vrot.slane %v1018_v23, 9  ;;  %v668_v42 = vor.u32 %v667_v40, %v664_v27  ;;  %v8630_v53 = vsel %vm8551_vm12, %v6923_v0, %v1080_v41  ;;  %v1092_v22 = vrot.slane %v8476_v38, 5  ;;  %v358_v38 = vld [vmem:[#allocation2 + $0x40] sm:$0xf]  ;;  %v1026_v40 = vld [vmem:[#allocation2 + $0x88] sm:$0xe] }
  0x5e   :  { %v8634_v7 = vsel %vm8551_vm12, %v6924_v44, %v1084_v45  ;;  %v8641_v24 = vsel %vm8551_vm12, %v6925_v50, %v1088_v51  ;;  %v206_v32 = vshrl.u32 %v8555_v1, 16  ;;  %v209_v48 = vshll.u32 %v8555_v1, 16  ;;  %v1025_v26 = vld [vmem:[#allocation2 + $0x80] sm:$0xe] }
  0x5f   :  { %v6941_v54 = vcombine.low %v8630_v53, %v8634_v7  ;;  %v669_v8 = vrot.slane %v668_v42, 4  ;;  %v8647_v12 = vsel %vm8551_vm12, %v6926_v47, %v1092_v22  ;;  %v6927_v13 = vrot.slane %v1019_v37, 9  ;;  %v1514_v42 = vld [vmem:[#allocation2 + $0x8] sm:$0xf] }
  0x60   :  { %v1096_v6 = vrot.slane %v8449_v9, 5  ;;  %v6942_v15 = vcombine.low %v8641_v24, %v8647_v12  ;;  %v8652_v0 = vrot.slane %v206_v32, 7  ;;  %v6928_v14 = vrot.slane %v1020_v57, 9  ;;  %v1024_v9 = vld [vmem:[#allocation2 + $0x78] sm:$0xe] }
  0x61   :  { %v1100_v36 = vrot.slane %v8501_v28, 5  ;;  %v674_v1 = vsel %vm8339_vm9, %v669_v8, %v673_v11  ;;  %v6929_v29 = vrot.slane %v1021_v4, 9  ;;  %v1104_v46 = vrot.slane %v8524_v3, 5  ;;  %v8015_v11 = vld [vmem:[%s11086_s1 + $0x50] sm:$0xff]  }
  0x62   :  { %v8659_v16 = vsel %vm8551_vm12, %v6927_v13, %v1096_v6  ;;  %v6890_v61 = vcombine.low %v660_v49, %v674_v1  ;;  %v211_v35 = vor.u32 %v209_v48, %v8652_v0  ;;  %v212_v23 = vrot.slane %v8652_v0, 4  ;;  %v8719_v32 = vld [vmem:[#allocation2 + $0x14] sm:$0x1]  ;;  %v406_v4 = vld [vmem:[#allocation2 + $0x90] sm:$0xf]  ;;  %v8009_v6 = vld [vmem:[%s11086_s1 + $0x40] sm:$0xff]  }
  0x63   :  { %v8666_v28 = vsel %vm8551_vm12, %v6928_v14, %v1100_v36  ;;  %v8676_v39 = vsel %vm8551_vm12, %v6929_v29, %v1104_v46  ;;  %v6930_v27 = vrot.slane %v1022_v5, 9  ;;  %v1108_v37 = vrot.slane %v8542_v31, 5  ;;  %v8727_v13 = vld [vmem:[#allocation2 + $0x1c] sm:$0x1]  ;;  %v361_v46 = vld [vmem:[#allocation2 + $0x44] sm:$0x1] }
  0x64   :  { %7690 = vmatmul.mubr.msk.bf16.vlgmr.msra.gmra.mxu1 %vm11101_vm8, %v8006_v52  ;;  %v6943_v3 = vcombine.low %v8659_v16, %v8666_v28  ;;  %7642 = vmatmul.mubr.msk.bf16.gmra.mxu0 %vm11101_vm8, %v6890_v61  ;;  %v359_v41 = vsel %vm8305_vm6, %v211_v35, %v358_v38  ;;  %v6931_v44 = vrot.slane %v1023_v30, 9  ;;  %v1112_v45 = vrot.slane %v8568_v56, 5  ;;  %v8698_v56 = vld [vmem:[%s11086_s1 + $0x78] sm:$0xff]   ;;  %v8804_v16 = vld [vmem:[#allocation2 + $0x34] sm:$0x1] }
  0x65   :  { %7693 = vmatprep.mubr.msk.bf16.mxu1 %vm11101_vm8, %v8007_v2  ;;  %v6932_v49 = vrot.slane %v1024_v9, 9  ;;  %7669 = vmatprep.mubr.msk.bf16.mxu0 %vm11101_vm8, %v6939_v34  ;;  %360 = vst [vmem:[#allocation2 + $0x40] sm:$0xf] %v359_v41  ;;  %v8690_v31 = vsel %vm8551_vm12, %v6930_v27, %v1108_v37  ;;  %v1116_v50 = vrot.slane %v8580_v33, 5  ;;  %v6933_v51 = vrot.slane %v1025_v26, 9 }
  0x66   :  { %v1120_v47 = vrot.slane %v8594_v58, 5  ;;  %7726 = vmatpush3.bf16.msra.mxu1 %v8461_v18  ;;  %v6944_v17 = vcombine.low %v8676_v39, %v8690_v31  ;;  %v8704_v55 = vsel %vm8551_vm12, %v6931_v44, %v1112_v45  ;;  %v6934_v34 = vrot.slane %v1026_v40, 9  ;;  %v8707_v58 = vld [vmem:[#allocation2 + $0xc] sm:$0x1]  ;;  %v1516_v18 = vld [vmem:[#allocation2 + $0x10] sm:$0xf] }
  0x67   :  { %v1124_v33 = vrot.slane %v8596_v62, 5  ;;  %7727 = vmatprep.subr.bf16.mxu1 %v8015_v11  ;;  %v8711_v52 = vsel %vm8551_vm12, %v6932_v49, %v1116_v50  ;;  %v270_v57 = vshrl.u32 %v8578_v21, 16  ;;  %v273_v2 = vshll.u32 %v8578_v21, 16  ;;  %v1518_v38 = vld [vmem:[#allocation2 + $0x18] sm:$0xf] }
  0x68   :  { %v8715_v22 = vsel %vm8551_vm12, %v6933_v51, %v1120_v47  ;;  %v6945_v62 = vcombine.low %v8704_v55, %v8711_v52  ;;  %v1547_v5 = vshrl.u32 %v1514_v42, 16  ;;  %v1550_v8 = vshll.u32 %v1514_v42, 16  ;;  %v8010_v21 = vld [vmem:[#allocation2 + $0x58] ss:$8 sps:$4 sm:$0xff]   ;;  %v8741_v44 = vld [vmem:[#allocation2 + $0x24] sm:$0x1] }
  0x69   :  { %v8725_v48 = vsel %vm8551_vm12, %v6934_v34, %v1124_v33  ;;  %v8734_v36 = vrot.slane %v270_v57, 7  ;;  %v1556_v1 = vshll.u32 %v8707_v58, 16  ;;  %v1561_v29 = vshrl.u32 %v1516_v18, 16  ;;  %v1520_v26 = vld [vmem:[#allocation2 + $0x20] sm:$0xf] }
  0x6a   :  { %v6946_v14 = vcombine.low %v8715_v22, %v8725_v48  ;;  %7728 = vmatpush3.bf16.msra.mxu1 %v8015_v11  ;;  %v1549_v30 = vrot.slane %v1547_v5, 4  ;;  %v1552_v9 = vrot.slane %v1550_v8, 5  ;;  %v1564_v61 = vshll.u32 %v1516_v18, 16  ;;  %v1949_v57 = vld [vmem:[#allocation2 + $0x10] sm:$0xe] }
  0x6b   :  { %v1570_v35 = vshll.u32 %v8719_v32, 16  ;;  %7765 = vmatprep.subr.bf16.mxu1 %v8698_v56  ;;  %v275_v27 = vor.u32 %v273_v2, %v8734_v36  ;;  %v276_v37 = vrot.slane %v8734_v36, 4  ;;  %v1558_v40 = vrot.slane %v1556_v1, 5  ;;  %v8011_v2 = vld [vmem:[#allocation2 + $0x68] ss:$8 sps:$4 sm:$0xff]  }
  0x6c   :  { %v1563_v41 = vrot.slane %v1561_v29, 4  ;;  %7670 = vmatmul.mubr.msk.bf16.vlgmr.msra.gmra.mxu0 %vm11101_vm8, %v6940_v59  ;;  %v8008_v11 = vld [vmem:[#allocation2 + $0x38] ss:$8 sps:$4 sm:$0xff]   ;;  %v1553_v45 = vor.u32 %v1552_v9, %v1549_v30  ;;  %v1566_v49 = vrot.slane %v1564_v61, 5  ;;  %v362_v51 = vsel %vm8311_vm7, %v212_v23, %v361_v46 }
  0x6d   :  { %v1572_v50 = vrot.slane %v1570_v35, 5  ;;  %7706 = vmatpush3.bf16.msra.mxu0 %v8454_v10  ;;  %7673 = vmatprep.mubr.msk.bf16.mxu0 %vm11101_vm8, %v6941_v54  ;;  %v407_v20 = vsel %vm8305_vm6, %v275_v27, %v406_v4  ;;  %v1575_v43 = vshrl.u32 %v1518_v38, 16  ;;  %v1578_v59 = vshll.u32 %v1518_v38, 16  ;;  %363 = vst [vmem:[#allocation2 + $0x44] sm:$0x1] %v362_v51  ;;  %v8763_v10 = vld [vmem:[%s11086_s1 + $0x68] sm:$0xff]  }
  0x6e   :  { %v1584_v47 = vshll.u32 %v8727_v13, 16  ;;  %7694 = vmatmul.mubr.msk.bf16.gmra.mxu1 %vm11101_vm8, %v8008_v11  ;;  %7707 = vmatprep.subr.bf16.mxu0 %v8009_v6  ;;  %408 = vst [vmem:[#allocation2 + $0x90] sm:$0xf] %v407_v20  ;;  %v1554_v0 = vrot.slane %v1553_v45, 4  ;;  %v1567_v23 = vor.u32 %v1566_v49, %v1563_v41  ;;  %v1589_v53 = vshrl.u32 %v1520_v26, 16 }
  0x6f   :  { %v1592_v7 = vshll.u32 %v1520_v26, 16  ;;  %v1948_v54 = vld [vmem:[#allocation2 + $0x8] sm:$0xe]  ;;  %7697 = vmatprep.mubr.msk.bf16.mxu1 %vm11101_vm8, %v8010_v21  ;;  %v1577_v42 = vrot.slane %v1575_v43, 4  ;;  %v1580_v34 = vrot.slane %v1578_v59, 5  ;;  %v1598_v18 = vshll.u32 %v8741_v44, 16 }
  0x70   :  { %v1586_v33 = vrot.slane %v1584_v47, 5  ;;  %v1559_v4 = vsel %vm8339_vm9, %v1554_v0, %v1558_v40  ;;  %v1568_v5 = vrot.slane %v1567_v23, 4  ;;  %v1591_v8 = vrot.slane %v1589_v53, 4  ;;  %v1950_v1 = vld [vmem:[#allocation2 + $0x18] sm:$0xe] }
  0x71   :  { %v1594_v38 = vrot.slane %v1592_v7, 5  ;;  %7708 = vmatpush3.bf16.msra.mxu0 %v8009_v6  ;;  %v8012_v29 = vld [vmem:[#allocation2 + $0x78] ss:$8 sps:$4 sm:$0xff]   ;;  %v1581_v46 = vor.u32 %v1580_v34, %v1577_v42  ;;  %v1600_v30 = vrot.slane %v1598_v18, 5  ;;  %v7001_v9 = vrot.slane %v1948_v54, 9 }
  0x72   :  { %v1998_v21 = vrot.slane %v8707_v58, 5  ;;  %v1951_v61 = vld [vmem:[#allocation2 + $0x20] sm:$0xe]  ;;  %v1573_v35 = vsel %vm8339_vm9, %v1568_v5, %v1572_v50  ;;  %7745 = vmatprep.subr.bf16.mxu0 %v8763_v10  ;;  %v7002_v27 = vrot.slane %v1949_v57, 9  ;;  %v2002_v40 = vrot.slane %v8719_v32, 5 }
  0x73   :  { %v1595_v26 = vor.u32 %v1594_v38, %v1591_v8  ;;  %v1522_v41 = vld [vmem:[#allocation2 + $0x28] sm:$0xf]  ;;  %v8774_v11 = vld [vmem:[#allocation2 + $0x2c] sm:$0x1]  ;;  %v8776_v6 = vcombine.low %v1559_v4, %v1573_v35  ;;  %v1582_v45 = vrot.slane %v1581_v46, 4  ;;  %v7003_v58 = vrot.slane %v1950_v1, 9 }
  0x74   :  { %v8780_v49 = vsel %vm8551_vm12, %v7001_v9, %v1998_v21  ;;  %7674 = vmatmul.mubr.msk.bf16.gmra.mxu0 %vm11101_vm8, %v6942_v15  ;;  %v2003_v32 = vsel %vm8551_vm12, %v7002_v27, %v2002_v40  ;;  %v2006_v51 = vrot.slane %v8727_v13, 5  ;;  %v7004_v20 = vrot.slane %v1951_v61, 9  ;;  %v1524_v43 = vld [vmem:[#allocation2 + $0x30] sm:$0xf]  ;;  %v1526_v0 = vld [vmem:[#allocation2 + $0x38] sm:$0xf] }
  0x75   :  { %v1596_v50 = vrot.slane %v1595_v26, 4  ;;  %7677 = vmatprep.mubr.msk.bf16.mxu0 %vm11101_vm8, %v6943_v3  ;;  %v1587_v59 = vsel %vm8339_vm9, %v1582_v45, %v1586_v33  ;;  %v7021_v24 = vcombine.low %v8780_v49, %v2003_v32  ;;  %v2010_v12 = vrot.slane %v8741_v44, 5  ;;  %v1527_v54 = vld [vmem:[#allocation2 + $0x3c] sm:$0x1]  ;;  %v1528_v42 = vld [vmem:[#allocation2 + $0x40] sm:$0xf] }
  0x76   :  { %v1603_v15 = vshrl.u32 %v1522_v41, 16  ;;  %7698 = vmatmul.mubr.msk.bf16.gmra.mxu1 %vm11101_vm8, %v8011_v2  ;;  %v8802_v47 = vsel %vm8551_vm12, %v7003_v58, %v2006_v51  ;;  %v1606_v28 = vshll.u32 %v1522_v41, 16  ;;  %v1612_v3 = vshll.u32 %v8774_v11, 16  ;;  %v1952_v2 = vld [vmem:[#allocation2 + $0x28] sm:$0xe] }
  0x77   :  { %v1601_v13 = vsel %vm8339_vm9, %v1596_v50, %v1600_v30  ;;  %7701 = vmatprep.mubr.msk.bf16.mxu1 %vm11101_vm8, %v8012_v29  ;;  %v8812_v44 = vsel %vm8551_vm12, %v7004_v20, %v2010_v12  ;;  %v1617_v7 = vshrl.u32 %v1524_v43, 16  ;;  %v1620_v57 = vshll.u32 %v1524_v43, 16  ;;  %v1529_v8 = vld [vmem:[#allocation2 + $0x44] sm:$0x1]  ;;  %v8013_v29 = vld [vmem:[#allocation2 + $0x88] ss:$8 sps:$4 sm:$0xff]  }
  0x78   :  { %v8808_v23 = vcombine.low %v1587_v59, %v1601_v13  ;;  %v1605_v53 = vrot.slane %v1603_v15, 4  ;;  %v7022_v34 = vcombine.low %v8802_v47, %v8812_v44  ;;  %v1608_v33 = vrot.slane %v1606_v28, 5  ;;  %v1953_v40 = vld [vmem:[#allocation2 + $0x30] sm:$0xe]  ;;  %v1954_v43 = vld [vmem:[#allocation2 + $0x38] sm:$0xe] }
  0x79   :  { %v1614_v18 = vrot.slane %v1612_v3, 5  ;;  %v1619_v4 = vrot.slane %v1617_v7, 4  ;;  %v1626_v5 = vshll.u32 %v8804_v16, 16  ;;  %v1631_v38 = vshrl.u32 %v1526_v0, 16  ;;  %v1955_v15 = vld [vmem:[#allocation2 + $0x40] sm:$0xe] }
  0x7a   :  { %v1634_v1 = vshll.u32 %v1526_v0, 16  ;;  %v1609_v46 = vor.u32 %v1608_v33, %v1605_v53  ;;  %v1622_v30 = vrot.slane %v1620_v57, 5  ;;  %v1640_v9 = vshll.u32 %v1527_v54, 16  ;;  %v1530_v53 = vld [vmem:[#allocation2 + $0x58] sm:$0xf]  ;;  %v8017_v47 = vld [vmem:[%s11086_s1 + $0x60] sm:$0xff]  }
  0x7b   :  { %v1645_v21 = vshrl.u32 %v1528_v42, 16  ;;  %v1628_v61 = vrot.slane %v1626_v5, 5  ;;  %v1633_v35 = vrot.slane %v1631_v38, 4  ;;  %v1648_v27 = vshll.u32 %v1528_v42, 16  ;;  %v8835_v7 = vld [vmem:[#allocation2 + $0x5c] sm:$0x1] }
  0x7c   :  { %v1636_v26 = vrot.slane %v1634_v1, 5  ;;  %7678 = vmatmul.mubr.msk.bf16.gmra.mxu0 %vm11101_vm8, %v6944_v17  ;;  %v1610_v41 = vrot.slane %v1609_v46, 4  ;;  %v1623_v45 = vor.u32 %v1622_v30, %v1619_v4  ;;  %v1642_v49 = vrot.slane %v1640_v9, 5  ;;  %v1532_v33 = vld [vmem:[#allocation2 + $0x60] sm:$0xf]  ;;  %v8019_v9 = vld [vmem:[%s11086_s1 + $0x70] sm:$0xff]  }
  0x7d   :  { %v1647_v58 = vrot.slane %v1645_v21, 4  ;;  %7681 = vmatprep.mubr.msk.bf16.mxu0 %vm11101_vm8, %v6945_v62  ;;  %v1650_v32 = vrot.slane %v1648_v27, 5  ;;  %v1654_v51 = vshll.u32 %v1529_v8, 16  ;;  %v7005_v20 = vrot.slane %v1952_v2, 9  ;;  %v8847_v4 = vld [vmem:[#allocation2 + $0x64] sm:$0x1] }
  0x7e   :  { %v1637_v50 = vor.u32 %v1636_v26, %v1633_v35  ;;  %7702 = vmatmul.mubr.msk.bf16.gmra.mxu1 %vm11101_vm8, %v8013_v29  ;;  %v1615_v39 = vsel %vm8339_vm9, %v1610_v41, %v1614_v18  ;;  %v1624_v31 = vrot.slane %v1623_v45, 4  ;;  %v2014_v17 = vrot.slane %v8774_v11, 5  ;;  %v1534_v5 = vld [vmem:[#allocation2 + $0x68] sm:$0xf]  ;;  %v8852_v30 = vld [vmem:[#allocation2 + $0x6c] sm:$0x1] }
  0x7f   :  { %v7006_v59 = vrot.slane %v1953_v40, 9  ;;  %7729 = vmatprep.mubr.msk.bf16.mxu1 %vm11101_vm8, %v7021_v24  ;;  %v1651_v55 = vor.u32 %v1650_v32, %v1647_v58  ;;  %v1656_v52 = vrot.slane %v1654_v51, 5  ;;  %v2018_v62 = vrot.slane %v8804_v16, 5  ;;  %v1536_v26 = vld [vmem:[#allocation2 + $0x70] sm:$0xf] }
  0x80   :  { %v1638_v12 = vrot.slane %v1637_v50, 4  ;;  %v1629_v13 = vsel %vm8339_vm9, %v1624_v31, %v1628_v61  ;;  %v2015_v28 = vsel %vm8551_vm12, %v7005_v20, %v2014_v17  ;;  %v7007_v3 = vrot.slane %v1954_v43, 9  ;;  %v1956_v22 = vld [vmem:[#allocation2 + $0x58] sm:$0xe]  ;;  %v1957_v32 = vld [vmem:[#allocation2 + $0x60] sm:$0xe] }
  0x81   :  { %v2022_v0 = vrot.slane %v1527_v54, 5  ;;  %v8837_v11 = vcombine.low %v1615_v39, %v1629_v13  ;;  %v1652_v42 = vrot.slane %v1651_v55, 4  ;;  %v2019_v16 = vsel %vm8551_vm12, %v7006_v59, %v2018_v62  ;;  %v1958_v17 = vld [vmem:[#allocation2 + $0x68] sm:$0xe]  ;;  %v1959_v62 = vld [vmem:[#allocation2 + $0x70] sm:$0xe] }
  0x82   :  { %v1643_v24 = vsel %vm8339_vm9, %v1638_v12, %v1642_v49  ;;  %v7023_v18 = vcombine.low %v2015_v28, %v2019_v16  ;;  %v7008_v2 = vrot.slane %v1955_v15, 9  ;;  %v2026_v54 = vrot.slane %v1529_v8, 5  ;;  %v8868_v49 = vld [vmem:[#allocation2 + $0x74] sm:$0x1] }
  0x83   :  { %v8845_v57 = vsel %vm8551_vm12, %v7007_v3, %v2022_v0  ;;  %v1657_v38 = vsel %vm8339_vm9, %v1652_v42, %v1656_v52  ;;  %v1659_v1 = vshrl.u32 %v1530_v53, 16  ;;  %v1662_v29 = vshll.u32 %v1530_v53, 16  ;;  %v1538_v3 = vld [vmem:[#allocation2 + $0x78] sm:$0xf] }
  0x84   :  { %v1668_v46 = vshll.u32 %v8835_v7, 16  ;;  %7682 = vmatmul.mubr.msk.bf16.gmra.mxu0 %vm11101_vm8, %v6946_v14  ;;  %v8861_v8 = vcombine.low %v1643_v24, %v1657_v38  ;;  %v2027_v21 = vsel %vm8551_vm12, %v7008_v2, %v2026_v54  ;;  %v1673_v61 = vshrl.u32 %v1532_v33, 16  ;;  %v8895_v38 = vld [vmem:[#allocation2 + $0x7c] sm:$0x1] }
  0x85   :  { %v1676_v35 = vshll.u32 %v1532_v33, 16  ;;  %7709 = vmatprep.mubr.msk.bf16.mxu0 %vm11101_vm8, %v8776_v6  ;;  %v7024_v27 = vcombine.low %v8845_v57, %v2027_v21  ;;  %v1661_v40 = vrot.slane %v1659_v1, 4  ;;  %v1664_v41 = vrot.slane %v1662_v29, 5  ;;  %v1540_v29 = vld [vmem:[#allocation2 + $0x80] sm:$0xf] }
  0x86   :  { %v1670_v45 = vrot.slane %v1668_v46, 5  ;;  %7730 = vmatmul.mubr.msk.bf16.vlgmr.msra.gmra.mxu1 %vm11101_vm8, %v7022_v34  ;;  %v1675_v48 = vrot.slane %v1673_v61, 4  ;;  %v1682_v58 = vshll.u32 %v8847_v4, 16  ;;  %v1687_v50 = vshrl.u32 %v1534_v5, 16  ;;  %v8909_v61 = vld [vmem:[#allocation2 + $0x84] sm:$0x1] }
  0x87   :  { %v1678_v14 = vrot.slane %v1676_v35, 5  ;;  %7733 = vmatprep.mubr.msk.bf16.mxu1 %vm11101_vm8, %v7023_v18  ;;  %v1665_v6 = vor.u32 %v1664_v41, %v1661_v40  ;;  %v1690_v51 = vshll.u32 %v1534_v5, 16  ;;  %v1696_v20 = vshll.u32 %v8852_v30, 16  ;;  %7766 = vmatpush3.bf16.msra.mxu1 %v8698_v56  ;;  %v409_v41 = vld [vmem:[#allocation2 + $0x94] sm:$0x1] }
  0x88   :  { %v1701_v43 = vshrl.u32 %v1536_v26, 16  ;;  %v1684_v31 = vrot.slane %v1682_v58, 5  ;;  %v1689_v44 = vrot.slane %v1687_v50, 4  ;;  %v1704_v34 = vshll.u32 %v1536_v26, 16  ;;  %7767 = vmatprep.subr.bf16.mxu1 %v8019_v9  ;;  %v1543_v58 = vld [vmem:[#allocation2 + $0x8c] sm:$0x1] }
  0x89   :  { %v1679_v39 = vor.u32 %v1678_v14, %v1675_v48  ;;  %v1666_v59 = vrot.slane %v1665_v6, 4  ;;  %v1692_v12 = vrot.slane %v1690_v51, 5  ;;  %v1698_v55 = vrot.slane %v1696_v20, 5  ;;  %v1544_v50 = vld [vmem:[#allocation2 + $0x90] sm:$0xf] }
  0x8a   :  { %v1703_v52 = vrot.slane %v1701_v43, 4  ;;  %v1706_v13 = vrot.slane %v1704_v34, 5  ;;  %v1710_v28 = vshll.u32 %v8868_v49, 16  ;;  %v7009_v56 = vrot.slane %v1956_v22, 9  ;;  %v1960_v43 = vld [vmem:[#allocation2 + $0x78] sm:$0xe] }
  0x8b   :  { %v1680_v15 = vrot.slane %v1679_v39, 4  ;;  %v1671_v0 = vsel %vm8339_vm9, %v1666_v59, %v1670_v45  ;;  %v1693_v53 = vor.u32 %v1692_v12, %v1689_v44  ;;  %v2030_v24 = vrot.slane %v8835_v7, 5  ;;  %7768 = vmatpush3.bf16.msra.mxu1 %v8019_v9  ;;  %v1542_v45 = vld [vmem:[#allocation2 + $0x88] sm:$0xf]  ;;  %v1961_v34 = vld [vmem:[#allocation2 + $0x80] sm:$0xe] }
  0x8c   :  { %v7010_v42 = vrot.slane %v1957_v32, 9  ;;  %7710 = vmatmul.mubr.msk.bf16.vlgmr.msra.gmra.mxu0 %vm11101_vm8, %v8808_v23  ;;  %v1707_v33 = vor.u32 %v1706_v13, %v1703_v52  ;;  %v1712_v18 = vrot.slane %v1710_v28, 5  ;;  %v2034_v57 = vrot.slane %v8847_v4, 5  ;;  %v1962_v52 = vld [vmem:[#allocation2 + $0x88] sm:$0xe] }
  0x8d   :  { %v1685_v16 = vsel %vm8339_vm9, %v1680_v15, %v1684_v31  ;;  %7746 = vmatpush3.bf16.msra.mxu0 %v8763_v10  ;;  %7713 = vmatprep.mubr.msk.bf16.mxu0 %vm11101_vm8, %v8837_v11  ;;  %v1694_v54 = vrot.slane %v1693_v53, 4  ;;  %v2031_v7 = vsel %vm8551_vm12, %v7009_v56, %v2030_v24  ;;  %v7011_v5 = vrot.slane %v1958_v17, 9  ;;  %v8904_v11 = vld [vmem:[%s11086_s1 + $0x88] sm:$0xff]  }
  0x8e   :  { %v6987_v2 = vcombine.low %v1671_v0, %v1685_v16  ;;  %7734 = vmatmul.mubr.msk.bf16.gmra.mxu1 %vm11101_vm8, %v7024_v27  ;;  %7747 = vmatprep.subr.bf16.mxu0 %v8017_v47  ;;  %v1708_v23 = vrot.slane %v1707_v33, 4  ;;  %v2035_v4 = vsel %vm8551_vm12, %v7010_v42, %v2034_v57  ;;  %v2038_v10 = vrot.slane %v8852_v30, 5  ;;  %v1963_v42 = vld [vmem:[#allocation2 + $0x90] sm:$0xe] }
  0x8f   :  { %v7012_v1 = vrot.slane %v1959_v62, 9  ;;  %v1699_v46 = vsel %vm8339_vm9, %v1694_v54, %v1698_v55  ;;  %v7025_v9 = vcombine.low %v2031_v7, %v2035_v4  ;;  %v2042_v21 = vrot.slane %v8868_v49, 5  ;;  %v8935_v4 = vld [vmem:[#allocation2 + $0x14] sm:$0x1] }
  0x90   :  { %v1715_v35 = vshrl.u32 %v1538_v3, 16  ;;  %v1713_v26 = vsel %vm8339_vm9, %v1708_v23, %v1712_v18  ;;  %v2039_v30 = vsel %vm8551_vm12, %v7011_v5, %v2038_v10  ;;  %v1718_v27 = vshll.u32 %v1538_v3, 16 }
  0x91   :  { %v1724_v40 = vshll.u32 %v8895_v38, 16  ;;  %v6988_v22 = vcombine.low %v1699_v46, %v1713_v26  ;;  %7748 = vmatpush3.bf16.msra.mxu0 %v8017_v47  ;;  %7737 = vmatprep.mubr.msk.bf16.mxu1 %vm11101_vm8, %v7025_v9  ;;  %v2043_v49 = vsel %vm8551_vm12, %v7012_v1, %v2042_v21  ;;  %v1729_v14 = vshrl.u32 %v1540_v29, 16  ;;  %v2451_v46 = vld [vmem:[#allocation2 + $0x18] sm:$0xf] }
  0x92   :  { %v1717_v48 = vrot.slane %v1715_v35, 4  ;;  %v7026_v32 = vcombine.low %v2039_v30, %v2043_v49  ;;  %v1720_v6 = vrot.slane %v1718_v27, 5  ;;  %v1732_v20 = vshll.u32 %v1540_v29, 16  ;;  %7785 = vmatprep.subr.bf16.mxu0 %v8904_v11  ;;  %v8941_v30 = vld [vmem:[#allocation2 + $0x1c] sm:$0x1] }
  0x93   :  { %v1726_v51 = vrot.slane %v1724_v40, 5  ;;  %v1731_v39 = vrot.slane %v1729_v14, 4  ;;  %v1738_v31 = vshll.u32 %v8909_v61, 16  ;;  %v410_v47 = vsel %vm8311_vm7, %v276_v37, %v409_v41  ;;  %v2453_v49 = vld [vmem:[#allocation2 + $0x20] sm:$0xf] }
  0x94   :  { %v1743_v44 = vshrl.u32 %v1542_v45, 16  ;;  %7714 = vmatmul.mubr.msk.bf16.gmra.mxu0 %vm11101_vm8, %v8861_v8  ;;  %v1721_v17 = vor.u32 %v1720_v6, %v1717_v48  ;;  %v1734_v59 = vrot.slane %v1732_v20, 5  ;;  %411 = vst [vmem:[#allocation2 + $0x94] sm:$0x1] %v410_v47  ;;  %v1746_v12 = vshll.u32 %v1542_v45, 16 }
  0x95   :  { %v1752_v55 = vshll.u32 %v1543_v58, 16  ;;  %7717 = vmatprep.mubr.msk.bf16.mxu0 %vm11101_vm8, %v6987_v2  ;;  %v1740_v62 = vrot.slane %v1738_v31, 5  ;;  %v1757_v13 = vshrl.u32 %v1544_v50, 16  ;;  %v1760_v36 = vshll.u32 %v1544_v50, 16  ;;  %v2449_v2 = vld [vmem:[#allocation2 + $0x10] sm:$0xf] }
  0x96   :  { %v1745_v15 = vrot.slane %v1743_v44, 4  ;;  %7738 = vmatmul.mubr.msk.bf16.gmra.mxu1 %vm11101_vm8, %v7026_v32  ;;  %v1722_v37 = vrot.slane %v1721_v17, 4  ;;  %v1735_v28 = vor.u32 %v1734_v59, %v1731_v39  ;;  %v1748_v56 = vrot.slane %v1746_v12, 5  ;;  %v8950_v32 = vld [vmem:[#allocation2 + $0x24] sm:$0x1] }
  0x97   :  { %v1754_v3 = vrot.slane %v1752_v55, 5  ;;  %v1759_v0 = vrot.slane %v1757_v13, 4  ;;  %v1762_v8 = vrot.slane %v1760_v36, 5  ;;  %v7013_v53 = vrot.slane %v1960_v43, 9  ;;  %v2455_v6 = vld [vmem:[#allocation2 + $0x28] sm:$0xf] }
  0x98   :  { %v2046_v24 = vrot.slane %v8895_v38, 5  ;;  %v1727_v16 = vsel %vm8339_vm9, %v1722_v37, %v1726_v51  ;;  %v1736_v33 = vrot.slane %v1735_v28, 4  ;;  %v1749_v18 = vor.u32 %v1748_v56, %v1745_v15  ;;  %v8954_v39 = vld [vmem:[#allocation2 + $0x2c] sm:$0x1]  ;;  %v8020_v47 = vld [vmem:[#allocation2 + $0x10] ss:$8 sps:$4 sm:$0xff]  }
  0x99   :  { %v7014_v57 = vrot.slane %v1961_v34, 9  ;;  %v1763_v54 = vor.u32 %v1762_v8, %v1759_v0  ;;  %v2050_v5 = vrot.slane %v8909_v61, 5  ;;  %v7015_v23 = vrot.slane %v1962_v52, 9  ;;  %v2457_v59 = vld [vmem:[#allocation2 + $0x30] sm:$0xf] }
  0x9a   :  { %v2047_v7 = vsel %vm8551_vm12, %v7013_v53, %v2046_v24  ;;  %v1741_v38 = vsel %vm8339_vm9, %v1736_v33, %v1740_v62  ;;  %v1750_v10 = vrot.slane %v1749_v18, 4  ;;  %v2054_v1 = vrot.slane %v1543_v58, 5 }
  0x9b   :  { %v7016_v29 = vrot.slane %v1963_v42, 9  ;;  %v6989_v9 = vcombine.low %v1727_v16, %v1741_v38  ;;  %v1545_v21 = vld [vmem:[#allocation2 + $0x94] sm:$0x1]  ;;  %v1764_v35 = vrot.slane %v1763_v54, 4  ;;  %v2051_v26 = vsel %vm8551_vm12, %v7014_v57, %v2050_v5  ;;  %v2459_v54 = vld [vmem:[#allocation2 + $0x38] sm:$0xf] }
  0x9c   :  { %v2482_v27 = vshrl.u32 %v2449_v2, 16  ;;  %7718 = vmatmul.mubr.msk.bf16.gmra.mxu0 %vm11101_vm8, %v6988_v22  ;;  %v1755_v61 = vsel %vm8339_vm9, %v1750_v10, %v1754_v3  ;;  %v1766_v40 = vshll.u32 %v1545_v21, 16  ;;  %v7027_v41 = vcombine.low %v2047_v7, %v2051_v26  ;;  %v8963_v42 = vld [vmem:[#allocation2 + $0x34] sm:$0x1]  ;;  %v8969_v38 = vld [vmem:[#allocation2 + $0x3c] sm:$0x1] }
  0x9d   :  { %v2055_v45 = vsel %vm8551_vm12, %v7015_v23, %v2054_v1  ;;  %7721 = vmatprep.mubr.msk.bf16.mxu0 %vm11101_vm8, %v6989_v9  ;;  %v2058_v48 = vrot.slane %v1545_v21, 5  ;;  %v2485_v58 = vshll.u32 %v2449_v2, 16  ;;  %v2491_v50 = vshll.u32 %v8935_v4, 16  ;;  %v8022_v1 = vld [vmem:[#allocation2 + $0x20] ss:$8 sps:$4 sm:$0xff]  }
  0x9e   :  { %v2484_v14 = vrot.slane %v2482_v27, 4  ;;  %v1768_v22 = vrot.slane %v1766_v40, 5  ;;  %7741 = vmatprep.mubr.msk.bf16.mxu1 %vm11101_vm8, %v7027_v41  ;;  %v2496_v51 = vshrl.u32 %v2451_v46, 16  ;;  %v2499_v20 = vshll.u32 %v2451_v46, 16 }
  0x9f   :  { %v2505_v43 = vshll.u32 %v8941_v30, 16  ;;  %v2059_v31 = vsel %vm8551_vm12, %v7016_v29, %v2058_v48  ;;  %v2487_v44 = vrot.slane %v2485_v58, 5  ;;  %v2493_v34 = vrot.slane %v2491_v50, 5 }
  0xa0   :  { %v2510_v17 = vshrl.u32 %v2453_v49, 16  ;;  %v1769_v12 = vsel %vm8339_vm9, %v1764_v35, %v1768_v22  ;;  %v7028_v55 = vcombine.low %v2055_v45, %v2059_v31  ;;  %v2498_v52 = vrot.slane %v2496_v51, 4  ;;  %v2461_v35 = vld [vmem:[#allocation2 + $0x40] sm:$0xf]  ;;  %v8974_v45 = vld [vmem:[#allocation2 + $0x44] sm:$0x1] }
  0xa1   :  { %v2501_v62 = vrot.slane %v2499_v20, 5  ;;  %v6990_v15 = vcombine.low %v1755_v61, %v1769_v12  ;;  %v2488_v13 = vor.u32 %v2487_v44, %v2484_v14  ;;  %v2507_v36 = vrot.slane %v2505_v43, 5  ;;  %v8023_v61 = vld [vmem:[#allocation2 + $0x30] ss:$8 sps:$4 sm:$0xff]   ;;  %v8026_v22 = vld [vmem:[%s11086_s1 + $0x80] sm:$0xff]  }
  0xa2   :  { %v2512_v37 = vrot.slane %v2510_v17, 4  ;;  %7742 = vmatmul.mubr.msk.bf16.gmra.mxu1 %vm11101_vm8, %v7028_v55  ;;  %v2513_v56 = vshll.u32 %v2453_v49, 16  ;;  %v2519_v3 = vshll.u32 %v8950_v32, 16  ;;  %v2524_v0 = vshrl.u32 %v2455_v6, 16  ;;  %v2463_v49 = vld [vmem:[#allocation2 + $0x48] sm:$0xf] }
  0xa3   :  { %v2502_v28 = vor.u32 %v2501_v62, %v2498_v52  ;;  %v2489_v8 = vrot.slane %v2488_v13, 4  ;;  %v2527_v53 = vshll.u32 %v2455_v6, 16  ;;  %v2533_v24 = vshll.u32 %v8954_v39, 16  ;;  %v8977_v6 = vld [vmem:[#allocation2 + $0x4c] sm:$0x1] }
  0xa4   :  { %v2538_v16 = vshrl.u32 %v2457_v59, 16  ;;  %7722 = vmatmul.mubr.msk.bf16.gmra.mxu0 %vm11101_vm8, %v6990_v15  ;;  %v2515_v18 = vrot.slane %v2513_v56, 5  ;;  %v2521_v57 = vrot.slane %v2519_v3, 5  ;;  %v2526_v2 = vrot.slane %v2524_v0, 4 }
  0xa5   :  { %v2503_v33 = vrot.slane %v2502_v28, 4  ;;  %7749 = vmatprep.mubr.msk.bf16.mxu0 %vm11101_vm8, %v8020_v47  ;;  %v2494_v7 = vsel %vm8339_vm9, %v2489_v8, %v2493_v34  ;;  %v2529_v5 = vrot.slane %v2527_v53, 5  ;;  %v2535_v23 = vrot.slane %v2533_v24, 5  ;;  %v8992_v8 = vld [vmem:[#allocation2 + $0x64] sm:$0x1] }
  0xa6   :  { %v2540_v10 = vrot.slane %v2538_v16, 4  ;;  %v2516_v46 = vor.u32 %v2515_v18, %v2512_v37  ;;  %v2541_v9 = vshll.u32 %v2457_v59, 16  ;;  %v2547_v21 = vshll.u32 %v8963_v42, 16  ;;  %v2465_v59 = vld [vmem:[#allocation2 + $0x60] sm:$0xf] }
  0xa7   :  { %v2508_v29 = vsel %vm8339_vm9, %v2503_v33, %v2507_v36  ;;  %v2530_v27 = vor.u32 %v2529_v5, %v2526_v2  ;;  %v2552_v40 = vshrl.u32 %v2459_v54, 16  ;;  %v2555_v41 = vshll.u32 %v2459_v54, 16  ;;  %v8024_v53 = vld [vmem:[#allocation2 + $0x40] ss:$8 sps:$4 sm:$0xff]  }
  0xa8   :  { %v7065_v26 = vcombine.low %v2494_v7, %v2508_v29  ;;  %v2517_v48 = vrot.slane %v2516_v46, 4  ;;  %v2543_v14 = vrot.slane %v2541_v9, 5  ;;  %v2549_v58 = vrot.slane %v2547_v21, 5  ;;  %v2467_v18 = vld [vmem:[#allocation2 + $0x68] sm:$0xf] }
  0xa9   :  { %v2561_v50 = vshll.u32 %v8969_v38, 16  ;;  %v2531_v51 = vrot.slane %v2530_v27, 4  ;;  %v2554_v20 = vrot.slane %v2552_v40, 4  ;;  %v2557_v43 = vrot.slane %v2555_v41, 5  ;;  %v8025_v29 = vld [vmem:[#allocation2 + $0x60] ss:$8 sps:$4 sm:$0xff]  }
  0xaa   :  { %7769 = vmatprep.mubr.msk.bf16.mxu1 %vm11101_vm8, %v7065_v26  ;;  %v2566_v31 = vshrl.u32 %v2461_v35, 16  ;;  %v2522_v47 = vsel %vm8339_vm9, %v2517_v48, %v2521_v57  ;;  %v2544_v44 = vor.u32 %v2543_v14, %v2540_v10  ;;  %v2569_v17 = vshll.u32 %v2461_v35, 16  ;;  %v2471_v48 = vld [vmem:[#allocation2 + $0x78] sm:$0xf] }
  0xab   :  { %v2563_v34 = vrot.slane %v2561_v50, 5  ;;  %v2536_v12 = vsel %vm8339_vm9, %v2531_v51, %v2535_v23  ;;  %v2558_v55 = vor.u32 %v2557_v43, %v2554_v20  ;;  %v2575_v62 = vshll.u32 %v8974_v45, 16  ;;  %v2469_v23 = vld [vmem:[#allocation2 + $0x70] sm:$0xf]  ;;  %v9009_v43 = vld [vmem:[#allocation2 + $0x7c] sm:$0x1] }
  0xac   :  { %v2568_v52 = vrot.slane %v2566_v31, 4  ;;  %7750 = vmatmul.mubr.msk.bf16.vlgmr.msra.gmra.mxu0 %vm11101_vm8, %v8022_v1  ;;  %v7066_v15 = vcombine.low %v2522_v47, %v2536_v12  ;;  %v2545_v13 = vrot.slane %v2544_v44, 4  ;;  %v2571_v36 = vrot.slane %v2569_v17, 5 }
  0xad   :  { %v2580_v37 = vshrl.u32 %v2463_v49, 16  ;;  %7786 = vmatpush3.bf16.msra.mxu0 %v8904_v11  ;;  %7753 = vmatprep.mubr.msk.bf16.mxu0 %vm11101_vm8, %v8023_v61  ;;  %v2559_v28 = vrot.slane %v2558_v55, 4  ;;  %v2577_v56 = vrot.slane %v2575_v62, 5  ;;  %v2583_v3 = vshll.u32 %v2463_v49, 16  ;;  %v8997_v11 = vld [vmem:[#allocation2 + $0x6c] sm:$0x1] }
  0xae   :  { %v2589_v0 = vshll.u32 %v8977_v6, 16  ;;  %7770 = vmatmul.mubr.msk.bf16.vlgmr.msra.gmra.mxu1 %vm11101_vm8, %v7066_v15  ;;  %v2550_v24 = vsel %vm8339_vm9, %v2545_v13, %v2549_v58  ;;  %v2572_v16 = vor.u32 %v2571_v36, %v2568_v52  ;;  %7787 = vmatprep.subr.bf16.mxu0 %v8026_v22  ;;  %v2594_v57 = vshrl.u32 %v2465_v59, 16  ;;  %v9002_v61 = vld [vmem:[#allocation2 + $0x74] sm:$0x1]  ;;  %v2473_v55 = vld [vmem:[#allocation2 + $0x80] sm:$0xf] }
  0xaf   :  { %v2582_v33 = vrot.slane %v2580_v37, 4  ;;  %v2564_v2 = vsel %vm8339_vm9, %v2559_v28, %v2563_v34  ;;  %v2585_v54 = vrot.slane %v2583_v3, 5  ;;  %v2597_v5 = vshll.u32 %v2465_v59, 16  ;;  %v9015_v52 = vld [vmem:[#allocation2 + $0x84] sm:$0x1] }
  0xb0   :  { %v2591_v7 = vrot.slane %v2589_v0, 5  ;;  %v7067_v10 = vcombine.low %v2550_v24, %v2564_v2  ;;  %v2573_v1 = vrot.slane %v2572_v16, 4  ;;  %v2596_v46 = vrot.slane %v2594_v57, 4  ;;  %v8027_v15 = vld [vmem:[#allocation2 + $0x70] ss:$8 sps:$4 sm:$0xff]  }
  0xb1   :  { %v2603_v9 = vshll.u32 %v8992_v8, 16  ;;  %v2586_v21 = vor.u32 %v2585_v54, %v2582_v33  ;;  %7788 = vmatpush3.bf16.msra.mxu0 %v8026_v22  ;;  %v2599_v35 = vrot.slane %v2597_v5, 5  ;;  %v2608_v26 = vshrl.u32 %v2467_v18, 16  ;;  %v2475_v28 = vld [vmem:[#allocation2 + $0x88] sm:$0xf] }
  0xb2   :  { %v2611_v27 = vshll.u32 %v2467_v18, 16  ;;  %7773 = vmatprep.mubr.msk.bf16.mxu1 %vm11101_vm8, %v7067_v10  ;;  %v2578_v40 = vsel %vm8339_vm9, %v2573_v1, %v2577_v56  ;;  %v2617_v49 = vshll.u32 %v8997_v11, 16  ;;  %v2622_v14 = vshrl.u32 %v2469_v23, 16  ;;  %v8028_v24 = vld [vmem:[#allocation2 + $0x80] ss:$8 sps:$4 sm:$0xff]  }
  0xb3   :  { %v2605_v41 = vrot.slane %v2603_v9, 5  ;;  %v2587_v58 = vrot.slane %v2586_v21, 4  ;;  %v2600_v50 = vor.u32 %v2599_v35, %v2596_v46  ;;  %v2610_v51 = vrot.slane %v2608_v26, 4  ;;  %v9021_v18 = vld [vmem:[#allocation2 + $0x8c] sm:$0x1] }
  0xb4   :  { %v2613_v20 = vrot.slane %v2611_v27, 5  ;;  %7754 = vmatmul.mubr.msk.bf16.gmra.mxu0 %vm11101_vm8, %v8024_v53  ;;  %v2619_v22 = vrot.slane %v2617_v49, 5  ;;  %v2624_v31 = vrot.slane %v2622_v14, 4  ;;  %v2625_v47 = vshll.u32 %v2469_v23, 16  ;;  %v2477_v10 = vld [vmem:[#allocation2 + $0x90] sm:$0xf] }
  0xb5   :  { %v2631_v44 = vshll.u32 %v9002_v61, 16  ;;  %v2592_v34 = vsel %vm8339_vm9, %v2587_v58, %v2591_v7  ;;  %7757 = vmatprep.mubr.msk.bf16.mxu0 %vm11101_vm8, %v8025_v29  ;;  %v2601_v17 = vrot.slane %v2600_v50, 4  ;;  %v2636_v12 = vshrl.u32 %v2471_v48, 16  ;;  %v9026_v21 = vld [vmem:[#allocation2 + $0x94] sm:$0x1] }
  0xb6   :  { %v2614_v59 = vor.u32 %v2613_v20, %v2610_v51  ;;  %v7068_v62 = vcombine.low %v2578_v40, %v2592_v34  ;;  %v2627_v13 = vrot.slane %v2625_v47, 5  ;;  %v2639_v37 = vshll.u32 %v2471_v48, 16  ;;  %v9034_v20 = vld [vmem:[#allocation2 + $0x9c] sm:$0x1] }
  0xb7   :  { %v2633_v36 = vrot.slane %v2631_v44, 5  ;;  %v2606_v56 = vsel %vm8339_vm9, %v2601_v17, %v2605_v41  ;;  %v2638_v0 = vrot.slane %v2636_v12, 4  ;;  %v2645_v53 = vshll.u32 %v9009_v43, 16  ;;  %v2479_v41 = vld [vmem:[#allocation2 + $0x98] sm:$0xf] }
  0xb8   :  { %v2615_v3 = vrot.slane %v2614_v59, 4  ;;  %7774 = vmatmul.mubr.msk.bf16.gmra.mxu1 %vm11101_vm8, %v7068_v62  ;;  %v2628_v16 = vor.u32 %v2627_v13, %v2624_v31  ;;  %v2641_v33 = vrot.slane %v2639_v37, 5  ;;  %v2650_v57 = vshrl.u32 %v2473_v55, 16  ;;  %v8029_v44 = vld [vmem:[#allocation2 + $0x90] ss:$8 sps:$4 sm:$0xff]  }
  0xb9   :  { %v2653_v2 = vshll.u32 %v2473_v55, 16  ;;  %v2647_v7 = vrot.slane %v2645_v53, 5  ;;  %v2659_v5 = vshll.u32 %v9015_v52, 16  ;;  %v2664_v23 = vshrl.u32 %v2475_v28, 16  ;;  %v2883_v12 = vld [vmem:[#allocation2 + $0x10] sm:$0xe] }
  0xba   :  { %v2620_v54 = vsel %vm8339_vm9, %v2615_v3, %v2619_v22  ;;  %v2629_v29 = vrot.slane %v2628_v16, 4  ;;  %v2642_v46 = vor.u32 %v2641_v33, %v2638_v0  ;;  %v2652_v9 = vrot.slane %v2650_v57, 4  ;;  %v2885_v37 = vld [vmem:[#allocation2 + $0x20] sm:$0xe]  ;;  %v2886_v53 = vld [vmem:[#allocation2 + $0x28] sm:$0xe] }
  0xbb   :  { %v7069_v1 = vcombine.low %v2606_v56, %v2620_v54  ;;  %v2655_v35 = vrot.slane %v2653_v2, 5  ;;  %v2661_v26 = vrot.slane %v2659_v5, 5  ;;  %v2666_v27 = vrot.slane %v2664_v23, 4  ;;  %v2887_v2 = vld [vmem:[#allocation2 + $0x30] sm:$0xe] }
  0xbc   :  { %v2667_v40 = vshll.u32 %v2475_v28, 16  ;;  %7758 = vmatmul.mubr.msk.bf16.gmra.mxu0 %vm11101_vm8, %v8027_v15  ;;  %v2634_v49 = vsel %vm8339_vm9, %v2629_v29, %v2633_v36  ;;  %v2643_v48 = vrot.slane %v2642_v46, 4  ;;  %v2673_v14 = vshll.u32 %v9021_v18, 16  ;;  %v2884_v36 = vld [vmem:[#allocation2 + $0x18] sm:$0xe] }
  0xbd   :  { %7777 = vmatprep.mubr.msk.bf16.mxu1 %vm11101_vm8, %v7069_v1  ;;  %v2678_v58 = vshrl.u32 %v2477_v10, 16  ;;  %7761 = vmatprep.mubr.msk.bf16.mxu0 %vm11101_vm8, %v8028_v24  ;;  %v2656_v50 = vor.u32 %v2655_v35, %v2652_v9  ;;  %v2681_v22 = vshll.u32 %v2477_v10, 16  ;;  %v2687_v31 = vshll.u32 %v9026_v21, 16  ;;  %v2888_v10 = vld [vmem:[#allocation2 + $0x38] sm:$0xe] }
  0xbe   :  { %v2669_v51 = vrot.slane %v2667_v40, 5  ;;  %v2648_v47 = vsel %vm8339_vm9, %v2643_v48, %v2647_v7  ;;  %v2675_v34 = vrot.slane %v2673_v14, 5  ;;  %v2692_v59 = vshrl.u32 %v2479_v41, 16  ;;  %v2889_v35 = vld [vmem:[#allocation2 + $0x40] sm:$0xe] }
  0xbf   :  { %v2680_v17 = vrot.slane %v2678_v58, 4  ;;  %v7070_v55 = vcombine.low %v2634_v49, %v2648_v47  ;;  %v2657_v62 = vrot.slane %v2656_v50, 4  ;;  %v2683_v13 = vrot.slane %v2681_v22, 5  ;;  %v2891_v58 = vld [vmem:[#allocation2 + $0x60] sm:$0xe] }
  0xc0   :  { %v2670_v15 = vor.u32 %v2669_v51, %v2666_v27  ;;  %v2689_v28 = vrot.slane %v2687_v31, 5  ;;  %v2694_v56 = vrot.slane %v2692_v59, 4  ;;  %v2695_v3 = vshll.u32 %v2479_v41, 16 }
  0xc1   :  { %v2701_v0 = vshll.u32 %v9034_v20, 16  ;;  %7778 = vmatmul.mubr.msk.bf16.gmra.mxu1 %vm11101_vm8, %v7070_v55  ;;  %v2662_v24 = vsel %vm8339_vm9, %v2657_v62, %v2661_v26  ;;  %v2684_v33 = vor.u32 %v2683_v13, %v2680_v17  ;;  %v7083_v57 = vrot.slane %v2883_v12, 9 }
  0xc2   :  { %v2671_v16 = vrot.slane %v2670_v15, 4  ;;  %v2697_v54 = vrot.slane %v2695_v3, 5  ;;  %v2933_v5 = vrot.slane %v8935_v4, 5  ;;  %v7084_v23 = vrot.slane %v2884_v36, 9  ;;  %v2890_v4 = vld [vmem:[#allocation2 + $0x48] sm:$0xe] }
  0xc3   :  { %v2703_v7 = vrot.slane %v2701_v0, 5  ;;  %v2685_v29 = vrot.slane %v2684_v33, 4  ;;  %v2937_v46 = vrot.slane %v8941_v30, 5  ;;  %v7085_v9 = vrot.slane %v2885_v37, 9  ;;  %v2893_v36 = vld [vmem:[#allocation2 + $0x70] sm:$0xe] }
  0xc4   :  { %v2676_v1 = vsel %vm8339_vm9, %v2671_v16, %v2675_v34  ;;  %7762 = vmatmul.mubr.msk.bf16.gmra.mxu0 %vm11101_vm8, %v8029_v44  ;;  %v2698_v27 = vor.u32 %v2697_v54, %v2694_v56  ;;  %v2934_v40 = vsel %vm8551_vm12, %v7083_v57, %v2933_v5  ;;  %v2941_v41 = vrot.slane %v8950_v32, 5  ;;  %v2892_v32 = vld [vmem:[#allocation2 + $0x68] sm:$0xe]  ;;  %v2895_v16 = vld [vmem:[#allocation2 + $0x80] sm:$0xe] }
  0xc5   :  { %v7071_v26 = vcombine.low %v2662_v24, %v2676_v1  ;;  %v2690_v49 = vsel %vm8339_vm9, %v2685_v29, %v2689_v28  ;;  %v2938_v48 = vsel %vm8551_vm12, %v7084_v23, %v2937_v46  ;;  %v7086_v14 = vrot.slane %v2886_v53, 9  ;;  %v2894_v24 = vld [vmem:[#allocation2 + $0x78] sm:$0xe] }
  0xc6   :  { %v2945_v30 = vrot.slane %v8954_v39, 5  ;;  %v2699_v50 = vrot.slane %v2698_v27, 4  ;;  %v7103_v51 = vcombine.low %v2934_v40, %v2938_v48  ;;  %v2942_v22 = vsel %vm8551_vm12, %v7085_v9, %v2941_v41  ;;  %v2897_v9 = vld [vmem:[#allocation2 + $0x90] sm:$0xe] }
  0xc7   :  { %7781 = vmatprep.mubr.msk.bf16.mxu1 %vm11101_vm8, %v7071_v26  ;;  %v7087_v31 = vrot.slane %v2887_v2, 9  ;;  %v2949_v44 = vrot.slane %v8963_v42, 5  ;;  %v7088_v34 = vrot.slane %v2888_v10, 9  ;;  %v2953_v17 = vrot.slane %v8969_v38, 5 }
  0xc8   :  { %v2946_v47 = vsel %vm8551_vm12, %v7086_v14, %v2945_v30  ;;  %v2704_v39 = vsel %vm8339_vm9, %v2699_v50, %v2703_v7  ;;  %7789 = vmatprep.mubr.msk.bf16.mxu0 %vm11101_vm8, %v7103_v51  ;;  %v7089_v12 = vrot.slane %v2889_v35, 9  ;;  %v2957_v55 = vrot.slane %v8974_v45, 5 }
  0xc9   :  { %v7104_v59 = vcombine.low %v2942_v22, %v2946_v47  ;;  %v7072_v62 = vcombine.low %v2690_v49, %v2704_v39  ;;  %v2950_v15 = vsel %vm8551_vm12, %v7087_v31, %v2949_v44  ;;  %v2954_v13 = vsel %vm8551_vm12, %v7088_v34, %v2953_v17 }
  0xca   :  { %v7090_v42 = vrot.slane %v2890_v4, 9  ;;  %v7105_v37 = vcombine.low %v2950_v15, %v2954_v13  ;;  %v2961_v38 = vrot.slane %v8977_v6, 5  ;;  %v7091_v28 = vrot.slane %v2891_v58, 9  ;;  %v2896_v6 = vld [vmem:[#allocation2 + $0x88] sm:$0xe] }
  0xcb   :  { %7782 = vmatmul.mubr.msk.bf16.gmra.mxu1 %vm11101_vm8, %v7072_v62  ;;  %v2965_v56 = vrot.slane %v8992_v8, 5  ;;  %v7092_v3 = vrot.slane %v2892_v32, 9  ;;  %v2969_v45 = vrot.slane %v8997_v11, 5  ;;  %v2958_v0 = vsel %vm8551_vm12, %v7089_v12, %v2957_v55 }
  0xcc   :  { %7790 = vmatmul.mubr.msk.bf16.vlgmr.msra.gmra.mxu0 %vm11101_vm8, %v7104_v59  ;;  %v2962_v53 = vsel %vm8551_vm12, %v7090_v42, %v2961_v38  ;;  %v7093_v11 = vrot.slane %v2893_v36, 9  ;;  %v2973_v2 = vrot.slane %v9002_v61, 5  ;;  %v7094_v54 = vrot.slane %v2894_v24, 9 }
  0xcd   :  { %7793 = vmatprep.mubr.msk.bf16.mxu0 %vm11101_vm8, %v7105_v37  ;;  %v2966_v33 = vsel %vm8551_vm12, %v7091_v28, %v2965_v56  ;;  %v2970_v8 = vsel %vm8551_vm12, %v7092_v3, %v2969_v45  ;;  %v7106_v57 = vcombine.low %v2958_v0, %v2962_v53  ;;  %v2977_v7 = vrot.slane %v9009_v43, 5 }
  0xce   :  { %v7095_v5 = vrot.slane %v2895_v16, 9  ;;  %v2981_v23 = vrot.slane %v9015_v52, 5  ;;  %v7096_v10 = vrot.slane %v2896_v6, 9  ;;  %v2985_v1 = vrot.slane %v9021_v18, 5 }
  0xcf   :  { %v7107_v29 = vcombine.low %v2966_v33, %v2970_v8  ;;  %v2974_v46 = vsel %vm8551_vm12, %v7093_v11, %v2973_v2  ;;  %v2978_v61 = vsel %vm8551_vm12, %v7094_v54, %v2977_v7 }
  0xd4   :  { %7794 = vmatmul.mubr.msk.bf16.gmra.mxu0 %vm11101_vm8, %v7106_v57 }
  0xd5   :  { %7797 = vmatprep.mubr.msk.bf16.mxu0 %vm11101_vm8, %v7107_v29 }
  0xd6   :  { %12 = vsyncpa [#allocation4], 0  ;;  %v2982_v43 = vsel %vm8551_vm12, %v7095_v5, %v2981_v23  ;;  %v2986_v52 = vsel %vm8551_vm12, %v7096_v10, %v2985_v1  ;;  %v2898_v18 = vld [vmem:[#allocation2 + $0x98] sm:$0xe]  ;;  %v7108_v35 = vcombine.low %v2974_v46, %v2978_v61  ;;  %v7097_v26 = vrot.slane %v2897_v9, 9 }
  0xd7   :  { %v7109_v27 = vcombine.low %v2982_v43, %v2986_v52  ;;  %v2989_v40 = vrot.slane %v9026_v21, 5  ;;  %v7098_v41 = vrot.slane %v2898_v18, 9  ;;  %v2993_v4 = vrot.slane %v9034_v20, 5 }
  0xd9   :  { %v2990_v49 = vsel %vm8551_vm12, %v7097_v26, %v2989_v40  ;;  %v2994_v48 = vsel %vm8551_vm12, %v7098_v41, %v2993_v4 }
  0xda   :  { %v7110_v14 = vcombine.low %v2990_v49, %v2994_v48 }
  0xdc   :  { %7798 = vmatmul.mubr.msk.bf16.gmra.mxu0 %vm11101_vm8, %v7108_v35 }
  0xdd   :  { %7801 = vmatprep.mubr.msk.bf16.mxu0 %vm11101_vm8, %v7109_v27 }
  0xe4   :  { %7802 = vmatmul.mubr.msk.bf16.gmra.mxu0 %vm11101_vm8, %v7110_v14 }
  0xea   :  { %v7651_v30 = vpop.f32.mrf.mxu1 }
  0xec   :  { %v948_v58 = vpop.f32.mrf.mxu1 }
  0xee   :  { %v7652_v22 = vpop.f32.mrf.mxu1 }
  0xf0   :  { %v9108_v47 = vpop.f32.mrf.mxu1 }
  0xf1   :  { %v7631_v50 = vpop.f32.mrf.mxu0 }
  0xf2   :  { %v957_v21 = vadd.f32 %v7651_v30, %v7631_v50 }
  0xf3   :  { %v775_v51 = vpop.f32.mrf.mxu0 }
  0xf4   :  { %v949_v20 = vadd.f32 %v948_v58, %v775_v51 }
  0xf5   :  { %v7632_v31 = vpop.f32.mrf.mxu0 }
  0xf6   :  { %v960_v32 = vadd.f32 %v7652_v22, %v7632_v31 }
  0xf7   :  { %v9110_v34 = vpop.f32.mrf.mxu0 }
  0xf9   :  { %v7655_v44 = vpop.f32.mrf.mxu1 }
  0xfb   :  { %v964_v17 = vpop.f32.mrf.mxu1 }
  0xfd   :  { %v7656_v55 = vpop.f32.mrf.mxu1 }
  0xff   :  { %v9112_v42 = vpop.f32.mrf.mxu1 }
 0x102   :  { %v7635_v39 = vpop.f32.mrf.mxu0 }
 0x103   :  { %v973_v59 = vadd.f32 %v7655_v44, %v7635_v39 }
 0x104   :  { %v791_v12 = vpop.f32.mrf.mxu0 }
 0x105   :  { %v965_v62 = vadd.f32 %v964_v17, %v791_v12 }
 0x106   :  { %v7636_v15 = vpop.f32.mrf.mxu0 }
 0x107   :  { %v976_v13 = vadd.f32 %v7656_v55, %v7636_v15 }
 0x108   :  { %v9114_v38 = vpop.f32.mrf.mxu0 }
 0x10c   :  { %v7659_v36 = vpop.f32.mrf.mxu1 }
 0x10e   :  { %v980_v37 = vpop.f32.mrf.mxu1 }
 0x110   :  { %v7660_v28 = vpop.f32.mrf.mxu1 }
 0x112   :  { %v9116_v0 = vpop.f32.mrf.mxu1 }
 0x115   :  { %v7639_v56 = vpop.f32.mrf.mxu0 }
 0x116   :  { %v989_v3 = vadd.f32 %v7659_v36, %v7639_v56 }
 0x117   :  { %v807_v45 = vpop.f32.mrf.mxu0 }
 0x118   :  { %v981_v53 = vadd.f32 %v980_v37, %v807_v45 }
 0x119   :  { %v7640_v24 = vpop.f32.mrf.mxu0 }
 0x11a   :  { %v992_v16 = vadd.f32 %v7660_v28, %v7640_v24 }
 0x11b   :  { %v9118_v11 = vpop.f32.mrf.mxu0 }
 0x11c   :  { %v7663_v6 = vpop.f32.mrf.mxu1 }
 0x11e   :  { %v996_v33 = vpop.f32.mrf.mxu1 }
 0x120   :  { %v7664_v8 = vpop.f32.mrf.mxu1 }
 0x122   :  { %v9120_v57 = vpop.f32.mrf.mxu1 }
 0x124   :  { %v7691_v2 = vpop.f32.mrf.mxu1  ;;  %v7643_v54 = vpop.f32.mrf.mxu0 }
 0x125   :  { %v1005_v7 = vadd.f32 %v7663_v6, %v7643_v54 }
 0x126   :  { %v9122_v5 = vpop.f32.mrf.mxu1  ;;  %v823_v23 = vpop.f32.mrf.mxu0 }
 0x127   :  { %v997_v10 = vadd.f32 %v996_v33, %v823_v23 }
 0x128   :  { %v9124_v1 = vpop.f32.mrf.mxu1  ;;  %v7644_v29 = vpop.f32.mrf.mxu0 }
 0x129   :  { %v1008_v46 = vadd.f32 %v7664_v8, %v7644_v29 }
 0x12a   :  { %v9126_v61 = vpop.f32.mrf.mxu0  ;;  %v9128_v9 = vpop.f32.mrf.mxu1 }
 0x12c   :  { %v7671_v43 = vpop.f32.mrf.mxu0 }
 0x12d   :  { %v1290_v52 = vadd.f32 %v7671_v43, %v957_v21 }
 0x12e   :  { %v1225_v18 = vpop.f32.mrf.mxu0  ;;  %v7695_v35 = vpop.f32.mrf.mxu1 }
 0x12f   :  { %v9130_v26 = vadd.f32 %v1225_v18, %v949_v20  ;;  %v1500_v27 = vadd.f32 %v7691_v2, %v1290_v52 }
 0x130   :  { %v7672_v40 = vpop.f32.mrf.mxu0  ;;  %v9132_v41 = vpop.f32.mrf.mxu1 }
 0x131   :  { %v9134_v4 = vadd.f32 %v7672_v40, %v960_v32 }
 0x132   :  { %v9136_v49 = vpop.f32.mrf.mxu0  ;;  %v9138_v48 = vpop.f32.mrf.mxu1 }
 0x134   :  { %v7675_v14 = vpop.f32.mrf.mxu0  ;;  %v9140_v30 = vpop.f32.mrf.mxu1 }
 0x135   :  { %v1294_v58 = vadd.f32 %v7675_v14, %v973_v59 }
 0x136   :  { %v1241_v50 = vpop.f32.mrf.mxu0  ;;  %v7699_v21 = vpop.f32.mrf.mxu1 }
 0x137   :  { %v9142_v51 = vadd.f32 %v1241_v50, %v965_v62  ;;  %v1504_v22 = vadd.f32 %v7695_v35, %v1294_v58 }
 0x138   :  { %v7676_v20 = vpop.f32.mrf.mxu0  ;;  %v9144_v31 = vpop.f32.mrf.mxu1 }
 0x139   :  { %v9146_v44 = vadd.f32 %v7676_v20, %v976_v13 }
 0x13a   :  { %v9148_v32 = vpop.f32.mrf.mxu0  ;;  %v9150_v17 = vpop.f32.mrf.mxu1 }
 0x13b   :  { %11119 = vst [vmem:[#allocation10_spill] sm:$0xff] %v9150_v17 }
 0x13c   :  { %v7679_v39 = vpop.f32.mrf.mxu0  ;;  %v9152_v12 = vpop.f32.mrf.mxu1 }
 0x13d   :  { %v1298_v55 = vadd.f32 %v7679_v39, %v989_v3 }
 0x13e   :  { %v1257_v15 = vpop.f32.mrf.mxu0  ;;  %v7703_v59 = vpop.f32.mrf.mxu1 }
 0x13f   :  { %v9154_v36 = vadd.f32 %v1257_v15, %v981_v53  ;;  %v1508_v62 = vadd.f32 %v7699_v21, %v1298_v55 }
 0x140   :  { %v7680_v37 = vpop.f32.mrf.mxu0  ;;  %v9156_v28 = vpop.f32.mrf.mxu1 }
 0x141   :  { %11120 = vst [vmem:[#allocation11_spill] sm:$0xff] %v9156_v28  ;;  %v9158_v56 = vadd.f32 %v7680_v37, %v992_v16 }
 0x142   :  { %v9160_v13 = vpop.f32.mrf.mxu0  ;;  %v9162_v45 = vpop.f32.mrf.mxu1 }
 0x143   :  { %11121 = vst [vmem:[#allocation12_spill] sm:$0xff] %v9162_v45 }
 0x144   :  { %v7683_v24 = vpop.f32.mrf.mxu0  ;;  %v9164_v6 = vpop.f32.mrf.mxu1 }
 0x145   :  { %11122 = vst [vmem:[#allocation13_spill] sm:$0xff] %v9164_v6  ;;  %v1302_v33 = vadd.f32 %v7683_v24, %v1005_v7 }
 0x146   :  { %v1273_v8 = vpop.f32.mrf.mxu0  ;;  %v9166_v3 = vpop.f32.mrf.mxu1 }
 0x147   :  { %v9168_v2 = vadd.f32 %v1273_v8, %v997_v10  ;;  %v1512_v53 = vadd.f32 %v7703_v59, %v1302_v33 }
 0x148   :  { %v7684_v54 = vpop.f32.mrf.mxu0  ;;  %v9170_v23 = vpop.f32.mrf.mxu1 }
 0x149   :  { %11123 = vst [vmem:[#allocation14_spill] sm:$0xff] %v9168_v2  ;;  %v9172_v29 = vadd.f32 %v7684_v54, %v1008_v46 }
 0x14a   :  { %v9174_v16 = vpop.f32.mrf.mxu0  ;;  %v9176_v43 = vpop.f32.mrf.mxu1 }
 0x14b   :  { %11124 = vst [vmem:[#allocation15_spill] sm:$0xff] %v9172_v29  ;;  %11125 = vst [vmem:[#allocation16_spill] sm:$0xff] %v9174_v16  ;;  %v952_v16 = vadd.f32 %v9108_v47, %v9110_v34 }
 0x14c   :  { %v7711_v52 = vpop.f32.mrf.mxu0  ;;  %v9178_v18 = vpop.f32.mrf.mxu1 }
 0x14d   :  { %v9180_v35 = vadd.f32 %v7711_v52, %v1500_v27  ;;  %v1289_v2 = vadd.f32 %v9136_v49, %v952_v16  ;;  %v1501_v49 = vadd.f32 %v9124_v1, %v9134_v4 }
 0x14e   :  { %v1869_v7 = vpop.f32.mrf.mxu0  ;;  %v9182_v40 = vpop.f32.mrf.mxu1 }
 0x150   :  { %v7712_v10 = vpop.f32.mrf.mxu0  ;;  %v9184_v14 = vpop.f32.mrf.mxu1 }
 0x152   :  { %v1872_v58 = vpop.f32.mrf.mxu0  ;;  %v9186_v50 = vpop.f32.mrf.mxu1 }
 0x154   :  { %v7715_v46 = vpop.f32.mrf.mxu0  ;;  %v9188_v21 = vpop.f32.mrf.mxu1 }
 0x155   :  { %v9190_v20 = vadd.f32 %v7715_v46, %v1504_v22 }
 0x156   :  { %v1885_v39 = vpop.f32.mrf.mxu0  ;;  %v9192_v55 = vpop.f32.mrf.mxu1 }
 0x157   :  { %11126 = vst [vmem:[#allocation17_spill] sm:$0xff] %v9192_v55 }
 0x158   :  { %v9194_v15 = vpop.f32.mrf.mxu0  ;;  %v9196_v27 = vpop.f32.mrf.mxu1 }
 0x159   :  { %11127 = vst [vmem:[#allocation18_spill] sm:$0xff] %v9196_v27 }
 0x15a   :  { %v9198_v59 = vpop.f32.mrf.mxu0  ;;  %v9200_v37 = vpop.f32.mrf.mxu1 }
 0x15b   :  { %11128 = vst [vmem:[#allocation19_spill] sm:$0xff] %v9200_v37 }
 0x15c   :  { %v7719_v24 = vpop.f32.mrf.mxu0  ;;  %v9206_v54 = vpop.f32.mrf.mxu1 }
 0x15d   :  { %v9202_v33 = vadd.f32 %v7719_v24, %v1508_v62  ;;  %11130 = vst [vmem:[#allocation21_spill] sm:$0xff] %v9206_v54 }
 0x15e   :  { %v9204_v8 = vpop.f32.mrf.mxu0 }
 0x15f   :  { %11129 = vst [vmem:[#allocation20_spill] sm:$0xff] %v9202_v33 }
 0x160   :  { %v9208_v22 = vpop.f32.mrf.mxu0 }
 0x161   :  { %11131 = vst [vmem:[#allocation22_spill] sm:$0xff] %v9208_v22 }
 0x162   :  { %v9210_v52 = vpop.f32.mrf.mxu0  ;;  %v9212_v46 = vpop.f32.mrf.mxu1 }
 0x163   :  { %11132 = vst [vmem:[#allocation23_spill] sm:$0xff] %v9210_v52  ;;  %11133 = vst [vmem:[#allocation24_spill] sm:$0xff] %v9212_v46 }
 0x164   :  { %v7723_v25 = vpop.f32.mrf.mxu0  ;;  %v9214_v19 = vpop.f32.mrf.mxu1 }
 0x165   :  { %11134 = vst [vmem:[#allocation25_spill] sm:$0xff] %v9214_v19  ;;  %v9216_v63 = vadd.f32 %v7723_v25, %v1512_v53 }
 0x166   :  { %v9218_v60 = vpop.f32.mrf.mxu0  ;;  %v9220_v45 = vpop.f32.mrf.mxu1 }
 0x167   :  { %11135 = vst [vmem:[#allocation26_spill] sm:$0xff] %v9216_v63  ;;  %11136 = vst [vmem:[#allocation27_spill] sm:$0xff] %v9218_v60 }
 0x168   :  { %11137 = vst [vmem:[#allocation28_spill] sm:$0xff] %v9220_v45  ;;  %v9222_v62 = vpop.f32.mrf.mxu0  ;;  %v9226_v29 = vpop.f32.mrf.mxu1 }
 0x169   :  { %11138 = vst [vmem:[#allocation29_spill] sm:$0xff] %v9222_v62  ;;  %11140 = vst [vmem:[#allocation31_spill] sm:$0xff] %v9226_v29 }
 0x16a   :  { %v9224_v24 = vpop.f32.mrf.mxu0 }
 0x16b   :  { %11139 = vst [vmem:[#allocation30_spill] sm:$0xff] %v9224_v24 }
 0x16c   :  { %v7751_v37 = vpop.f32.mrf.mxu0 }
 0x16e   :  { %v2370_v6 = vpop.f32.mrf.mxu0  ;;  %v7771_v54 = vpop.f32.mrf.mxu1 }
 0x170   :  { %v7752_v55 = vpop.f32.mrf.mxu0  ;;  %v2804_v46 = vpop.f32.mrf.mxu1 }
 0x172   :  { %v2373_v33 = vpop.f32.mrf.mxu0  ;;  %v7772_v22 = vpop.f32.mrf.mxu1 }
 0x174   :  { %v9228_v19 = vpop.f32.mrf.mxu0  ;;  %v2807_v25 = vpop.f32.mrf.mxu1 }
 0x176   :  { %v2386_v53 = vpop.f32.mrf.mxu0 }
 0x178   :  { %v9230_v63 = vpop.f32.mrf.mxu0  ;;  %v9232_v45 = vpop.f32.mrf.mxu1 }
 0x179   :  { %11141 = vst [vmem:[#allocation32_spill] sm:$0xff] %v9230_v63  ;;  %11142 = vst [vmem:[#allocation33_spill] sm:$0xff] %v9232_v45  ;;  %v1498_v45 = vadd.f32 %v9122_v5, %v9130_v26 }
 0x17a   :  { %v9234_v62 = vpop.f32.mrf.mxu0  ;;  %v2820_v29 = vpop.f32.mrf.mxu1 }
 0x17b   :  { %v1932_v17 = vadd.f32 %v1869_v7, %v1498_v45  ;;  %v2224_v7 = vadd.f32 %v9166_v3, %v9180_v35 }
 0x17c   :  { %v9236_v24 = vpop.f32.mrf.mxu0  ;;  %v9245_v27 = vpop.f32.mrf.mxu1 }
 0x17d   :  { %11143 = vst [vmem:[#allocation34_spill] sm:$0xff] %v9236_v24  ;;  %v1499_v24 = vadd.f32 %v9128_v9, %v1289_v2  ;;  %v1935_v9 = vadd.f32 %v7712_v10, %v1501_v49  ;;  %v2222_v45 = vadd.f32 %v9170_v23, %v1932_v17  ;;  %v984_v17 = vadd.f32 %v9116_v0, %v9118_v11  ;;  %v11147_v49 = vld [vmem:[#allocation23_spill] sm:$0xff] }
 0x17e   :  { %v9238_v60 = vpop.f32.mrf.mxu0  ;;  %v9256_v47 = vpop.f32.mrf.mxu1  ;;  %v1506_v0 = vadd.f32 %v9144_v31, %v9154_v36 }
 0x17f   :  { %11144 = vst [vmem:[#allocation35_spill] sm:$0xff] %v9238_v60  ;;  %v968_v60 = vadd.f32 %v9112_v42, %v9114_v38  ;;  %v1933_v16 = vadd.f32 %v1872_v58, %v1499_v24  ;;  %v2433_v4 = vadd.f32 %v2370_v6, %v2222_v45  ;;  %v1297_v58 = vadd.f32 %v9160_v13, %v984_v17 }
 0x180   :  { %v9242_v28 = vpop.f32.mrf.mxu0  ;;  %v1940_v13 = vadd.f32 %v9204_v8, %v1506_v0  ;;  %v11149_v45 = vld [vmem:[#allocation32_spill] sm:$0xff]  ;;  %v11154_v17 = vld [vmem:[#allocation33_spill] sm:$0xff]  ;;  %v11159_v0 = vld [vmem:[#allocation27_spill] sm:$0xff] }
 0x181   :  { %11145 = vst [vmem:[#allocation36_spill] sm:$0xff] %v9242_v28  ;;  %v1502_v28 = vadd.f32 %v9132_v41, %v9142_v51  ;;  %v1293_v5 = vadd.f32 %v9148_v32, %v968_v60  ;;  %v9268_v42 = vpop.f32.mrf.mxu1  ;;  %v2223_v1 = vadd.f32 %v9178_v18, %v1933_v16  ;;  %v2225_v60 = vadd.f32 %v9176_v43, %v1935_v9 }
 0x182   :  { %v9247_v52 = vpop.f32.mrf.mxu0  ;;  %v2435_v32 = vadd.f32 %v7751_v37, %v2224_v7  ;;  %v1507_v31 = vadd.f32 %v9152_v12, %v1297_v58  ;;  %v11146_v12 = vld [vmem:[#allocation10_spill] sm:$0xff]  ;;  %v11157_v58 = vld [vmem:[#allocation17_spill] sm:$0xff] }
 0x183   :  { %v1936_v2 = vadd.f32 %v1885_v39, %v1502_v28  ;;  %v1503_v41 = vadd.f32 %v9140_v30, %v1293_v5  ;;  %v2434_v10 = vadd.f32 %v2373_v33, %v2223_v1  ;;  %v1505_v28 = vadd.f32 %v9138_v48, %v9146_v44  ;;  %v9283_v35 = vpop.f32.mrf.mxu1 }
 0x184   :  { %v9251_v63 = vpop.f32.mrf.mxu0  ;;  %v2436_v18 = vadd.f32 %v7752_v55, %v2225_v60  ;;  %v2867_v30 = vadd.f32 %v2804_v46, %v2433_v4  ;;  %v2869_v11 = vadd.f32 %v7771_v54, %v2435_v32  ;;  %v11150_v4 = vld [vmem:[#allocation14_spill] sm:$0xff] }
 0x185   :  { %v2226_v23 = vadd.f32 %v9184_v14, %v1936_v2  ;;  %v1937_v3 = vadd.f32 %v9198_v59, %v1503_v41  ;;  %v1939_v43 = vadd.f32 %v9194_v15, %v1505_v28  ;;  %v2868_v48 = vadd.f32 %v2807_v25, %v2434_v10  ;;  %v9294_v55 = vpop.f32.mrf.mxu1  ;;  %v11151_v41 = vld [vmem:[#allocation11_spill] sm:$0xff] }
 0x186   :  { %v9258_v34 = vpop.f32.mrf.mxu0  ;;  %v2228_v14 = vadd.f32 %v9182_v40, %v9190_v20  ;;  %v2870_v15 = vadd.f32 %v7772_v22, %v2436_v18  ;;  %v1000_v22 = vadd.f32 %v9120_v57, %v9126_v61  ;;  %v1510_v57 = vadd.f32 %v11151_v41, %v11150_v4  ;;  %v11152_v61 = vld [vmem:[#allocation16_spill] sm:$0xff] }
 0x187   :  { %v2437_v39 = vadd.f32 %v2386_v53, %v2226_v23  ;;  %v2227_v59 = vadd.f32 %v9188_v21, %v1937_v3  ;;  %v2229_v36 = vadd.f32 %v9186_v50, %v1939_v43  ;;  %v1509_v50 = vadd.f32 %v11146_v12, %v9158_v56  ;;  %v11153_v56 = vld [vmem:[#allocation22_spill] sm:$0xff]  ;;  %v11155_v3 = vld [vmem:[#allocation35_spill] sm:$0xff] }
 0x188   :  { %v9265_v26 = vpop.f32.mrf.mxu0  ;;  %v2439_v54 = vadd.f32 %v9228_v19, %v2228_v14  ;;  %v1941_v19 = vadd.f32 %v11147_v49, %v1507_v31  ;;  %v11160_v31 = vld [vmem:[#allocation13_spill] sm:$0xff]  ;;  %v11163_v49 = vld [vmem:[#allocation15_spill] sm:$0xff]  ;;  %v11167_v41 = vld [vmem:[#allocation36_spill] sm:$0xff] }
 0x189   :  { %v2871_v25 = vadd.f32 %v2820_v29, %v2437_v39  ;;  %v2438_v21 = vadd.f32 %v9234_v62, %v2227_v59  ;;  %v2839_v29 = vpop.f32.mrf.mxu1  ;;  %v11148_v62 = vld [vmem:[#allocation18_spill] sm:$0xff]  ;;  %v2440_v2 = vadd.f32 %v11149_v45, %v2229_v36  ;;  %v1943_v60 = vadd.f32 %v11153_v56, %v1509_v50  ;;  %v11158_v39 = vld [vmem:[#allocation21_spill] sm:$0xff] }
 0x18a   :  { %v9270_v38 = vpop.f32.mrf.mxu0  ;;  %v2230_v9 = vadd.f32 %v11148_v62, %v1940_v13  ;;  %v2873_v28 = vadd.f32 %v11154_v17, %v2439_v54  ;;  %v11161_v54 = vld [vmem:[#allocation19_spill] sm:$0xff] }
 0x18b   :  { %v2872_v23 = vadd.f32 %v9256_v47, %v2438_v21  ;;  %v11162_v21 = vld [vmem:[#allocation34_spill] sm:$0xff] }
 0x18c   :  { %v7791_v51 = vpop.f32.mrf.mxu0 }
 0x18d   :  { %v9297_v46 = vadd.f32 %v7791_v51, %v2869_v11  ;;  %v1301_v51 = vadd.f32 %v11152_v61, %v1000_v22  ;;  %v1944_v11 = vadd.f32 %v11159_v0, %v1510_v57  ;;  %v11168_v61 = vld [vmem:[#allocation29_spill] sm:$0xff] }
 0x18e   :  { %v3094_v6 = vpop.f32.mrf.mxu0 }
 0x18f   :  { %v9289_v44 = vadd.f32 %v3094_v6, %v2867_v30  ;;  %v3176_v7 = vsel %vm11101_vm8, %v9297_v46, 0.0  ;;  %v2441_v6 = vadd.f32 %v11155_v3, %v2230_v9  ;;  %v11156_v30 = vld [vmem:[#allocation20_spill] sm:$0xff]  ;;  %v1511_v36 = vadd.f32 %v11160_v31, %v1301_v51 }
 0x190   :  { %v7792_v37 = vpop.f32.mrf.mxu0  ;;  %v2232_v43 = vadd.f32 %v11157_v58, %v11156_v30  ;;  %v11170_v3 = vld [vmem:[#allocation24_spill] sm:$0xff] }
 0x191   :  { %v3173_v20 = vsel %vm11101_vm8, %v9289_v44, 0.0  ;;  %v9307_v53 = vadd.f32 %v7792_v37, %v2870_v15  ;;  %v2231_v37 = vadd.f32 %v11158_v39, %v1941_v19  ;;  %v2875_v12 = vadd.f32 %v9283_v35, %v2441_v6  ;;  %v11164_v19 = vld [vmem:[#allocation12_spill] sm:$0xff] }
 0x192   :  { %v3097_v33 = vpop.f32.mrf.mxu0 }
 0x193   :  { %v9299_v24 = vadd.f32 %v3097_v33, %v2868_v48  ;;  %v3178_v18 = vsel %vm11101_vm8, %v9307_v53, 0.0  ;;  %v7783_v48 = vpop.f32.mrf.mxu1  ;;  %v2874_v33 = vadd.f32 %v9245_v27, %v2440_v2  ;;  %v2442_v50 = vadd.f32 %v9247_v52, %v2231_v37 }
 0x194   :  { %v7795_v40 = vpop.f32.mrf.mxu0 }
 0x195   :  { %v3174_v8 = vsel %vm11101_vm8, %v9299_v24, 0.0  ;;  %v9336_v13 = vadd.f32 %v7795_v40, %v2873_v28  ;;  %v2852_v9 = vpop.f32.mrf.mxu1 }
 0x196   :  { %v3175_v16 = vadd.f32 %v3174_v8, %v3173_v20  ;;  %v3110_v5 = vpop.f32.mrf.mxu0  ;;  %v2443_v20 = vadd.f32 %v11162_v21, %v2232_v43 }
 0x197   :  { %v9320_v1 = vadd.f32 %v3110_v5, %v2871_v25  ;;  %v2233_v25 = vadd.f32 %v11161_v54, %v1943_v60  ;;  %v11165_v5 = vld [vmem:[#allocation30_spill] sm:$0xff]  ;;  %v3184_v52 = vsel %vm11101_vm8, %v9336_v13, 0.0  ;;  %v7784_v58 = vpop.f32.mrf.mxu1 }
 0x198   :  { %v3177_v32 = vadd.f32 %v3176_v7, %v3175_v16  ;;  %v7796_v10 = vpop.f32.mrf.mxu0  ;;  %v1513_v16 = vadd.f32 %v11164_v19, %v11163_v49  ;;  %v1945_v62 = vadd.f32 %v11165_v5, %v1511_v36  ;;  %v11166_v7 = vld [vmem:[#allocation25_spill] sm:$0xff] }
 0x199   :  { %v3180_v47 = vsel %vm11101_vm8, %v9320_v1, 0.0  ;;  %v9347_v27 = vadd.f32 %v7796_v10, %v2874_v33  ;;  %v2234_v4 = vadd.f32 %v11166_v7, %v1944_v11  ;;  %v2444_v57 = vadd.f32 %v11167_v41, %v2233_v25 }
 0x19a   :  { %v3179_v14 = vadd.f32 %v3178_v18, %v3177_v32  ;;  %v3113_v59 = vpop.f32.mrf.mxu0  ;;  %v1947_v51 = vadd.f32 %v11168_v61, %v1513_v16  ;;  %v2877_v32 = vadd.f32 %v9268_v42, %v2443_v20  ;;  %v2876_v10 = vadd.f32 %v2839_v29, %v2442_v50  ;;  %v11171_v18 = vld [vmem:[#allocation31_spill] sm:$0xff] }
 0x19b   :  { %v9340_v15 = vadd.f32 %v3113_v59, %v2872_v23  ;;  %v2445_v17 = vadd.f32 %v9258_v34, %v2234_v4  ;;  %v3186_v28 = vsel %vm11101_vm8, %v9347_v27, 0.0  ;;  %v11169_v23 = vld [vmem:[#allocation26_spill] sm:$0xff]  ;;  %v2235_v30 = vadd.f32 %v11171_v18, %v1945_v62  ;;  %v11172_v34 = vld [vmem:[#allocation28_spill] sm:$0xff] }
 0x19c   :  { %v3181_v8 = vadd.f32 %v3180_v47, %v3179_v14  ;;  %v7799_v22 = vpop.f32.mrf.mxu0  ;;  %v2236_v6 = vadd.f32 %v11170_v3, %v11169_v23  ;;  %v2878_v37 = vadd.f32 %v9294_v55, %v2444_v57  ;;  %v2237_v11 = vadd.f32 %v11172_v34, %v1947_v51  ;;  %v2855_v55 = vpop.f32.mrf.mxu1 }
 0x19d   :  { %v3182_v40 = vsel %vm11101_vm8, %v9340_v15, 0.0  ;;  %v3167_v0 = vadd.f32 %v7799_v22, %v2877_v32  ;;  %v2879_v47 = vadd.f32 %v2852_v9, %v2445_v17  ;;  %v2446_v31 = vadd.f32 %v9270_v38, %v2235_v30 }
 0x19e   :  { %v3183_v45 = vadd.f32 %v3182_v40, %v3181_v8  ;;  %v3126_v2 = vpop.f32.mrf.mxu0  ;;  %v2447_v14 = vadd.f32 %v9251_v63, %v2236_v6  ;;  %v2448_v20 = vadd.f32 %v9265_v26, %v2237_v11 }
 0x19f   :  { %v9358_v35 = vadd.f32 %v3126_v2, %v2875_v12  ;;  %v3192_v8 = vsel %vm11101_vm8, %v3167_v0, 0.0  ;;  %v2880_v40 = vadd.f32 %v2855_v55, %v2446_v31 }
 0x1a0   :  { %v3185_v56 = vadd.f32 %v3184_v52, %v3183_v45  ;;  %v7800_v60 = vpop.f32.mrf.mxu0  ;;  %v2881_v63 = vadd.f32 %v7783_v48, %v2447_v14  ;;  %v2882_v16 = vadd.f32 %v7784_v58, %v2448_v20 }
 0x1a1   :  { %v3188_v42 = vsel %vm11101_vm8, %v9358_v35, 0.0  ;;  %v3168_v36 = vadd.f32 %v7800_v60, %v2878_v37 }
 0x1a2   :  { %v3187_v43 = vadd.f32 %v3186_v28, %v3185_v56  ;;  %v3129_v39 = vpop.f32.mrf.mxu0 }
 0x1a3   :  { %v9371_v29 = vadd.f32 %v3129_v39, %v2876_v10  ;;  %v3194_v49 = vsel %vm11101_vm8, %v3168_v36, 0.0 }
 0x1a4   :  { %v3189_v59 = vadd.f32 %v3188_v42, %v3187_v43  ;;  %v7803_v33 = vpop.f32.mrf.mxu0 }
 0x1a5   :  { %v3190_v54 = vsel %vm11101_vm8, %v9371_v29, 0.0  ;;  %v3171_v5 = vadd.f32 %v7803_v33, %v2881_v63 }
 0x1a6   :  { %v3191_v25 = vadd.f32 %v3190_v54, %v3189_v59  ;;  %v3142_v21 = vpop.f32.mrf.mxu0 }
 0x1a7   :  { %v3169_v22 = vadd.f32 %v3142_v21, %v2879_v47  ;;  %v3200_v4 = vsel %vm11101_vm8, %v3171_v5, 0.0 }
 0x1a8   :  { %v3193_v12 = vadd.f32 %v3192_v8, %v3191_v25  ;;  %v7804_v50 = vpop.f32.mrf.mxu0 }
 0x1a9   :  { %v3196_v62 = vsel %vm11101_vm8, %v3169_v22, 0.0  ;;  %v3172_v2 = vadd.f32 %v7804_v50, %v2882_v16 }
 0x1aa   :  { %v3195_v19 = vadd.f32 %v3194_v49, %v3193_v12  ;;  %v3145_v38 = vpop.f32.mrf.mxu0 }
 0x1ab   :  { %v3170_v9 = vadd.f32 %v3145_v38, %v2880_v40  ;;  %v3202_v48 = vsel %vm11101_vm8, %v3172_v2, 0.0 }
 0x1ac   :  { %v3197_v45 = vadd.f32 %v3196_v62, %v3195_v19 }
 0x1ad   :  { %v3198_v26 = vsel %vm11101_vm8, %v3170_v9, 0.0 }
 0x1ae   :  { %v3199_v7 = vadd.f32 %v3198_v26, %v3197_v45 }
 0x1b0   :  { %v3201_v41 = vadd.f32 %v3200_v4, %v3199_v7  ;;  %v8031_v4 = vld [vmem:[%s11089_s4 + $0x10] sm:$0xff]  }
 0x1b2   :  { %v3203_v57 = vadd.f32 %v3202_v48, %v3201_v41  ;;  %v8032_v48 = vld [vmem:[%s11089_s4 + $0x8] sm:$0xff]  }
 0x1b3   :  { %7825 = vmatprep.subr.bf16.mxu0 %v8032_v48 }
 0x1b4   :  { %v3204_v52 = vrot.slane %v3203_v57, 4  ;;  %7826 = vmatpush3.bf16.msra.mxu0 %v8032_v48 }
 0x1b6   :  { %v3205_v61 = vadd.f32 %v3204_v52, %v3203_v57  ;;  %v8033_v57 = vld [vmem:[%s11089_s4] sm:$0xff]  }
 0x1b7   :  { %7827 = vmatprep.subr.bf16.mxu0 %v8033_v57 }
 0x1b8   :  { %v3206_v51 = vrot.slane %v3205_v61, 2  ;;  %7828 = vmatpush3.bf16.msra.mxu0 %v8033_v57 }
 0x1ba   :  { %v3207_v56 = vadd.f32 %v3206_v51, %v3205_v61 }
 0x1bc   :  { %v3208_v60 = vrot.slane %v3207_v56, 1 }
 0x1be   :  { %v3209_v32 = vadd.f32 %v3208_v60, %v3207_v56 }
 0x1c0   :  { %v3210_v10 = vmul.f32 0.0078125, %v3209_v32 }
 0x1c2   :  { %v9386_v17 = vsub.f32 %v9289_v44, %v3210_v10  ;;  %v9389_v28 = vsub.f32 %v9299_v24, %v3210_v10  ;;  %v9392_v23 = vsub.f32 %v9297_v46, %v3210_v10  ;;  %v9395_v3 = vsub.f32 %v9307_v53, %v3210_v10 }
 0x1c3   :  { %v9398_v6 = vsub.f32 %v9320_v1, %v3210_v10  ;;  %v9401_v18 = vsub.f32 %v9336_v13, %v3210_v10  ;;  %v9404_v30 = vsub.f32 %v9347_v27, %v3210_v10  ;;  %v9407_v44 = vsub.f32 %v9358_v35, %v3210_v10 }
 0x1c4   :  { %v9409_v24 = vsub.f32 %v3167_v0, %v3210_v10  ;;  %v9411_v58 = vsub.f32 %v3168_v36, %v3210_v10  ;;  %v9413_v46 = vsub.f32 %v3169_v22, %v3210_v10  ;;  %v9415_v53 = vsub.f32 %v3171_v5, %v3210_v10 }
 0x1c5   :  { %v9417_v43 = vsub.f32 %v3172_v2, %v3210_v10  ;;  %v3227_v1 = vmul.f32 %v9386_v17, %v9386_v17  ;;  %v3228_v13 = vmul.f32 %v9389_v28, %v9389_v28  ;;  %v3229_v27 = vmul.f32 %v9392_v23, %v9392_v23 }
 0x1c6   :  { %v9426_v35 = vsub.f32 %v9340_v15, %v3210_v10  ;;  %v3230_v39 = vmul.f32 %v9395_v3, %v9395_v3  ;;  %v3231_v34 = vmul.f32 %v9398_v6, %v9398_v6  ;;  %v3233_v47 = vmul.f32 %v9401_v18, %v9401_v18 }
 0x1c7   :  { %v3243_v37 = vsel %vm11101_vm8, %v3227_v1, 0.0  ;;  %v3244_v0 = vsel %vm11101_vm8, %v3228_v13, 0.0  ;;  %v3246_v11 = vsel %vm11101_vm8, %v3229_v27, 0.0  ;;  %v9442_v54 = vsub.f32 %v9371_v29, %v3210_v10  ;;  %v8038_v27 = vld [vmem:[%s11089_s4 + $0x28] sm:$0xff]  }
 0x1c8   :  { %v3245_v42 = vadd.f32 %v3244_v0, %v3243_v37  ;;  %v3232_v59 = vmul.f32 %v9426_v35, %v9426_v35  ;;  %v3248_v15 = vsel %vm11101_vm8, %v3230_v39, 0.0  ;;  %v3250_v31 = vsel %vm11101_vm8, %v3231_v34, 0.0 }
 0x1c9   :  { %v3234_v55 = vmul.f32 %v9404_v30, %v9404_v30  ;;  %v3235_v20 = vmul.f32 %v9407_v44, %v9407_v44  ;;  %v3254_v8 = vsel %vm11101_vm8, %v3233_v47, 0.0  ;;  %v3236_v12 = vmul.f32 %v9442_v54, %v9442_v54 }
 0x1ca   :  { %v3247_v14 = vadd.f32 %v3246_v11, %v3245_v42  ;;  %v3252_v25 = vsel %vm11101_vm8, %v3232_v59, 0.0  ;;  %v3237_v29 = vmul.f32 %v9409_v24, %v9409_v24  ;;  %v9456_v19 = vsub.f32 %v3170_v9, %v3210_v10  ;;  %v8030_v9 = vld [vmem:[%s11089_s4 + $0x18] sm:$0xff]  }
 0x1cb   :  { %v3256_v50 = vsel %vm11101_vm8, %v3234_v55, 0.0  ;;  %v3258_v40 = vsel %vm11101_vm8, %v3235_v20, 0.0  ;;  %v3238_v38 = vmul.f32 %v9411_v58, %v9411_v58  ;;  %v3260_v16 = vsel %vm11101_vm8, %v3236_v12, 0.0  ;;  %7805 = vmatprep.subr.bf16.mxu1 %v8030_v9  ;;  %v9502_v20 = vld [vmem:[#allocation2] sm:$0xf] }
 0x1cc   :  { %v3249_v33 = vadd.f32 %v3248_v15, %v3247_v14  ;;  %v3239_v62 = vmul.f32 %v9413_v46, %v9413_v46  ;;  %v3262_v45 = vsel %vm11101_vm8, %v3237_v29, 0.0  ;;  %v3240_v26 = vmul.f32 %v9456_v19, %v9456_v19  ;;  %7806 = vmatpush3.bf16.msra.mxu1 %v8030_v9 }
 0x1cd   :  { %v3264_v7 = vsel %vm11101_vm8, %v3238_v38, 0.0  ;;  %v3241_v52 = vmul.f32 %v9415_v53, %v9415_v53  ;;  %v3242_v56 = vmul.f32 %v9417_v43, %v9417_v43  ;;  %7807 = vmatprep.subr.bf16.mxu1 %v8031_v4  ;;  %v3286_v47 = vlaneseq }
 0x1ce   :  { %v3251_v36 = vadd.f32 %v3250_v31, %v3249_v33  ;;  %v3266_v61 = vsel %vm11101_vm8, %v3239_v62, 0.0  ;;  %v3268_v60 = vsel %vm11101_vm8, %v3240_v26, 0.0  ;;  %v9493_v33 = vld [vmem:[%s11089_s4 + $0x38] sm:$0xff]   ;;  %v3814_v12 = vshrl.u32 %v9502_v20, 16  ;;  %v7121_v26 = vld [vmem:[%s11088_s3] ss:$0 sm:$0xff] }
 0x1cf   :  { %v3270_v10 = vsel %vm11101_vm8, %v3241_v52, 0.0  ;;  %v3272_v13 = vsel %vm11101_vm8, %v3242_v56, 0.0  ;;  %7865 = vmatprep.subr.bf16.mxu0 %v9493_v33  ;;  %v9496_v31 = vshrl.u32 %v3286_v47, 7 }
 0x1d0   :  { %v3253_v21 = vadd.f32 %v3252_v25, %v3251_v36  ;;  %7808 = vmatpush3.bf16.msra.mxu1 %v8031_v4  ;;  %v3281_v36 = vld [vmem:[%s11087_s2] sm:$0x1] }
 0x1d1   :  { %7845 = vmatprep.subr.bf16.mxu1 %v8038_v27  ;;  %11173 = vst [vmem:[#allocation10_spill] sm:$0xff] %v9496_v31  ;;  %v11102_v55 = vsub.s32 0, %v9496_v31 }
 0x1d2   :  { %v3255_v22 = vadd.f32 %v3254_v8, %v3253_v21  ;;  %v9504_v8 = vld [vmem:[#allocation2 + $0x50] sm:$0xf] }
 0x1d3   :  { %v3929_v29 = vshll.u32 %v9504_v8, 16 }
 0x1d4   :  { %v3257_v63 = vadd.f32 %v3256_v50, %v3255_v22  ;;  %v3817_v50 = vshll.u32 %v9502_v20, 16 }
 0x1d6   :  { %v3259_v49 = vadd.f32 %v3258_v40, %v3257_v63  ;;  %v3926_v63 = vshrl.u32 %v9504_v8, 16 }
 0x1d8   :  { %v3261_v5 = vadd.f32 %v3260_v16, %v3259_v49 }
 0x1da   :  { %v3263_v2 = vadd.f32 %v3262_v45, %v3261_v5 }
 0x1dc   :  { %v3265_v41 = vadd.f32 %v3264_v7, %v3263_v2 }
 0x1de   :  { %v3267_v51 = vadd.f32 %v3266_v61, %v3265_v41 }
 0x1e0   :  { %v3269_v32 = vadd.f32 %v3268_v60, %v3267_v51  ;;  %v9551_v51 = vld [vmem:[#allocation2 + $0x4] sm:$0x1] }
 0x1e2   :  { %v3271_v1 = vadd.f32 %v3270_v10, %v3269_v32  ;;  %v3823_v10 = vshll.u32 %v9551_v51, 16 }
 0x1e4   :  { %v3273_v39 = vadd.f32 %v3272_v13, %v3271_v1 }
 0x1e6   :  { %v3274_v37 = vrot.slane %v3273_v39, 4 }
 0x1e8   :  { %v3275_v0 = vadd.f32 %v3274_v37, %v3273_v39  ;;  %v9561_v39 = vld [vmem:[#allocation2 + $0x54] sm:$0x1] }
 0x1e9   :  { %v3935_v47 = vshll.u32 %v9561_v39, 16 }
 0x1ea   :  { %v3276_v42 = vrot.slane %v3275_v0, 2 }
 0x1ec   :  { %v3277_v34 = vadd.f32 %v3276_v42, %v3275_v0 }
 0x1ee   :  { %v3278_v11 = vrot.slane %v3277_v34, 1 }
 0x1f0   :  { %v3279_v14 = vadd.f32 %v3278_v11, %v3277_v34 }
 0x1f2   :  { %v3280_v59 = vmul.f32 0.0078125, %v3279_v14 }
 0x1f4   :  { %v3282_v15 = vadd.f32 1e-05, %v3280_v59 }
 0x1f6   :  { %8072 = vrsqrt.f32 %v3282_v15 }
 0x203   :  { %v8073_v25 = vpop.eup %8072 }
 0x204   :  { %v3284_v21 = vmul.f32 %v8073_v25, %v3281_v36 }
 0x206   :  { %v3289_v22 = vrot.slane %v3284_v21, %v11102_v55 }
 0x208   :  { %v3291_v40 = vmul.f32 %v3289_v22, %v9386_v17  ;;  %v3292_v49 = vmul.f32 %v3289_v22, %v9389_v28  ;;  %v3293_v38 = vmul.f32 %v3289_v22, %v9392_v23  ;;  %v3294_v16 = vmul.f32 %v3289_v22, %v9395_v3 }
 0x209   :  { %v3295_v5 = vmul.f32 %v3289_v22, %v9398_v6  ;;  %v3296_v62 = vmul.f32 %v3289_v22, %v9426_v35  ;;  %v3297_v45 = vmul.f32 %v3289_v22, %v9401_v18  ;;  %v3298_v2 = vmul.f32 %v3289_v22, %v9404_v30 }
 0x20a   :  { %v3299_v17 = vmul.f32 %v3289_v22, %v9407_v44  ;;  %v3300_v28 = vmul.f32 %v3289_v22, %v9442_v54  ;;  %v3301_v23 = vmul.f32 %v3289_v22, %v9409_v24  ;;  %v3302_v3 = vmul.f32 %v3289_v22, %v9411_v58 }
 0x20b   :  { %v3303_v6 = vmul.f32 %v3289_v22, %v9413_v46  ;;  %v3304_v35 = vmul.f32 %v3289_v22, %v9456_v19  ;;  %v3305_v18 = vmul.f32 %v3289_v22, %v9415_v53  ;;  %v3306_v30 = vmul.f32 %v3289_v22, %v9417_v43 }
 0x20c   :  { %v9531_v7 = vadd.f32 %v7121_v26, %v3291_v40  ;;  %v9533_v9 = vadd.f32 %v7121_v26, %v3292_v49  ;;  %v9535_v4 = vadd.f32 %v7121_v26, %v3293_v38  ;;  %v9537_v44 = vadd.f32 %v7121_v26, %v3294_v16 }
 0x20d   :  { %v9539_v54 = vadd.f32 %v7121_v26, %v3295_v5  ;;  %v3816_v24 = vrot.slane %v3814_v12, 4  ;;  %v3819_v58 = vrot.slane %v3817_v50, 5  ;;  %v9541_v41 = vadd.f32 %v7121_v26, %v3296_v62 }
 0x20e   :  { %v9543_v46 = vadd.f32 %v7121_v26, %v3297_v45  ;;  %v3928_v19 = vrot.slane %v3926_v63, 4  ;;  %v3931_v53 = vrot.slane %v3929_v29, 5  ;;  %v3330_v43 = vmin.f32 %v9531_v7, 0.0 }
 0x20f   :  { %v3331_v48 = vmin.f32 %v9533_v9, 0.0  ;;  %v3332_v57 = vmin.f32 %v9535_v4, 0.0  ;;  %v9548_v52 = vadd.f32 %v7121_v26, %v3298_v2  ;;  %v3333_v61 = vmin.f32 %v9537_v44, 0.0 }
 0x210   :  { %v9553_v56 = vadd.f32 %v7121_v26, %v3299_v17  ;;  %v3334_v60 = vmin.f32 %v9539_v54, 0.0  ;;  %v3820_v32 = vor.u32 %v3819_v58, %v3816_v24  ;;  %v9557_v1 = vadd.f32 %v7121_v26, %v3300_v28 }
 0x211   :  { %v3335_v13 = vmin.f32 %v9541_v41, 0.0  ;;  %v3336_v27 = vmin.f32 %v9543_v46, 0.0  ;;  %v3932_v37 = vor.u32 %v3931_v53, %v3928_v19  ;;  %v9563_v0 = vadd.f32 %v7121_v26, %v3301_v23  ;;  %v4372_v23 = vld [vmem:[#allocation2] sm:$0xe] }
 0x212   :  { %v3346_v42 = vmul.f32 1.442695, %v3330_v43  ;;  %v3348_v34 = vmul.f32 1.442695, %v3331_v48  ;;  %v3350_v11 = vmul.f32 1.442695, %v3332_v57  ;;  %v9565_v14 = vadd.f32 %v7121_v26, %v3302_v3 }
 0x213   :  { %v3337_v59 = vmin.f32 %v9548_v52, 0.0  ;;  %v3352_v15 = vmul.f32 1.442695, %v3333_v61  ;;  %v9569_v36 = vadd.f32 %v7121_v26, %v3303_v6  ;;  %v3338_v25 = vmin.f32 %v9553_v56, 0.0 }
 0x214   :  { %8074 = vpow2.f32 %v3346_v42  ;;  %v3354_v21 = vmul.f32 1.442695, %v3334_v60  ;;  %v9572_v22 = vadd.f32 %v7121_v26, %v3304_v35  ;;  %v3339_v12 = vmin.f32 %v9557_v1, 0.0  ;;  %v4380_v35 = vld [vmem:[#allocation2 + $0x50] sm:$0xe] }
 0x215   :  { %8076 = vpow2.f32 %v3348_v34  ;;  %v3356_v50 = vmul.f32 1.442695, %v3335_v13  ;;  %v9575_v63 = vadd.f32 %v7121_v26, %v3305_v18  ;;  %v3340_v29 = vmin.f32 %v9563_v0, 0.0 }
 0x216   :  { %8078 = vpow2.f32 %v3350_v11  ;;  %v3358_v40 = vmul.f32 1.442695, %v3336_v27  ;;  %v9578_v49 = vadd.f32 %v7121_v26, %v3306_v30  ;;  %v3341_v38 = vmin.f32 %v9565_v14, 0.0  ;;  %v3726_v27 = vld [vmem:[#allocation2 + $0x44] sm:$0x1] }
 0x217   :  { %8080 = vpow2.f32 %v3352_v15  ;;  %v3360_v16 = vmul.f32 1.442695, %v3337_v59  ;;  %v3342_v5 = vmin.f32 %v9569_v36, 0.0  ;;  %v3362_v62 = vmul.f32 1.442695, %v3338_v25 }
 0x218   :  { %8082 = vpow2.f32 %v3354_v21  ;;  %v9582_v45 = vrot.slane %v3823_v10, 5  ;;  %v3343_v2 = vmin.f32 %v9572_v22, 0.0  ;;  %v3364_v17 = vmul.f32 1.442695, %v3339_v12  ;;  %v3696_v10 = vld [vmem:[#allocation2 + $0x1c] sm:$0x1] }
 0x219   :  { %8084 = vpow2.f32 %v3356_v50  ;;  %v9585_v28 = vrot.slane %v3820_v32, 4  ;;  %v3344_v26 = vmin.f32 %v9575_v63, 0.0  ;;  %v3366_v3 = vmul.f32 1.442695, %v3340_v29 }
 0x21a   :  { %8086 = vpow2.f32 %v3358_v40  ;;  %v9588_v6 = vrot.slane %v3932_v37, 4  ;;  %v3345_v18 = vmin.f32 %v9578_v49, 0.0  ;;  %v3368_v30 = vmul.f32 1.442695, %v3341_v38 }
 0x21b   :  { %8088 = vpow2.f32 %v3360_v16  ;;  %v9591_v24 = vrot.slane %v3935_v47, 5  ;;  %v3370_v58 = vmul.f32 1.442695, %v3342_v5  ;;  %v7194_v19 = vrot.slane %v4372_v23, 9 }
 0x21c   :  { %8090 = vpow2.f32 %v3362_v62  ;;  %v4422_v53 = vrot.slane %v9551_v51, 5  ;;  %v3372_v43 = vmul.f32 1.442695, %v3343_v2  ;;  %v7202_v48 = vrot.slane %v4380_v35, 9  ;;  %v3693_v51 = vld [vmem:[#allocation2 + $0x18] sm:$0xf] }
 0x21d   :  { %11174 = vst [vmem:[#allocation23_spill] sm:$0xff] %v9591_v24  ;;  %8092 = vpow2.f32 %v3364_v17  ;;  %v4454_v57 = vrot.slane %v9561_v39, 5  ;;  %v3374_v61 = vmul.f32 1.442695, %v3344_v26  ;;  %v3376_v60 = vmul.f32 1.442695, %v3345_v18 }
 0x21e   :  { %8094 = vpow2.f32 %v3366_v3  ;;  %vm3410_vm13 = vcmp.gt.f32.partialorder %v9531_v7, 0.0  ;;  %v9606_v39 = vsel %vm8551_vm12, %v7194_v19, %v4422_v53  ;;  %vm3411_vm14 = vcmp.gt.f32.partialorder %v9533_v9, 0.0  ;;  %v3729_v24 = vld [vmem:[#allocation2 + $0x58] sm:$0xf] }
 0x21f   :  { %8096 = vpow2.f32 %v3368_v30  ;;  %11177 = vst [vmem:[#allocation18_spill] sm:$0xff] %v9606_v39  ;;  %v9610_v37 = vsel %vm8551_vm12, %v7202_v48, %v4454_v57  ;;  %vm3412_vm15 = vcmp.gt.f32.partialorder %v9535_v4, 0.0  ;;  %vm3413_vm0 = vcmp.gt.f32.partialorder %v9537_v44, 0.0  ;;  %v3723_v39 = vld [vmem:[#allocation2 + $0x40] sm:$0xf] }
 0x220   :  { %8098 = vpow2.f32 %v3370_v58  ;;  %11178 = vst [vmem:[#allocation32_spill] sm:$0xff] %v9610_v37  ;;  %vm3414_vm1 = vcmp.gt.f32.partialorder %v9539_v54, 0.0  ;;  %vm3415_vm2 = vcmp.gt.f32.partialorder %v9541_v41, 0.0  ;;  %vm3416_vm3 = vcmp.gt.f32.partialorder %v9543_v46, 0.0  ;;  %v3720_v37 = vld [vmem:[#allocation2 + $0x3c] sm:$0x1] }
 0x221   :  { %v8075_v13 = vpop.eup %8074  ;;  %8100 = vpow2.f32 %v3372_v43  ;;  %vm3417_vm4 = vcmp.gt.f32.partialorder %v9548_v52, 0.0  ;;  %vm3418_vm5 = vcmp.gt.f32.partialorder %v9553_v56, 0.0  ;;  %vm3419_vm10 = vcmp.gt.f32.partialorder %v9557_v1, 0.0 }
 0x222   :  { %v8077_v42 = vpop.eup %8076  ;;  %8102 = vpow2.f32 %v3374_v61  ;;  %v7122_v34 = vadd.f32 -1.0, %v8075_v13  ;;  %vm3420_vm11 = vcmp.gt.f32.partialorder %v9563_v0, 0.0  ;;  %vm3421_vm8 = vcmp.gt.f32.partialorder %v9565_v14, 0.0 }
 0x223   :  { %v8079_v11 = vpop.eup %8078  ;;  %8104 = vpow2.f32 %v3376_v60  ;;  %v7123_v59 = vadd.f32 -1.0, %v8077_v42 }
 0x224   :  { %v8081_v15 = vpop.eup %8080  ;;  %v7124_v47 = vadd.f32 -1.0, %v8079_v11  ;;  %v3394_v25 = vmul.f32 1.6732632, %v7122_v34 }
 0x225   :  { %v8083_v21 = vpop.eup %8082  ;;  %v7125_v12 = vadd.f32 -1.0, %v8081_v15  ;;  %v3395_v50 = vmul.f32 1.6732632, %v7123_v59 }
 0x226   :  { %v8085_v29 = vpop.eup %8084  ;;  %v7126_v40 = vadd.f32 -1.0, %v8083_v21  ;;  %v3396_v38 = vmul.f32 1.6732632, %v7124_v47  ;;  %v3426_v16 = vsel %vm3410_vm13, %v9531_v7, %v3394_v25  ;;  %vm3422_vm13 = vcmp.gt.f32.partialorder %v9569_v36, 0.0 }
 0x227   :  { %v8087_v5 = vpop.eup %8086  ;;  %v7127_v62 = vadd.f32 -1.0, %v8085_v29  ;;  %v3397_v2 = vmul.f32 1.6732632, %v7125_v12  ;;  %v3427_v17 = vsel %vm3411_vm14, %v9533_v9, %v3395_v50  ;;  %v3442_v23 = vmul.f32 1.050701, %v3426_v16 }
 0x228   :  { %v8089_v26 = vpop.eup %8088  ;;  %v7128_v3 = vadd.f32 -1.0, %v8087_v5  ;;  %v3398_v35 = vmul.f32 1.6732632, %v7126_v40  ;;  %v3428_v18 = vsel %vm3412_vm15, %v9535_v4, %v3396_v38  ;;  %v3443_v7 = vmul.f32 1.050701, %v3427_v17 }
 0x229   :  { %v8091_v30 = vpop.eup %8090  ;;  %v7129_v58 = vadd.f32 -1.0, %v8089_v26  ;;  %v3399_v19 = vmul.f32 1.6732632, %v7127_v62  ;;  %v3429_v9 = vsel %vm3413_vm0, %v9537_v44, %v3397_v2  ;;  %v3444_v53 = vmul.f32 1.050701, %v3428_v18 }
 0x22a   :  { %v8093_v43 = vpop.eup %8092  ;;  %v7130_v48 = vadd.f32 -1.0, %v8091_v30  ;;  %v3400_v57 = vmul.f32 1.6732632, %v7128_v3  ;;  %vm3423_vm14 = vcmp.gt.f32.partialorder %v9572_v22, 0.0  ;;  %v3430_v4 = vsel %vm3414_vm1, %v9539_v54, %v3398_v35 }
 0x22b   :  { %v3445_v61 = vmul.f32 1.050701, %v3429_v9  ;;  %v8095_v60 = vpop.eup %8094  ;;  %v7131_v13 = vadd.f32 -1.0, %v8093_v43  ;;  %v3401_v42 = vmul.f32 1.6732632, %v7129_v58  ;;  %vm3424_vm15 = vcmp.gt.f32.partialorder %v9575_v63, 0.0 }
 0x22c   :  { %v3431_v44 = vsel %vm3415_vm2, %v9541_v41, %v3399_v19  ;;  %v3446_v34 = vmul.f32 1.050701, %v3430_v4  ;;  %v8097_v11 = vpop.eup %8096  ;;  %v7132_v59 = vadd.f32 -1.0, %v8095_v60  ;;  %v3402_v15 = vmul.f32 1.6732632, %v7130_v48 }
 0x22d   :  { %vm3425_vm0 = vcmp.gt.f32.partialorder %v9578_v49, 0.0  ;;  %v3432_v54 = vsel %vm3416_vm3, %v9543_v46, %v3400_v57  ;;  %v3447_v47 = vmul.f32 1.050701, %v3431_v44  ;;  %v8099_v25 = vpop.eup %8098  ;;  %v7133_v21 = vadd.f32 -1.0, %v8097_v11 }
 0x22e   :  { %v3403_v12 = vmul.f32 1.6732632, %v7131_v13  ;;  %v3433_v50 = vsel %vm3417_vm4, %v9548_v52, %v3401_v42  ;;  %v3448_v29 = vmul.f32 1.050701, %v3432_v54  ;;  %v8101_v41 = vpop.eup %8100  ;;  %v7134_v40 = vadd.f32 -1.0, %v8099_v25 }
 0x22f   :  { %v3404_v38 = vmul.f32 1.6732632, %v7132_v59  ;;  %v3434_v16 = vsel %vm3418_vm5, %v9553_v56, %v3402_v15  ;;  %v3449_v5 = vmul.f32 1.050701, %v3433_v50  ;;  %v8103_v62 = vpop.eup %8102  ;;  %v7135_v2 = vadd.f32 -1.0, %v8101_v41 }
 0x230   :  { %v3405_v46 = vmul.f32 1.6732632, %v7133_v21  ;;  %v3435_v17 = vsel %vm3419_vm10, %v9557_v1, %v3403_v12  ;;  %v3450_v26 = vmul.f32 1.050701, %v3434_v16  ;;  %v8105_v3 = vpop.eup %8104  ;;  %v7136_v35 = vadd.f32 -1.0, %v8103_v62 }
 0x231   :  { %v3406_v52 = vmul.f32 1.6732632, %v7134_v40  ;;  %v3436_v18 = vsel %vm3420_vm11, %v9563_v0, %v3404_v38  ;;  %v3451_v30 = vmul.f32 1.050701, %v3435_v17  ;;  %v7137_v58 = vadd.f32 -1.0, %v8105_v3 }
 0x232   :  { %v3407_v19 = vmul.f32 1.6732632, %v7135_v2  ;;  %v3437_v56 = vsel %vm3421_vm8, %v9565_v14, %v3405_v46  ;;  %v3452_v9 = vmul.f32 1.050701, %v3436_v18  ;;  %v3408_v43 = vmul.f32 1.6732632, %v7136_v35 }
 0x233   :  { %v3438_v1 = vsel %vm3422_vm13, %v9569_v36, %v3406_v52  ;;  %v3453_v48 = vmul.f32 1.050701, %v3437_v56  ;;  %v7429_v57 = vpack.c.bf16 %v3442_v23, %v3442_v23  ;;  %v3409_v4 = vmul.f32 1.6732632, %v7137_v58  ;;  %v3717_v56 = vld [vmem:[#allocation2 + $0x38] sm:$0xf] }
 0x234   :  { %v3439_v0 = vsel %vm3423_vm14, %v9572_v22, %v3407_v19  ;;  %v3454_v60 = vmul.f32 1.050701, %v3438_v1  ;;  %v7430_v13 = vpack.c.bf16 %v3443_v7, %v3443_v7  ;;  %v3440_v42 = vsel %vm3424_vm15, %v9575_v63, %v3408_v43  ;;  %v3714_v43 = vld [vmem:[#allocation2 + $0x34] sm:$0x1] }
 0x235   :  { %v3455_v14 = vmul.f32 1.050701, %v3439_v0  ;;  %v7431_v44 = vpack.c.bf16 %v3444_v53, %v3444_v53  ;;  %v7432_v11 = vpack.c.bf16 %v3445_v61, %v3445_v61  ;;  %v3441_v36 = vsel %vm3425_vm0, %v9578_v49, %v3409_v4 }
 0x236   :  { %v3456_v59 = vmul.f32 1.050701, %v3440_v42  ;;  %v7433_v23 = vpack.c.bf16 %v3446_v34, %v3446_v34  ;;  %v7434_v15 = vpack.c.bf16 %v3447_v47, %v3447_v47  ;;  %v3457_v54 = vmul.f32 1.050701, %v3441_v36 }
 0x237   :  { %v7435_v25 = vpack.c.bf16 %v3448_v29, %v3448_v29  ;;  %v7436_v21 = vpack.c.bf16 %v3449_v5, %v3449_v5  ;;  %v7437_v22 = vpack.c.bf16 %v3450_v26, %v3450_v26  ;;  %v9675_v12 = vpack.c.bf16 %v3451_v30, %v3451_v30 }
 0x238   :  { %v9677_v7 = vpack.c.bf16 %v3452_v9, %v3452_v9  ;;  %v9679_v50 = vpack.c.bf16 %v3453_v48, %v3453_v48  ;;  %v9681_v63 = vpack.c.bf16 %v3454_v60, %v3454_v60  ;;  %v9683_v53 = vpack.c.bf16 %v3455_v14, %v3455_v14 }
 0x239   :  { %v9685_v61 = vpack.c.bf16 %v3456_v59, %v3456_v59  ;;  %v9687_v49 = vpack.c.bf16 %v3457_v54, %v3457_v54  ;;  %v3523_v34 = vshrl.u32 %v7429_v57, 16  ;;  %v3526_v47 = vshll.u32 %v7429_v57, 16 }
 0x23a   :  { %v3531_v41 = vshrl.u32 %v7430_v13, 16  ;;  %v3534_v29 = vshll.u32 %v7430_v13, 16  ;;  %v3539_v40 = vshrl.u32 %v7431_v44, 16  ;;  %v3542_v16 = vshll.u32 %v7431_v44, 16 }
 0x23b   :  { %v9689_v38 = vrot.slane %v3523_v34, 7  ;;  %v3547_v5 = vshrl.u32 %v7432_v11, 16  ;;  %v3550_v62 = vshll.u32 %v7432_v11, 16  ;;  %v3555_v17 = vshrl.u32 %v7433_v23, 16 }
 0x23c   :  { %v9691_v2 = vrot.slane %v3531_v41, 7  ;;  %v9693_v46 = vrot.slane %v3539_v40, 7  ;;  %v3558_v26 = vshll.u32 %v7433_v23, 16  ;;  %v3563_v18 = vshrl.u32 %v7434_v15, 16 }
 0x23d   :  { %v9696_v3 = vor.u32 %v3526_v47, %v9689_v38  ;;  %v3529_v35 = vrot.slane %v9689_v38, 4  ;;  %v9699_v52 = vrot.slane %v3547_v5, 7  ;;  %v9713_v1 = vrot.slane %v3555_v17, 7 }
 0x23e   :  { %v9702_v30 = vor.u32 %v3534_v29, %v9691_v2  ;;  %v9706_v19 = vor.u32 %v3542_v16, %v9693_v46  ;;  %v9715_v48 = vrot.slane %v3563_v18, 7  ;;  %v3566_v57 = vshll.u32 %v7434_v15, 16  ;;  %v3705_v29 = vld [vmem:[#allocation2 + $0x28] sm:$0xf] }
 0x23f   :  { %v9710_v9 = vor.u32 %v3550_v62, %v9699_v52  ;;  %v3571_v4 = vshrl.u32 %v7435_v25, 16  ;;  %v3574_v0 = vshll.u32 %v7435_v25, 16  ;;  %v3579_v60 = vshrl.u32 %v7436_v21, 16 }
 0x240   :  { %v9718_v13 = vor.u32 %v3558_v26, %v9713_v1  ;;  %v3582_v44 = vshll.u32 %v7436_v21, 16  ;;  %v9723_v11 = vor.u32 %v3566_v57, %v9715_v48  ;;  %v3587_v23 = vshrl.u32 %v7437_v22, 16  ;;  %v3702_v57 = vld [vmem:[#allocation2 + $0x24] sm:$0x1]  ;;  %v3711_v21 = vld [vmem:[#allocation2 + $0x30] sm:$0xf] }
 0x241   :  { %v9725_v36 = vrot.slane %v3571_v4, 7  ;;  %v9727_v59 = vrot.slane %v3579_v60, 7  ;;  %v3590_v15 = vshll.u32 %v7437_v22, 16  ;;  %v3595_v54 = vshrl.u32 %v9675_v12, 16  ;;  %v3684_v60 = vld [vmem:[#allocation2 + $0xc] sm:$0x1] }
 0x242   :  { %v3598_v25 = vshll.u32 %v9675_v12, 16  ;;  %v3603_v34 = vshrl.u32 %v9677_v7, 16  ;;  %v9740_v40 = vrot.slane %v3587_v23, 7  ;;  %v3606_v12 = vshll.u32 %v9677_v7, 16  ;;  %v3687_v7 = vld [vmem:[#allocation2 + $0x10] sm:$0xf] }
 0x243   :  { %v9733_v47 = vor.u32 %v3574_v0, %v9725_v36  ;;  %v9737_v41 = vor.u32 %v3582_v44, %v9727_v59  ;;  %v9742_v16 = vrot.slane %v3595_v54, 7  ;;  %v3611_v5 = vshrl.u32 %v9679_v50, 16  ;;  %v3699_v0 = vld [vmem:[#allocation2 + $0x20] sm:$0xf] }
 0x244   :  { %v9744_v22 = vrot.slane %v3603_v34, 7  ;;  %v3614_v62 = vshll.u32 %v9679_v50, 16  ;;  %v3619_v17 = vshrl.u32 %v9681_v63, 16  ;;  %v3622_v26 = vshll.u32 %v9681_v63, 16 }
 0x245   :  { %v9752_v18 = vor.u32 %v3590_v15, %v9740_v40  ;;  %v9756_v4 = vor.u32 %v3598_v25, %v9742_v16  ;;  %v9763_v23 = vrot.slane %v3611_v5, 7  ;;  %v3690_v15 = vld [vmem:[#allocation2 + $0x14] sm:$0x1]  ;;  %v3627_v54 = vshrl.u32 %v9683_v53, 16  ;;  %v8140_v5 = vld [vmem:[#allocation2 + $0x8] sm:$0xf] }
 0x246   :  { %v9760_v44 = vor.u32 %v3606_v12, %v9744_v22  ;;  %v9765_v63 = vrot.slane %v3619_v17, 7  ;;  %v3630_v34 = vshll.u32 %v9683_v53, 16  ;;  %v3635_v25 = vshrl.u32 %v9685_v61, 16  ;;  %v3708_v53 = vld [vmem:[#allocation2 + $0x2c] sm:$0x1] }
 0x247   :  { %v3638_v55 = vshll.u32 %v9685_v61, 16  ;;  %v9772_v12 = vor.u32 %v3614_v62, %v9763_v23  ;;  %v9779_v14 = vrot.slane %v3627_v54, 7  ;;  %v3643_v42 = vshrl.u32 %v9687_v49, 16 }
 0x248   :  { %v9776_v17 = vor.u32 %v3622_v26, %v9765_v63  ;;  %v9781_v61 = vrot.slane %v3635_v25, 7  ;;  %v3646_v62 = vshll.u32 %v9687_v49, 16  ;;  %v3682_v58 = vsel %vm8305_vm6, %v9696_v3, %v8140_v5 }
 0x249   :  { %v3685_v31 = vsel %vm8311_vm7, %v3529_v35, %v3684_v60  ;;  %v3688_v54 = vsel %vm8305_vm6, %v9702_v30, %v3687_v7  ;;  %v11181_v25 = vrot.slane %v9691_v2, 4  ;;  %v9800_v3 = vor.u32 %v3630_v34, %v9779_v14  ;;  %v3732_v30 = vld [vmem:[#allocation2 + $0x5c] sm:$0x1]  ;;  %v3735_v7 = vld [vmem:[#allocation2 + $0x60] sm:$0xf] }
 0x24a   :  { %v3633_v38 = vrot.slane %v9779_v14, 4  ;;  %v9804_v35 = vor.u32 %v3638_v55, %v9781_v61  ;;  %v3641_v60 = vrot.slane %v9781_v61, 4  ;;  %3683 = vst [vmem:[#allocation2 + $0x8] sm:$0xf] %v3682_v58  ;;  %3686 = vst [vmem:[#allocation2 + $0xc] sm:$0x1] %v3685_v31  ;;  %v3700_v5 = vsel %vm8305_vm6, %v9710_v9, %v3699_v0 }
 0x24b   :  { %v3691_v49 = vsel %vm8311_vm7, %v11181_v25, %v3690_v15  ;;  %3689 = vst [vmem:[#allocation2 + $0x10] sm:$0xf] %v3688_v54  ;;  %v9807_v2 = vrot.slane %v3643_v42, 7  ;;  %v3694_v15 = vsel %vm8305_vm6, %v9706_v19, %v3693_v51  ;;  %v11182_v34 = vrot.slane %v9693_v46, 4  ;;  %v3738_v25 = vld [vmem:[#allocation2 + $0x64] sm:$0x1] }
 0x24c   :  { %3692 = vst [vmem:[#allocation2 + $0x14] sm:$0x1] %v3691_v49  ;;  %v3741_v58 = vld [vmem:[#allocation2 + $0x68] sm:$0xf]  ;;  %v11183_v31 = vrot.slane %v9699_v52, 4  ;;  %v3706_v51 = vsel %vm8305_vm6, %v9718_v13, %v3705_v29  ;;  %v11184_v46 = vrot.slane %v9713_v1, 4  ;;  %v3712_v19 = vsel %vm8305_vm6, %v9723_v11, %v3711_v21 }
 0x24d   :  { %v3697_v55 = vsel %vm8311_vm7, %v11182_v34, %v3696_v10  ;;  %v3744_v9 = vld [vmem:[#allocation2 + $0x6c] sm:$0x1]  ;;  %v3747_v0 = vld [vmem:[#allocation2 + $0x70] sm:$0xf]  ;;  %v3750_v54 = vld [vmem:[#allocation2 + $0x74] sm:$0x1]  ;;  %v3648_v52 = vor.u32 %v3646_v62, %v9807_v2  ;;  %v3718_v29 = vsel %vm8305_vm6, %v9733_v47, %v3717_v56  ;;  %v3730_v47 = vsel %vm8305_vm6, %v9752_v18, %v3729_v24 }
 0x24e   :  { %v3703_v42 = vsel %vm8311_vm7, %v11183_v31, %v3702_v57  ;;  %v3709_v10 = vsel %vm8311_vm7, %v11184_v46, %v3708_v53  ;;  %3695 = vst [vmem:[#allocation2 + $0x18] sm:$0xf] %v3694_v15  ;;  %3698 = vst [vmem:[#allocation2 + $0x1c] sm:$0x1] %v3697_v55  ;;  %v3649_v57 = vrot.slane %v9807_v2, 4  ;;  %v11185_v13 = vrot.slane %v9715_v48, 4 }
 0x24f   :  { %3701 = vst [vmem:[#allocation2 + $0x20] sm:$0xf] %v3700_v5  ;;  %v3753_v11 = vld [vmem:[#allocation2 + $0x78] sm:$0xf]  ;;  %v3756_v21 = vld [vmem:[#allocation2 + $0x7c] sm:$0x1]  ;;  %v3724_v48 = vsel %vm8305_vm6, %v9737_v41, %v3723_v39  ;;  %v3736_v39 = vsel %vm8305_vm6, %v9756_v4, %v3735_v7  ;;  %v3742_v24 = vsel %vm8305_vm6, %v9760_v44, %v3741_v58 }
 0x250   :  { %v3715_v1 = vsel %vm8311_vm7, %v11185_v13, %v3714_v43  ;;  %3704 = vst [vmem:[#allocation2 + $0x24] sm:$0x1] %v3703_v42  ;;  %3707 = vst [vmem:[#allocation2 + $0x28] sm:$0xf] %v3706_v51  ;;  %v11186_v53 = vrot.slane %v9725_v36, 4  ;;  %v11187_v43 = vrot.slane %v9727_v59, 4  ;;  %v3754_v7 = vsel %vm8305_vm6, %v9776_v17, %v3753_v11 }
 0x251   :  { %3710 = vst [vmem:[#allocation2 + $0x2c] sm:$0x1] %v3709_v10  ;;  %3713 = vst [vmem:[#allocation2 + $0x30] sm:$0xf] %v3712_v19  ;;  %v3759_v49 = vld [vmem:[#allocation2 + $0x80] sm:$0xf] }
 0x252   :  { %v3721_v62 = vsel %vm8311_vm7, %v11186_v53, %v3720_v37  ;;  %v3727_v56 = vsel %vm8311_vm7, %v11187_v43, %v3726_v27  ;;  %v3762_v2 = vld [vmem:[#allocation2 + $0x84] sm:$0x1]  ;;  %v3765_v15 = vld [vmem:[#allocation2 + $0x88] sm:$0xf]  ;;  %3716 = vst [vmem:[#allocation2 + $0x34] sm:$0x1] %v3715_v1 }
 0x253   :  { %3719 = vst [vmem:[#allocation2 + $0x38] sm:$0xf] %v3718_v29  ;;  %v11188_v37 = vrot.slane %v9740_v40, 4  ;;  %v11189_v27 = vrot.slane %v9742_v16, 4  ;;  %v3768_v41 = vld [vmem:[#allocation2 + $0x8c] sm:$0x1]  ;;  %v3748_v16 = vsel %vm8305_vm6, %v9772_v12, %v3747_v0  ;;  %v3763_v12 = vsel %vm8311_vm7, %v3633_v38, %v3762_v2 }
 0x254   :  { %v3771_v18 = vld [vmem:[#allocation2 + $0x90] sm:$0xf]  ;;  %v3774_v34 = vld [vmem:[#allocation2 + $0x94] sm:$0x1]  ;;  %3722 = vst [vmem:[#allocation2 + $0x3c] sm:$0x1] %v3721_v62  ;;  %v3766_v17 = vsel %vm8305_vm6, %v9804_v35, %v3765_v15  ;;  %v3769_v14 = vsel %vm8311_vm7, %v3641_v60, %v3768_v41 }
 0x255   :  { %v3733_v36 = vsel %vm8311_vm7, %v11188_v37, %v3732_v30  ;;  %v3739_v59 = vsel %vm8311_vm7, %v11189_v27, %v3738_v25  ;;  %3725 = vst [vmem:[#allocation2 + $0x40] sm:$0xf] %v3724_v48  ;;  %3728 = vst [vmem:[#allocation2 + $0x44] sm:$0x1] %v3727_v56  ;;  %v11190_v40 = vrot.slane %v9744_v22, 4  ;;  %v11191_v30 = vrot.slane %v9763_v23, 4 }
 0x256   :  { %3731 = vst [vmem:[#allocation2 + $0x58] sm:$0xf] %v3730_v47  ;;  %3734 = vst [vmem:[#allocation2 + $0x5c] sm:$0x1] %v3733_v36  ;;  %v11192_v22 = vrot.slane %v9765_v63, 4  ;;  %v3760_v23 = vsel %vm8305_vm6, %v9800_v3, %v3759_v49  ;;  %v3772_v3 = vsel %vm8305_vm6, %v3648_v52, %v3771_v18  ;;  %v3775_v38 = vsel %vm8311_vm7, %v3649_v57, %v3774_v34  ;;  %v8046_v19 = vld [vmem:[%s11089_s4 + $0x30] sm:$0xff]  }
 0x257   :  { %v3745_v4 = vsel %vm8311_vm7, %v11190_v40, %v3744_v9  ;;  %v3751_v44 = vsel %vm8311_vm7, %v11191_v30, %v3750_v54  ;;  %3737 = vst [vmem:[#allocation2 + $0x60] sm:$0xf] %v3736_v39  ;;  %3740 = vst [vmem:[#allocation2 + $0x64] sm:$0x1] %v3739_v59  ;;  %v3778_v63 = vld [vmem:[#allocation2 + $0x8] sm:$0xf] }
 0x258   :  { %3743 = vst [vmem:[#allocation2 + $0x68] sm:$0xf] %v3742_v24  ;;  %v3757_v55 = vsel %vm8311_vm7, %v11192_v22, %v3756_v21  ;;  %3746 = vst [vmem:[#allocation2 + $0x6c] sm:$0x1] %v3745_v4  ;;  %v3779_v5 = vld [vmem:[#allocation2 + $0x10] sm:$0xf]  ;;  %v7176_v58 = vcombine.low %v9502_v20, %v3778_v63 }
 0x259   :  { %3749 = vst [vmem:[#allocation2 + $0x70] sm:$0xf] %v3748_v16  ;;  %3752 = vst [vmem:[#allocation2 + $0x74] sm:$0x1] %v3751_v44  ;;  %v3828_v35 = vshrl.u32 %v3778_v63, 16  ;;  %v3831_v25 = vshll.u32 %v3778_v63, 16 }
 0x25a   :  { %3755 = vst [vmem:[#allocation2 + $0x78] sm:$0xf] %v3754_v7  ;;  %3758 = vst [vmem:[#allocation2 + $0x7c] sm:$0x1] %v3757_v55  ;;  %v3780_v31 = vld [vmem:[#allocation2 + $0x18] sm:$0xf] }
 0x25b   :  { %3764 = vst [vmem:[#allocation2 + $0x84] sm:$0x1] %v3763_v12  ;;  %3761 = vst [vmem:[#allocation2 + $0x80] sm:$0xf] %v3760_v23  ;;  %v3842_v61 = vshrl.u32 %v3779_v5, 16  ;;  %v3845_v42 = vshll.u32 %v3779_v5, 16  ;;  %v7177_v10 = vcombine.low %v3779_v5, %v3780_v31 }
 0x25c   :  { %3767 = vst [vmem:[#allocation2 + $0x88] sm:$0xf] %v3766_v17  ;;  %3770 = vst [vmem:[#allocation2 + $0x8c] sm:$0x1] %v3769_v14  ;;  %v9907_v51 = vld [vmem:[#allocation2 + $0xc] sm:$0x1]  ;;  %v11196_v17 = vsel %vm8339_vm9, %v9585_v28, %v9582_v45 }
 0x25d   :  { %3776 = vst [vmem:[#allocation2 + $0x94] sm:$0x1] %v3775_v38  ;;  %3773 = vst [vmem:[#allocation2 + $0x90] sm:$0xf] %v3772_v3  ;;  %v3830_v60 = vrot.slane %v3828_v35, 4  ;;  %v3856_v26 = vshrl.u32 %v3780_v31, 16 }
 0x25e   :  { %v3859_v46 = vshll.u32 %v3780_v31, 16  ;;  %v3781_v50 = vld [vmem:[#allocation2 + $0x20] sm:$0xf]  ;;  %v3833_v9 = vrot.slane %v3831_v25, 5  ;;  %vm11193_vm6 = vcmask 261120   ;;  %v3844_v0 = vrot.slane %v3842_v61, 4 }
 0x25f   :  { %7829 = vmatprep.mubr.msk.bf16.mxu0 %vm11193_vm6, %v7176_v58  ;;  %v3847_v54 = vrot.slane %v3845_v42, 5  ;;  %v3782_v20 = vld [vmem:[#allocation2 + $0x28] sm:$0xf]  ;;  %v3870_v52 = vshrl.u32 %v3781_v50, 16  ;;  %v3858_v57 = vrot.slane %v3856_v26, 4  ;;  %vm11194_vm7 = vmmov %vm11193_vm6  ;;  %v3873_v1 = vshll.u32 %v3781_v50, 16 }
 0x260   :  { %v3861_v13 = vrot.slane %v3859_v46, 5  ;;  %7830 = vmatmul.mubr.msk.bf16.vlgmr.msra.gmra.mxu0 %vm11194_vm7, %v7177_v10  ;;  %v3884_v29 = vshrl.u32 %v3782_v20, 16  ;;  %v3783_v11 = vld [vmem:[#allocation2 + $0x30] sm:$0xf]  ;;  %v3887_v53 = vshll.u32 %v3782_v20, 16  ;;  %v7178_v62 = vcombine.low %v3781_v50, %v3782_v20  ;;  %v9918_v56 = vld [vmem:[%s11089_s4 + $0x58] sm:$0xff]   ;;  %vm11195_vm8 = vmmov %vm11193_vm6 }
 0x261   :  { %v3872_v21 = vrot.slane %v3870_v52, 4  ;;  %v3834_v48 = vor.u32 %v3833_v9, %v3830_v60  ;;  %v3784_v43 = vld [vmem:[#allocation2 + $0x38] sm:$0xf]  ;;  %7866 = vmatpush3.bf16.msra.mxu0 %v9493_v33  ;;  %v3875_v47 = vrot.slane %v3873_v1, 5  ;;  %v3837_v2 = vshll.u32 %v9907_v51, 16  ;;  %vm11197_vm1 = vmmov %vm11193_vm6  ;;  %v8043_v52 = vld [vmem:[%s11089_s4 + $0x20] sm:$0xff]  }
 0x262   :  { %v3886_v49 = vrot.slane %v3884_v29, 4  ;;  %v3898_v15 = vshrl.u32 %v3783_v11, 16  ;;  %v9921_v37 = vld [vmem:[#allocation2 + $0x14] sm:$0x1]  ;;  %7867 = vmatprep.subr.bf16.mxu0 %v8046_v19  ;;  %v3889_v36 = vrot.slane %v3887_v53, 5  ;;  %7833 = vmatprep.mubr.msk.bf16.mxu0 %vm11195_vm8, %v7178_v62  ;;  %v3901_v27 = vshll.u32 %v3783_v11, 16  ;;  %vm11198_vm2 = vmmov %vm11197_vm1 }
 0x263   :  { %v3835_v39 = vrot.slane %v3834_v48, 4  ;;  %v3912_v59 = vshrl.u32 %v3784_v43, 16  ;;  %v9924_v33 = vld [vmem:[#allocation2 + $0x1c] sm:$0x1]  ;;  %v3839_v24 = vrot.slane %v3837_v2, 5  ;;  %v3915_v18 = vshll.u32 %v3784_v43, 16  ;;  %vm11199_vm3 = vmmov %vm11197_vm1 }
 0x264   :  { %v9926_v41 = vrot.slane %v3898_v15, 4  ;;  %v7179_v34 = vcombine.low %v3783_v11, %v3784_v43  ;;  %v3786_v40 = vld [vmem:[#allocation2 + $0x58] sm:$0xf]  ;;  %v9928_v4 = vrot.slane %v3901_v27, 5  ;;  %v3848_v30 = vor.u32 %v3847_v54, %v3844_v0  ;;  %v9938_v12 = vld [vmem:[#allocation2 + $0x24] sm:$0x1]  ;;  %vm11200_vm4 = vmmov %vm11197_vm1 }
 0x265   :  { %v9930_v16 = vrot.slane %v3912_v59, 4  ;;  %v3851_v44 = vshll.u32 %v9921_v37, 16  ;;  %7868 = vmatpush3.bf16.msra.mxu0 %v8046_v19  ;;  %v3840_v7 = vsel %vm8339_vm9, %v3835_v39, %v3839_v24  ;;  %v9935_v22 = vrot.slane %v3915_v18, 5  ;;  %v9946_v38 = vld [vmem:[#allocation2 + $0x2c] sm:$0x1]  ;;  %vm11201_vm5 = vmmov %vm11197_vm1 }
 0x266   :  { %v3862_v55 = vor.u32 %v3861_v13, %v3858_v57  ;;  %v3865_v23 = vshll.u32 %v9924_v33, 16  ;;  %7905 = vmatprep.subr.bf16.mxu0 %v9918_v56  ;;  %v7158_v63 = vcombine.low %v11196_v17, %v3840_v7  ;;  %v3849_v5 = vrot.slane %v3848_v30, 4  ;;  %v3787_v61 = vld [vmem:[#allocation2 + $0x60] sm:$0xf]  ;;  %v3788_v26 = vld [vmem:[#allocation2 + $0x68] sm:$0xf]  ;;  %vm11202_vm10 = vmmov %vm11197_vm1 }
 0x267   :  { %v3853_v14 = vrot.slane %v3851_v44, 5  ;;  %v3940_v3 = vshrl.u32 %v3786_v40, 16  ;;  %v3943_v58 = vshll.u32 %v3786_v40, 16  ;;  %v7180_v31 = vcombine.low %v9504_v8, %v3786_v40  ;;  %v9962_v20 = vld [vmem:[#allocation2 + $0x34] sm:$0x1]  ;;  %v9988_v27 = vld [vmem:[%s11089_s4 + $0x48] sm:$0xff]   ;;  %vm11203_vm11 = vmmov %vm11197_vm1 }
 0x268   :  { %7834 = vmatmul.mubr.msk.bf16.gmra.mxu0 %vm11197_vm1, %v7179_v34  ;;  %v3863_v35 = vrot.slane %v3862_v55, 4  ;;  %v3867_v25 = vrot.slane %v3865_v23, 5  ;;  %7809 = vmatprep.mubr.msk.bf16.mxu1 %vm11198_vm2, %v7158_v63  ;;  %v3876_v28 = vor.u32 %v3875_v47, %v3872_v21  ;;  %v3879_v60 = vshll.u32 %v9938_v12, 16  ;;  %v9967_v11 = vld [vmem:[#allocation2 + $0x3c] sm:$0x1]  ;;  %v8141_v47 = vld [vmem:[%s11089_s4 + $0x28] sm:$0xff]   ;;  %vm11204_vm13 = vmmov %vm11197_vm1 }
 0x269   :  { %v3854_v42 = vsel %vm8339_vm9, %v3849_v5, %v3853_v14  ;;  %v9953_v45 = vrot.slane %v3940_v3, 4  ;;  %v9958_v10 = vrot.slane %v3943_v58, 5  ;;  %7837 = vmatprep.mubr.msk.bf16.mxu0 %vm11199_vm3, %v7180_v31  ;;  %v3890_v8 = vor.u32 %v3889_v36, %v3886_v49  ;;  %v3789_v43 = vld [vmem:[#allocation2 + $0x70] sm:$0xf]  ;;  %v3790_v39 = vld [vmem:[#allocation2 + $0x78] sm:$0xf]  ;;  %vm11205_vm14 = vmmov %vm11197_vm1 }
 0x26a   :  { %v3868_v46 = vsel %vm8339_vm9, %v3863_v35, %v3867_v25  ;;  %v3893_v50 = vshll.u32 %v9946_v38, 16  ;;  %v3877_v9 = vrot.slane %v3876_v28, 4  ;;  %v3881_v0 = vrot.slane %v3879_v60, 5  ;;  %v9993_v40 = vld [vmem:[#allocation2 + $0x5c] sm:$0x1]  ;;  %vm11208_vm15 = vmmov %vm11197_vm1 }
 0x26b   :  { %v7159_v19 = vcombine.low %v3854_v42, %v3868_v46  ;;  %v3954_v54 = vshrl.u32 %v3787_v61, 16  ;;  %v3891_v57 = vrot.slane %v3890_v8, 4  ;;  %v3957_v1 = vshll.u32 %v3787_v61, 16  ;;  %v3791_v7 = vld [vmem:[#allocation2 + $0x80] sm:$0xf]  ;;  %vm11209_vm0 = vmmov %vm11197_vm1 }
 0x26c   :  { %v3895_v13 = vrot.slane %v3893_v50, 5  ;;  %v3968_v29 = vshrl.u32 %v3788_v26, 16  ;;  %v3882_v21 = vsel %vm8339_vm9, %v3877_v9, %v3881_v0  ;;  %v3971_v62 = vshll.u32 %v3788_v26, 16  ;;  %v3792_v5 = vld [vmem:[#allocation2 + $0x88] sm:$0xf]  ;;  %vm11210_vm6 = vmmov %vm11209_vm0 }
 0x26d   :  { %7810 = vmatmul.mubr.msk.bf16.vlgmr.msra.gmra.mxu1 %vm11200_vm4, %v7159_v19  ;;  %v9972_v53 = vrot.slane %v3954_v54, 4  ;;  %v7181_v48 = vcombine.low %v3787_v61, %v3788_v26  ;;  %v9979_v2 = vrot.slane %v3957_v1, 5  ;;  %v3904_v36 = vor.u32 %v9928_v4, %v9926_v41  ;;  %v9998_v35 = vld [vmem:[#allocation2 + $0x64] sm:$0x1]  ;;  %v10009_v46 = vld [vmem:[#allocation2 + $0x6c] sm:$0x1]  ;;  %vm11211_vm7 = vmmov %vm11209_vm0 }
 0x26e   :  { %7846 = vmatpush3.bf16.msra.mxu1 %v8141_v47  ;;  %v3896_v49 = vsel %vm8339_vm9, %v3891_v57, %v3895_v13  ;;  %v9981_v15 = vrot.slane %v3968_v29, 4  ;;  %v3973_v24 = vrot.slane %v3971_v62, 5  ;;  %v3907_v18 = vshll.u32 %v9962_v20, 16  ;;  %v8045_v0 = vld [vmem:[#allocation2 + $0x8] ss:$8 sps:$4 sm:$0xff]   ;;  %vm11212_vm8 = vmmov %vm11209_vm0 }
 0x26f   :  { %v7160_v59 = vcombine.low %v3882_v21, %v3896_v49  ;;  %v3918_v34 = vor.u32 %v9935_v22, %v9930_v16  ;;  %7847 = vmatprep.subr.bf16.mxu1 %v8043_v52  ;;  %v3905_v30 = vrot.slane %v3904_v36, 4  ;;  %v3921_v41 = vshll.u32 %v9967_v11, 16  ;;  %v10011_v54 = vld [vmem:[#allocation2 + $0x74] sm:$0x1]  ;;  %v10022_v47 = vld [vmem:[#allocation2 + $0x7c] sm:$0x1]  ;;  %vm11214_vm1 = vmmov %vm11209_vm0 }
 0x270   :  { %7838 = vmatmul.mubr.msk.bf16.gmra.mxu0 %vm11201_vm5, %v7181_v48  ;;  %v3982_v4 = vshrl.u32 %v3789_v43, 16  ;;  %v3985_v44 = vshll.u32 %v3789_v43, 16  ;;  %v3909_v55 = vrot.slane %v3907_v18, 5  ;;  %v3996_v17 = vshrl.u32 %v3790_v39, 16  ;;  %v10024_v36 = vld [vmem:[#allocation2 + $0x84] sm:$0x1]  ;;  %vm11216_vm2 = vmmov %vm11209_vm0 }
 0x271   :  { %7813 = vmatprep.mubr.msk.bf16.mxu1 %vm11202_vm10, %v7160_v59  ;;  %v3919_v23 = vrot.slane %v3918_v34, 4  ;;  %v3999_v63 = vshll.u32 %v3790_v39, 16  ;;  %v3923_v14 = vrot.slane %v3921_v41, 5  ;;  %v7182_v3 = vcombine.low %v3789_v43, %v3790_v39  ;;  %vm11217_vm3 = vmmov %vm11209_vm0 }
 0x272   :  { %v3984_v16 = vrot.slane %v3982_v4, 4  ;;  %v3987_v22 = vrot.slane %v3985_v44, 5  ;;  %7848 = vmatpush3.bf16.msra.mxu1 %v8043_v52  ;;  %v3910_v25 = vsel %vm8339_vm9, %v3905_v30, %v3909_v55  ;;  %v3998_v58 = vrot.slane %v3996_v17, 4  ;;  %vm11218_vm4 = vmmov %vm11209_vm0 }
 0x273   :  { %v4001_v31 = vrot.slane %v3999_v63, 5  ;;  %v3946_v61 = vor.u32 %v9958_v10, %v9953_v45  ;;  %7885 = vmatprep.subr.bf16.mxu1 %v9988_v27  ;;  %v3924_v42 = vsel %vm8339_vm9, %v3919_v23, %v3923_v14  ;;  %7841 = vmatprep.mubr.msk.bf16.mxu0 %vm11203_vm11, %v7182_v3  ;;  %v3949_v28 = vshll.u32 %v9993_v40, 16  ;;  %v4373_v23 = vld [vmem:[#allocation2 + $0x8] sm:$0xe]  ;;  %v4375_v3 = vld [vmem:[#allocation2 + $0x18] sm:$0xe]  ;;  %vm11220_vm5 = vmmov %vm11209_vm0 }
 0x274   :  { %v4010_v60 = vshrl.u32 %v3791_v7, 16  ;;  %v4013_v26 = vshll.u32 %v3791_v7, 16  ;;  %v7161_v8 = vcombine.low %v3910_v25, %v3924_v42  ;;  %v4024_v19 = vshrl.u32 %v3792_v5, 16  ;;  %v8057_v25 = vld [vmem:[%s11089_s4 + $0x50] sm:$0xff]   ;;  %vm11221_vm10 = vmmov %vm11209_vm0 }
 0x275   :  { %v3947_v50 = vrot.slane %v3946_v61, 4  ;;  %v4027_v9 = vshll.u32 %v3792_v5, 16  ;;  %v3951_v45 = vrot.slane %v3949_v28, 5  ;;  %v7183_v57 = vcombine.low %v3791_v7, %v3792_v5  ;;  %v8047_v5 = vld [vmem:[#allocation2 + $0x18] ss:$8 sps:$4 sm:$0xff]   ;;  %vm11222_vm11 = vmmov %vm11209_vm0 }
 0x276   :  { %v4012_v10 = vrot.slane %v4010_v60, 4  ;;  %v4015_v52 = vrot.slane %v4013_v26, 5  ;;  %7814 = vmatmul.mubr.msk.bf16.gmra.mxu1 %vm11204_vm13, %v7161_v8  ;;  %v4026_v13 = vrot.slane %v4024_v19, 4  ;;  %v3960_v29 = vor.u32 %v9979_v2, %v9972_v53  ;;  %v11206_v53 = vld [vmem:[#allocation23_spill] sm:$0xff]  ;;  %v4376_v19 = vld [vmem:[#allocation2 + $0x20] sm:$0xe]  ;;  %vm11223_vm13 = vmmov %vm11209_vm0 }
 0x277   :  { %v4029_v1 = vrot.slane %v4027_v9, 5  ;;  %v3963_v21 = vshll.u32 %v9998_v35, 16  ;;  %v3952_v62 = vsel %vm8339_vm9, %v3947_v50, %v3951_v45  ;;  %v3974_v48 = vor.u32 %v3973_v24, %v9981_v15  ;;  %v10033_v15 = vld [vmem:[#allocation2 + $0x8c] sm:$0x1]  ;;  %v8048_v28 = vld [vmem:[#allocation2 + $0x28] ss:$8 sps:$4 sm:$0xff]  }
 0x278   :  { %7842 = vmatmul.mubr.msk.bf16.gmra.mxu0 %vm11205_vm14, %v7183_v57  ;;  %v3977_v43 = vshll.u32 %v10009_v46, 16  ;;  %v3988_v49 = vor.u32 %v3987_v22, %v3984_v16  ;;  %v11207_v2 = vsel %vm8339_vm9, %v9588_v6, %v11206_v53  ;;  %v3961_v59 = vrot.slane %v3960_v29, 4  ;;  %v4374_v22 = vld [vmem:[#allocation2 + $0x10] sm:$0xe]  ;;  %v4379_v53 = vld [vmem:[#allocation2 + $0x38] sm:$0xe]  ;;  %vm11224_vm14 = vmmov %vm11209_vm0 }
 0x279   :  { %v7162_v39 = vcombine.low %v11207_v2, %v3952_v62  ;;  %v3965_v18 = vrot.slane %v3963_v21, 5  ;;  %7869 = vmatprep.mubr.msk.bf16.mxu0 %vm11208_vm15, %v8045_v0  ;;  %v3991_v34 = vshll.u32 %v10011_v54, 16  ;;  %v3975_v24 = vrot.slane %v3974_v48, 4  ;;  %v4378_v21 = vld [vmem:[#allocation2 + $0x30] sm:$0xe]  ;;  %v10059_v62 = vld [vmem:[%s11089_s4 + $0x78] sm:$0xff]   ;;  %vm11225_vm15 = vmmov %vm11209_vm0 }
 0x27a   :  { %v3979_v30 = vrot.slane %v3977_v43, 5  ;;  %v3989_v41 = vrot.slane %v3988_v49, 4  ;;  %v4002_v4 = vor.u32 %v4001_v31, %v3998_v58  ;;  %v4005_v6 = vshll.u32 %v10022_v47, 16 }
 0x27b   :  { %7817 = vmatprep.mubr.msk.bf16.mxu1 %vm11209_vm0, %v7162_v39  ;;  %v3966_v44 = vsel %vm8339_vm9, %v3961_v59, %v3965_v18  ;;  %v3993_v7 = vrot.slane %v3991_v34, 5  ;;  %v4016_v55 = vor.u32 %v4015_v52, %v4012_v10  ;;  %v4019_v14 = vshll.u32 %v10024_v36, 16  ;;  %v4377_v52 = vld [vmem:[#allocation2 + $0x28] sm:$0xe]  ;;  %v11215_v39 = vld [vmem:[#allocation18_spill] sm:$0xff] }
 0x27c   :  { %v3980_v17 = vsel %vm8339_vm9, %v3975_v24, %v3979_v30  ;;  %v4003_v63 = vrot.slane %v4002_v4, 4  ;;  %v4030_v16 = vor.u32 %v4029_v1, %v4026_v13  ;;  %v4007_v61 = vrot.slane %v4005_v6, 5  ;;  %v4381_v24 = vld [vmem:[#allocation2 + $0x58] sm:$0xe] }
 0x27d   :  { %v7163_v58 = vcombine.low %v3966_v44, %v3980_v17  ;;  %v3994_v31 = vsel %vm8339_vm9, %v3989_v41, %v3993_v7  ;;  %v4017_v42 = vrot.slane %v4016_v55, 4  ;;  %v4021_v60 = vrot.slane %v4019_v14, 5  ;;  %v8049_v4 = vld [vmem:[#allocation2 + $0x38] ss:$8 sps:$4 sm:$0xff]  }
 0x27e   :  { %v4031_v26 = vrot.slane %v4030_v16, 4  ;;  %v4033_v8 = vshll.u32 %v10033_v15, 16  ;;  %v7195_v50 = vrot.slane %v4373_v23, 9  ;;  %v4008_v9 = vsel %vm8339_vm9, %v4003_v63, %v4007_v61  ;;  %v4382_v55 = vld [vmem:[#allocation2 + $0x60] sm:$0xe] }
 0x27f   :  { %7818 = vmatmul.mubr.msk.bf16.gmra.mxu1 %vm11210_vm6, %v7163_v58  ;;  %v4426_v0 = vrot.slane %v9907_v51, 5  ;;  %v7196_v45 = vrot.slane %v4374_v22, 9  ;;  %v4430_v10 = vrot.slane %v9921_v37, 5  ;;  %v7164_v57 = vcombine.low %v3994_v31, %v4008_v9  ;;  %v4383_v23 = vld [vmem:[#allocation2 + $0x68] sm:$0xe]  ;;  %vm11226_vm6 = vmmov %vm11209_vm0 }
 0x280   :  { %7870 = vmatmul.mubr.msk.bf16.vlgmr.msra.gmra.mxu0 %vm11211_vm7, %v8047_v5  ;;  %v4022_v13 = vsel %vm8339_vm9, %v4017_v42, %v4021_v60  ;;  %v4035_v1 = vrot.slane %v4033_v8, 5  ;;  %v7197_v29 = vrot.slane %v4375_v3, 9  ;;  %v4434_v43 = vrot.slane %v9924_v33, 5  ;;  %v8051_v17 = vld [vmem:[#allocation2 + $0x58] ss:$8 sps:$4 sm:$0xff]   ;;  %vm11227_vm7 = vmmov %vm11209_vm0 }
 0x281   :  { %7873 = vmatprep.mubr.msk.bf16.mxu0 %vm11212_vm8, %v8048_v28  ;;  %v4427_v37 = vsel %vm8551_vm12, %v7195_v50, %v4426_v0  ;;  %v10066_v48 = vsel %vm8551_vm12, %v7196_v45, %v4430_v10  ;;  %v7198_v49 = vrot.slane %v4376_v19, 9  ;;  %7906 = vmatpush3.bf16.msra.mxu0 %v9918_v56  ;;  %v4438_v18 = vrot.slane %v9938_v12, 5  ;;  %v10093_v16 = vld [vmem:[#allocation2 + $0xc] sm:$0x1]  ;;  %v10102_v31 = vld [vmem:[#allocation2 + $0x14] sm:$0x1]  ;;  %vm11228_vm8 = vmmov %vm11209_vm0 }
 0x282   :  { %7821 = vmatprep.mubr.msk.bf16.mxu1 %vm11214_vm1, %v7164_v57  ;;  %v4036_v2 = vsel %vm8339_vm9, %v4031_v26, %v4035_v1  ;;  %v7214_v59 = vcombine.low %v11215_v39, %v4427_v37  ;;  %v7199_v34 = vrot.slane %v4377_v52, 9  ;;  %7907 = vmatprep.subr.bf16.mxu0 %v8057_v25  ;;  %v10077_v33 = vsel %vm8551_vm12, %v7197_v29, %v4434_v43  ;;  %v5306_v61 = vld [vmem:[#allocation2 + $0x8] sm:$0xe]  ;;  %v5307_v28 = vld [vmem:[#allocation2 + $0x10] sm:$0xe]  ;;  %vm11229_vm1 = vmmov %vm11209_vm0 }
 0x283   :  { %v7165_v30 = vcombine.low %v4022_v13, %v4036_v2  ;;  %v4442_v41 = vrot.slane %v9946_v38, 5  ;;  %v7200_v56 = vrot.slane %v4378_v21, 9  ;;  %v7215_v44 = vcombine.low %v10066_v48, %v10077_v33  ;;  %v11219_v26 = vld [vmem:[#allocation32_spill] sm:$0xff]  ;;  %v4385_v9 = vld [vmem:[#allocation2 + $0x78] sm:$0xe] }
 0x284   :  { %v10084_v7 = vsel %vm8551_vm12, %v7198_v49, %v4438_v18  ;;  %v4446_v12 = vrot.slane %v9962_v20, 5  ;;  %v7201_v6 = vrot.slane %v4379_v53, 9  ;;  %v4450_v38 = vrot.slane %v9967_v11, 5  ;;  %v10125_v0 = vld [vmem:[#allocation2 + $0x1c] sm:$0x1] }
 0x285   :  { %v10089_v63 = vsel %vm8551_vm12, %v7199_v34, %v4442_v41  ;;  %v7203_v5 = vrot.slane %v4381_v24, 9  ;;  %v4458_v14 = vrot.slane %v9993_v40, 5  ;;  %7908 = vmatpush3.bf16.msra.mxu0 %v8057_v25  ;;  %v7204_v3 = vrot.slane %v4382_v55, 9  ;;  %v10134_v57 = vld [vmem:[#allocation2 + $0x24] sm:$0x1] }
 0x286   :  { %v7216_v22 = vcombine.low %v10084_v7, %v10089_v63  ;;  %v10099_v20 = vsel %vm8551_vm12, %v7200_v56, %v4446_v12  ;;  %v4462_v58 = vrot.slane %v9998_v35, 5  ;;  %7945 = vmatprep.subr.bf16.mxu0 %v10059_v62  ;;  %v10108_v11 = vsel %vm8551_vm12, %v7201_v6, %v4450_v38  ;;  %v4384_v35 = vld [vmem:[#allocation2 + $0x70] sm:$0xe]  ;;  %v5308_v37 = vld [vmem:[#allocation2 + $0x18] sm:$0xe] }
 0x287   :  { %7822 = vmatmul.mubr.msk.bf16.gmra.mxu1 %vm11216_vm2, %v7165_v30  ;;  %v10112_v40 = vsel %vm8551_vm12, %v7203_v5, %v4458_v14  ;;  %v7205_v25 = vrot.slane %v4383_v23, 9  ;;  %v4466_v42 = vrot.slane %v10009_v46, 5  ;;  %v7217_v60 = vcombine.low %v10099_v20, %v10108_v11  ;;  %v5309_v2 = vld [vmem:[#allocation2 + $0x20] sm:$0xe]  ;;  %v4387_v30 = vld [vmem:[#allocation2 + $0x88] sm:$0xe]  ;;  %vm11230_vm2 = vmmov %vm11209_vm0 }
 0x288   :  { %7849 = vmatprep.mubr.msk.bf16.mxu1 %vm11217_vm3, %v7214_v59  ;;  %7874 = vmatmul.mubr.msk.bf16.gmra.mxu0 %vm11218_vm4, %v8049_v4  ;;  %v7218_v8 = vcombine.low %v11219_v26, %v10112_v40  ;;  %v10123_v50 = vsel %vm8551_vm12, %v7204_v3, %v4462_v58  ;;  %v7276_v19 = vrot.slane %v5306_v61, 9  ;;  %v5356_v45 = vrot.slane %v10093_v16, 5  ;;  %v4386_v59 = vld [vmem:[#allocation2 + $0x80] sm:$0xe]  ;;  %v10155_v41 = vld [vmem:[#allocation2 + $0x2c] sm:$0x1]  ;;  %vm11231_vm3 = vmmov %vm11209_vm0 }
 0x289   :  { %7877 = vmatprep.mubr.msk.bf16.mxu0 %vm11220_vm5, %v8051_v17  ;;  %v10130_v46 = vsel %vm8551_vm12, %v7205_v25, %v4466_v42  ;;  %v7277_v10 = vrot.slane %v5307_v28, 9  ;;  %v5360_v52 = vrot.slane %v10102_v31, 5  ;;  %v7206_v1 = vrot.slane %v4384_v35, 9  ;;  %v8052_v56 = vld [vmem:[#allocation2 + $0x68] ss:$8 sps:$4 sm:$0xff]   ;;  %vm11232_vm4 = vmmov %vm11209_vm0 }
 0x28a   :  { %v7219_v13 = vcombine.low %v10123_v50, %v10130_v46  ;;  %v4470_v29 = vrot.slane %v10011_v54, 5  ;;  %v7207_v21 = vrot.slane %v4385_v9, 9  ;;  %v10141_v43 = vsel %vm8551_vm12, %v7276_v19, %v5356_v45  ;;  %v10166_v23 = vld [vmem:[#allocation2 + $0x34] sm:$0x1]  ;;  %v5310_v3 = vld [vmem:[#allocation2 + $0x28] sm:$0xe]  ;;  %vm11233_vm5 = vmmov %vm11209_vm0 }
 0x28b   :  { %v10145_v49 = vsel %vm8551_vm12, %v7277_v10, %v5360_v52  ;;  %v4474_v53 = vrot.slane %v10022_v47, 5  ;;  %v7278_v39 = vrot.slane %v5308_v37, 9  ;;  %v5364_v34 = vrot.slane %v10125_v0, 5  ;;  %v8055_v47 = vld [vmem:[%s11089_s4 + $0x40] sm:$0xff]   ;;  %v5311_v58 = vld [vmem:[#allocation2 + $0x30] sm:$0xe] }
 0x28c   :  { %v7296_v18 = vcombine.low %v10141_v43, %v10145_v49  ;;  %v10152_v54 = vsel %vm8551_vm12, %v7206_v1, %v4470_v29  ;;  %v7279_v24 = vrot.slane %v5309_v2, 9  ;;  %v5368_v12 = vrot.slane %v10134_v57, 5  ;;  %v4872_v28 = vld [vmem:[#allocation2 + $0x8] sm:$0xf]  ;;  %v8053_v48 = vld [vmem:[#allocation2 + $0x78] ss:$8 sps:$4 sm:$0xff]  }
 0x28d   :  { %v10162_v4 = vsel %vm8551_vm12, %v7207_v21, %v4474_v53  ;;  %v7208_v6 = vrot.slane %v4386_v59, 9  ;;  %v4478_v55 = vrot.slane %v10024_v36, 5  ;;  %v10172_v38 = vsel %vm8551_vm12, %v7278_v39, %v5364_v34  ;;  %v10191_v35 = vld [vmem:[%s11089_s4 + $0x68] sm:$0xff]   ;;  %v10205_v45 = vld [vmem:[#allocation2 + $0x3c] sm:$0x1] }
 0x28e   :  { %v7220_v17 = vcombine.low %v10152_v54, %v10162_v4  ;;  %v7209_v5 = vrot.slane %v4387_v30, 9  ;;  %v4482_v14 = vrot.slane %v10033_v15, 5  ;;  %v10181_v36 = vsel %vm8551_vm12, %v7279_v24, %v5368_v12  ;;  %v4874_v15 = vld [vmem:[#allocation2 + $0x10] sm:$0xf]  ;;  %v10214_v10 = vld [vmem:[#allocation2 + $0x44] sm:$0x1] }
 0x28f   :  { %7850 = vmatmul.mubr.msk.bf16.vlgmr.msra.gmra.mxu1 %vm11221_vm10, %v7215_v44  ;;  %v10185_v61 = vsel %vm8551_vm12, %v7208_v6, %v4478_v55  ;;  %v7280_v25 = vrot.slane %v5310_v3, 9  ;;  %v5372_v42 = vrot.slane %v10155_v41, 5  ;;  %v7297_v33 = vcombine.low %v10172_v38, %v10181_v36  ;;  %v5312_v52 = vld [vmem:[#allocation2 + $0x38] sm:$0xe]  ;;  %v5313_v53 = vld [vmem:[#allocation2 + $0x40] sm:$0xe]  ;;  %vm11234_vm10 = vmmov %vm11209_vm0 }
 0x290   :  { %7886 = vmatpush3.bf16.msra.mxu1 %v9988_v27  ;;  %7853 = vmatprep.mubr.msk.bf16.mxu1 %vm11222_vm11, %v7216_v22  ;;  %v10202_v44 = vsel %vm8551_vm12, %v7209_v5, %v4482_v14  ;;  %v7281_v19 = vrot.slane %v5311_v58, 9  ;;  %v5376_v9 = vrot.slane %v10166_v23, 5  ;;  %v4905_v63 = vshrl.u32 %v4872_v28, 16  ;;  %v4876_v24 = vld [vmem:[#allocation2 + $0x18] sm:$0xf]  ;;  %vm11235_vm11 = vmmov %vm11209_vm0 }
 0x291   :  { %7878 = vmatmul.mubr.msk.bf16.gmra.mxu0 %vm11223_vm13, %v8052_v56  ;;  %7887 = vmatprep.subr.bf16.mxu1 %v8055_v47  ;;  %v7221_v27 = vcombine.low %v10185_v61, %v10202_v44  ;;  %v10212_v7 = vsel %vm8551_vm12, %v7280_v25, %v5372_v42  ;;  %v4908_v22 = vshll.u32 %v4872_v28, 16  ;;  %v4914_v29 = vshll.u32 %v10093_v16, 16  ;;  %v4878_v55 = vld [vmem:[#allocation2 + $0x20] sm:$0xf]  ;;  %v8054_v5 = vld [vmem:[#allocation2 + $0x88] ss:$8 sps:$4 sm:$0xff]   ;;  %vm11236_vm13 = vmmov %vm11209_vm0 }
 0x292   :  { %7881 = vmatprep.mubr.msk.bf16.mxu0 %vm11224_vm14, %v8053_v48  ;;  %v10219_v1 = vsel %vm8551_vm12, %v7281_v19, %v5376_v9  ;;  %v4919_v21 = vshrl.u32 %v4874_v15, 16  ;;  %v4922_v37 = vshll.u32 %v4874_v15, 16  ;;  %v4907_v39 = vrot.slane %v4905_v63, 4  ;;  %v10228_v15 = vld [vmem:[#allocation2 + $0x5c] sm:$0x1]  ;;  %vm11237_vm14 = vmmov %vm11209_vm0 }
 0x293   :  { %v7298_v2 = vcombine.low %v10212_v7, %v10219_v1  ;;  %v4910_v59 = vrot.slane %v4908_v22, 5  ;;  %v4928_v34 = vshll.u32 %v10102_v31, 16  ;;  %v4916_v30 = vrot.slane %v4914_v29, 5  ;;  %v5314_v63 = vld [vmem:[#allocation2 + $0x58] sm:$0xe] }
 0x294   :  { %7888 = vmatpush3.bf16.msra.mxu1 %v8055_v47  ;;  %v4921_v56 = vrot.slane %v4919_v21, 4  ;;  %v4924_v12 = vrot.slane %v4922_v37, 5  ;;  %v7282_v6 = vrot.slane %v5312_v52, 9  ;;  %v5380_v3 = vrot.slane %v10205_v45, 5  ;;  %v5315_v52 = vld [vmem:[#allocation2 + $0x60] sm:$0xe] }
 0x295   :  { %v4911_v14 = vor.u32 %v4910_v59, %v4907_v39  ;;  %v4930_v16 = vrot.slane %v4928_v34, 5  ;;  %v7283_v58 = vrot.slane %v5313_v53, 9  ;;  %7925 = vmatprep.subr.bf16.mxu1 %v10191_v35  ;;  %v5384_v42 = vrot.slane %v10214_v10, 5  ;;  %v10252_v26 = vld [vmem:[#allocation2 + $0x64] sm:$0x1] }
 0x296   :  { %v4925_v25 = vor.u32 %v4924_v12, %v4921_v56  ;;  %v4933_v28 = vshrl.u32 %v4876_v24, 16  ;;  %v4936_v31 = vshll.u32 %v4876_v24, 16  ;;  %v10236_v48 = vsel %vm8551_vm12, %v7282_v6, %v5380_v3  ;;  %v4880_v59 = vld [vmem:[#allocation2 + $0x28] sm:$0xf]  ;;  %v4882_v12 = vld [vmem:[#allocation2 + $0x30] sm:$0xf] }
 0x297   :  { %7854 = vmatmul.mubr.msk.bf16.gmra.mxu1 %vm11225_vm15, %v7217_v60  ;;  %v4912_v47 = vrot.slane %v4911_v14, 4  ;;  %v4942_v19 = vshll.u32 %v10125_v0, 16  ;;  %v4947_v9 = vshrl.u32 %v4878_v55, 16  ;;  %v10245_v20 = vsel %vm8551_vm12, %v7283_v58, %v5384_v42  ;;  %v4886_v38 = vld [vmem:[#allocation2 + $0x40] sm:$0xf]  ;;  %vm11238_vm15 = vmmov %vm11209_vm0 }
 0x298   :  { %7857 = vmatprep.mubr.msk.bf16.mxu1 %vm11209_vm0, %v7218_v8  ;;  %v4926_v22 = vrot.slane %v4925_v25, 4  ;;  %v4935_v11 = vrot.slane %v4933_v28, 4  ;;  %v4938_v60 = vrot.slane %v4936_v31, 5  ;;  %v7299_v29 = vcombine.low %v10236_v48, %v10245_v20  ;;  %v5316_v28 = vld [vmem:[#allocation2 + $0x68] sm:$0xe] }
 0x299   :  { %7882 = vmatmul.mubr.msk.bf16.gmra.mxu0 %vm11226_vm6, %v8054_v5  ;;  %v4917_v0 = vsel %vm8339_vm9, %v4912_v47, %v4916_v30  ;;  %v4944_v21 = vrot.slane %v4942_v19, 5  ;;  %v4949_v40 = vrot.slane %v4947_v9, 4  ;;  %v4950_v53 = vshll.u32 %v4878_v55, 16  ;;  %v5317_v31 = vld [vmem:[#allocation2 + $0x70] sm:$0xe]  ;;  %vm11239_vm6 = vmmov %vm11209_vm0 }
 0x29a   :  { %7909 = vmatprep.mubr.msk.bf16.mxu0 %vm11227_vm7, %v7296_v18  ;;  %v4931_v8 = vsel %vm8339_vm9, %v4926_v22, %v4930_v16  ;;  %v4939_v37 = vor.u32 %v4938_v60, %v4935_v11  ;;  %v4956_v39 = vshll.u32 %v10134_v57, 16  ;;  %v7284_v24 = vrot.slane %v5314_v63, 9  ;;  %v10270_v16 = vld [vmem:[#allocation2 + $0x6c] sm:$0x1]  ;;  %v10284_v63 = vld [vmem:[#allocation2 + $0x74] sm:$0x1]  ;;  %vm11240_vm7 = vmmov %vm11209_vm0 }
 0x29b   :  { %v10261_v34 = vcombine.low %v4917_v0, %v4931_v8  ;;  %v5388_v30 = vrot.slane %v10228_v15, 5  ;;  %v7285_v56 = vrot.slane %v5315_v52, 9  ;;  %v4952_v5 = vrot.slane %v4950_v53, 5  ;;  %v8061_v22 = vld [vmem:[%s11089_s4 + $0x70] sm:$0xff]   ;;  %v4884_v60 = vld [vmem:[#allocation2 + $0x38] sm:$0xf] }
 0x29c   :  { %v4940_v6 = vrot.slane %v4939_v37, 4  ;;  %v4958_v43 = vrot.slane %v4956_v39, 5  ;;  %v5392_v49 = vrot.slane %v10252_v26, 5  ;;  %v4961_v55 = vshrl.u32 %v4880_v59, 16  ;;  %v10318_v39 = vld [vmem:[#allocation2 + $0x7c] sm:$0x1] }
 0x29d   :  { %v10267_v18 = vsel %vm8551_vm12, %v7284_v24, %v5388_v30  ;;  %v4964_v14 = vshll.u32 %v4880_v59, 16  ;;  %v4970_v57 = vshll.u32 %v10155_v41, 16  ;;  %v4953_v58 = vor.u32 %v4952_v5, %v4949_v40 }
 0x29e   :  { %v4945_v3 = vsel %vm8339_vm9, %v4940_v6, %v4944_v21  ;;  %v10276_v25 = vsel %vm8551_vm12, %v7285_v56, %v5392_v49  ;;  %v4975_v42 = vshrl.u32 %v4882_v12, 16  ;;  %v4963_v47 = vrot.slane %v4961_v55, 4  ;;  %v10324_v55 = vld [vmem:[#allocation2 + $0x84] sm:$0x1] }
 0x29f   :  { %7858 = vmatmul.mubr.msk.bf16.gmra.mxu1 %vm11228_vm8, %v7219_v13  ;;  %v7300_v41 = vcombine.low %v10267_v18, %v10276_v25  ;;  %v4966_v19 = vrot.slane %v4964_v14, 5  ;;  %v4972_v9 = vrot.slane %v4970_v57, 5  ;;  %v4954_v50 = vrot.slane %v4953_v58, 4  ;;  %v4888_v58 = vld [vmem:[#allocation2 + $0x58] sm:$0xf]  ;;  %v8059_v18 = vld [vmem:[%s11089_s4 + $0x60] sm:$0xff]   ;;  %vm11241_vm8 = vmmov %vm11209_vm0 }
 0x2a0   :  { %7861 = vmatprep.mubr.msk.bf16.mxu1 %vm11229_vm1, %v7220_v17  ;;  %v4977_v46 = vrot.slane %v4975_v42, 4  ;;  %v4978_v13 = vshll.u32 %v4882_v12, 16  ;;  %v4984_v11 = vshll.u32 %v10166_v23, 16  ;;  %v7286_v0 = vrot.slane %v5316_v28, 9  ;;  %v5319_v12 = vld [vmem:[#allocation2 + $0x80] sm:$0xe]  ;;  %vm11242_vm1 = vmmov %vm11209_vm0 }
 0x2a1   :  { %7910 = vmatmul.mubr.msk.bf16.vlgmr.msra.gmra.mxu0 %vm11230_vm2, %v7297_v33  ;;  %v4967_v52 = vor.u32 %v4966_v19, %v4963_v47  ;;  %v5396_v21 = vrot.slane %v10270_v16, 5  ;;  %v7287_v40 = vrot.slane %v5317_v31, 9  ;;  %v4959_v54 = vsel %vm8339_vm9, %v4954_v50, %v4958_v43  ;;  %v4890_v19 = vld [vmem:[#allocation2 + $0x60] sm:$0xf]  ;;  %vm11243_vm2 = vmmov %vm11209_vm0 }
 0x2a2   :  { %7913 = vmatprep.mubr.msk.bf16.mxu0 %vm11231_vm3, %v7298_v2  ;;  %v4980_v4 = vrot.slane %v4978_v13, 5  ;;  %v4986_v23 = vrot.slane %v4984_v11, 5  ;;  %v5400_v17 = vrot.slane %v10284_v63, 5  ;;  %7946 = vmatpush3.bf16.msra.mxu0 %v10059_v62  ;;  %v10307_v36 = vcombine.low %v4945_v3, %v4959_v54  ;;  %v5318_v62 = vld [vmem:[#allocation2 + $0x78] sm:$0xe]  ;;  %vm11244_vm3 = vmmov %vm11209_vm0 }
 0x2a3   :  { %v4968_v33 = vrot.slane %v4967_v52, 4  ;;  %v10311_v8 = vsel %vm8551_vm12, %v7286_v0, %v5396_v21  ;;  %v4989_v7 = vshrl.u32 %v4884_v60, 16  ;;  %7947 = vmatprep.subr.bf16.mxu0 %v8061_v22  ;;  %v4992_v37 = vshll.u32 %v4884_v60, 16  ;;  %v5320_v11 = vld [vmem:[#allocation2 + $0x88] sm:$0xe] }
 0x2a4   :  { %v4981_v1 = vor.u32 %v4980_v4, %v4977_v46  ;;  %v10315_v2 = vsel %vm8551_vm12, %v7287_v40, %v5400_v17  ;;  %v4998_v53 = vshll.u32 %v10205_v45, 16  ;;  %v5003_v56 = vshrl.u32 %v4886_v38, 16  ;;  %v10347_v46 = vld [vmem:[#allocation2 + $0x8c] sm:$0x1]  ;;  %v10357_v0 = vld [vmem:[#allocation2 + $0x94] sm:$0x1] }
 0x2a5   :  { %v4973_v59 = vsel %vm8339_vm9, %v4968_v33, %v4972_v9  ;;  %v7301_v24 = vcombine.low %v10311_v8, %v10315_v2  ;;  %v4991_v30 = vrot.slane %v4989_v7, 4  ;;  %v4994_v5 = vrot.slane %v4992_v37, 5  ;;  %v5321_v21 = vld [vmem:[#allocation2 + $0x90] sm:$0xe] }
 0x2a6   :  { %v4982_v6 = vrot.slane %v4981_v1, 4  ;;  %v5000_v43 = vrot.slane %v4998_v53, 5  ;;  %v5006_v49 = vshll.u32 %v4886_v38, 16  ;;  %7948 = vmatpush3.bf16.msra.mxu0 %v8061_v22  ;;  %v5005_v45 = vrot.slane %v5003_v56, 4 }
 0x2a7   :  { %7862 = vmatmul.mubr.msk.bf16.gmra.mxu1 %vm11232_vm4, %v7221_v27  ;;  %v5012_v14 = vshll.u32 %v10214_v10, 16  ;;  %v7288_v57 = vrot.slane %v5318_v62, 9  ;;  %v5404_v3 = vrot.slane %v10318_v39, 5  ;;  %v4995_v28 = vor.u32 %v4994_v5, %v4991_v30  ;;  %vm11245_vm4 = vmmov %vm11209_vm0 }
 0x2a8   :  { %7889 = vmatprep.mubr.msk.bf16.mxu1 %vm11233_vm5, %v10261_v34  ;;  %v4987_v42 = vsel %vm8339_vm9, %v4982_v6, %v4986_v23  ;;  %v5008_v31 = vrot.slane %v5006_v49, 5  ;;  %v7289_v47 = vrot.slane %v5319_v12, 9  ;;  %v5408_v10 = vrot.slane %v10324_v55, 5  ;;  %v4892_v23 = vld [vmem:[#allocation2 + $0x68] sm:$0xf]  ;;  %vm11246_vm5 = vmmov %vm11209_vm0 }
 0x2a9   :  { %7914 = vmatmul.mubr.msk.bf16.gmra.mxu0 %vm11234_vm10, %v7299_v29  ;;  %v7260_v61 = vcombine.low %v4973_v59, %v4987_v42  ;;  %v5014_v44 = vrot.slane %v5012_v14, 5  ;;  %v5405_v27 = vsel %vm8551_vm12, %v7288_v57, %v5404_v3  ;;  %v4996_v34 = vrot.slane %v4995_v28, 4  ;;  %v4894_v59 = vld [vmem:[#allocation2 + $0x70] sm:$0xf]  ;;  %v5808_v28 = vld [vmem:[#allocation2 + $0x18] sm:$0xf]  ;;  %vm11247_vm10 = vmmov %vm11209_vm0 }
 0x2aa   :  { %7917 = vmatprep.mubr.msk.bf16.mxu0 %vm11235_vm11, %v7300_v41  ;;  %v5009_v9 = vor.u32 %v5008_v31, %v5005_v45  ;;  %v5017_v22 = vshrl.u32 %v4888_v58, 16  ;;  %v5020_v50 = vshll.u32 %v4888_v58, 16  ;;  %v5409_v48 = vsel %vm8551_vm12, %v7289_v47, %v5408_v10  ;;  %v5806_v6 = vld [vmem:[#allocation2 + $0x10] sm:$0xf]  ;;  %v10380_v45 = vld [vmem:[#allocation2 + $0x14] sm:$0x1]  ;;  %vm11248_vm11 = vmmov %vm11209_vm0 }
 0x2ab   :  { %v5026_v20 = vshll.u32 %v10228_v15, 16  ;;  %v5031_v29 = vshrl.u32 %v4890_v19, 16  ;;  %v5034_v13 = vshll.u32 %v4890_v19, 16  ;;  %v5001_v25 = vsel %vm8339_vm9, %v4996_v34, %v5000_v43 }
 0x2ac   :  { %v5010_v41 = vrot.slane %v5009_v9, 4  ;;  %v7302_v60 = vcombine.low %v5405_v27, %v5409_v48  ;;  %v5019_v52 = vrot.slane %v5017_v22, 4  ;;  %v5022_v40 = vrot.slane %v5020_v50, 5  ;;  %v4896_v9 = vld [vmem:[#allocation2 + $0x78] sm:$0xf] }
 0x2ad   :  { %v5028_v54 = vrot.slane %v5026_v20, 5  ;;  %v5033_v4 = vrot.slane %v5031_v29, 4  ;;  %v5036_v15 = vrot.slane %v5034_v13, 5  ;;  %v5040_v38 = vshll.u32 %v10252_v26, 16 }
 0x2ae   :  { %v5015_v17 = vsel %vm8339_vm9, %v5010_v41, %v5014_v44  ;;  %v7290_v33 = vrot.slane %v5320_v11, 9  ;;  %v5412_v7 = vrot.slane %v10347_v46, 5  ;;  %v5023_v37 = vor.u32 %v5022_v40, %v5019_v52 }
 0x2af   :  { %7890 = vmatmul.mubr.msk.bf16.vlgmr.msra.gmra.mxu1 %vm11236_vm13, %v10307_v36  ;;  %v7261_v1 = vcombine.low %v5001_v25, %v5015_v17  ;;  %v5037_v53 = vor.u32 %v5036_v15, %v5033_v4  ;;  %v7291_v62 = vrot.slane %v5321_v21, 9  ;;  %v5042_v30 = vrot.slane %v5040_v38, 5  ;;  %v10373_v36 = vld [vmem:[%s11089_s4 + $0x88] sm:$0xff]   ;;  %vm11249_vm13 = vmmov %vm11209_vm0 }
 0x2b0   :  { %7926 = vmatpush3.bf16.msra.mxu1 %v10191_v35  ;;  %7893 = vmatprep.mubr.msk.bf16.mxu1 %vm11237_vm14, %v7260_v61  ;;  %v5413_v56 = vsel %vm8551_vm12, %v7290_v33, %v5412_v7  ;;  %v5416_v26 = vrot.slane %v10357_v0, 5  ;;  %v5045_v12 = vshrl.u32 %v4892_v23, 16  ;;  %v5024_v35 = vrot.slane %v5023_v37, 4  ;;  %v10389_v61 = vld [vmem:[#allocation2 + $0x1c] sm:$0x1]  ;;  %vm11250_vm14 = vmmov %vm11209_vm0 }
 0x2b1   :  { %7918 = vmatmul.mubr.msk.bf16.gmra.mxu0 %vm11238_vm15, %v7301_v24  ;;  %v5038_v5 = vrot.slane %v5037_v53, 4  ;;  %7927 = vmatprep.subr.bf16.mxu1 %v8059_v18  ;;  %v5048_v43 = vshll.u32 %v4892_v23, 16  ;;  %v5054_v49 = vshll.u32 %v10270_v16, 16  ;;  %v5059_v3 = vshrl.u32 %v4894_v59, 16  ;;  %v5810_v33 = vld [vmem:[#allocation2 + $0x20] sm:$0xf]  ;;  %vm11251_vm15 = vmmov %vm11209_vm0 }
 0x2b2   :  { %7921 = vmatprep.mubr.msk.bf16.mxu0 %vm11209_vm0, %v7302_v60  ;;  %v5417_v14 = vsel %vm8551_vm12, %v7291_v62, %v5416_v26  ;;  %v5047_v57 = vrot.slane %v5045_v12, 4  ;;  %v5062_v58 = vshll.u32 %v4894_v59, 16  ;;  %v5029_v8 = vsel %vm8339_vm9, %v5024_v35, %v5028_v54  ;;  %v4898_v54 = vld [vmem:[#allocation2 + $0x80] sm:$0xf]  ;;  %v10403_v62 = vld [vmem:[#allocation2 + $0x24] sm:$0x1] }
 0x2b3   :  { %v5043_v2 = vsel %vm8339_vm9, %v5038_v5, %v5042_v30  ;;  %v7303_v24 = vcombine.low %v5413_v56, %v5417_v14  ;;  %v5050_v42 = vrot.slane %v5048_v43, 5  ;;  %v5056_v31 = vrot.slane %v5054_v49, 5  ;;  %v5812_v5 = vld [vmem:[#allocation2 + $0x28] sm:$0xf] }
 0x2b4   :  { %v7262_v16 = vcombine.low %v5029_v8, %v5043_v2  ;;  %v5061_v47 = vrot.slane %v5059_v3, 4  ;;  %v5064_v19 = vrot.slane %v5062_v58, 5  ;;  %7928 = vmatpush3.bf16.msra.mxu1 %v8059_v18  ;;  %v5068_v27 = vshll.u32 %v10284_v63, 16  ;;  %v4900_v58 = vld [vmem:[#allocation2 + $0x88] sm:$0xf] }
 0x2b5   :  { %v5051_v44 = vor.u32 %v5050_v42, %v5047_v57  ;;  %v5839_v10 = vshrl.u32 %v5806_v6, 16  ;;  %v5842_v34 = vshll.u32 %v5806_v6, 16  ;;  %7965 = vmatprep.subr.bf16.mxu1 %v10373_v36  ;;  %v5848_v50 = vshll.u32 %v10380_v45, 16  ;;  %v10410_v57 = vld [vmem:[#allocation2 + $0x2c] sm:$0x1] }
 0x2b6   :  { %v5065_v22 = vor.u32 %v5064_v19, %v5061_v47  ;;  %v5853_v48 = vshrl.u32 %v5808_v28, 16  ;;  %v5856_v20 = vshll.u32 %v5808_v28, 16  ;;  %v5070_v13 = vrot.slane %v5068_v27, 5  ;;  %v4902_v47 = vld [vmem:[#allocation2 + $0x90] sm:$0xf] }
 0x2b7   :  { %7894 = vmatmul.mubr.msk.bf16.gmra.mxu1 %vm11239_vm6, %v7261_v1  ;;  %v5052_v29 = vrot.slane %v5051_v44, 4  ;;  %v5841_v11 = vrot.slane %v5839_v10, 4  ;;  %v5844_v18 = vrot.slane %v5842_v34, 5  ;;  %v5850_v63 = vrot.slane %v5848_v50, 5  ;;  %vm11252_vm6 = vmmov %vm11209_vm0 }
 0x2b8   :  { %7897 = vmatprep.mubr.msk.bf16.mxu1 %vm11240_vm7, %v7262_v16  ;;  %v5066_v25 = vrot.slane %v5065_v22, 4  ;;  %v5855_v41 = vrot.slane %v5853_v48, 4  ;;  %v5858_v60 = vrot.slane %v5856_v20, 5  ;;  %v5862_v40 = vshll.u32 %v10389_v61, 16  ;;  %vm11253_vm7 = vmmov %vm11209_vm0 }
 0x2b9   :  { %7922 = vmatmul.mubr.msk.bf16.gmra.mxu0 %vm11241_vm8, %v7303_v24  ;;  %v5057_v52 = vsel %vm8339_vm9, %v5052_v29, %v5056_v31  ;;  %v5845_v21 = vor.u32 %v5844_v18, %v5841_v11  ;;  %v5073_v4 = vshrl.u32 %v4896_v9, 16  ;;  %v5076_v17 = vshll.u32 %v4896_v9, 16  ;;  %vm11254_vm8 = vmmov %vm11209_vm0 }
 0x2ba   :  { %v5071_v15 = vsel %vm8339_vm9, %v5066_v25, %v5070_v13  ;;  %v5859_v23 = vor.u32 %v5858_v60, %v5855_v41  ;;  %v5082_v38 = vshll.u32 %v10318_v39, 16  ;;  %v5864_v37 = vrot.slane %v5862_v40, 5  ;;  %v5814_v41 = vld [vmem:[#allocation2 + $0x30] sm:$0xf] }
 0x2bb   :  { %v7263_v7 = vcombine.low %v5057_v52, %v5071_v15  ;;  %v5846_v1 = vrot.slane %v5845_v21, 4  ;;  %v5075_v53 = vrot.slane %v5073_v4, 4  ;;  %v5078_v30 = vrot.slane %v5076_v17, 5 }
 0x2bc   :  { %v5860_v59 = vrot.slane %v5859_v23, 4  ;;  %v5084_v56 = vrot.slane %v5082_v38, 5  ;;  %v5087_v26 = vshrl.u32 %v4898_v54, 16  ;;  %v5090_v6 = vshll.u32 %v4898_v54, 16  ;;  %v10422_v54 = vld [vmem:[#allocation2 + $0x34] sm:$0x1] }
 0x2bd   :  { %v5851_v12 = vsel %vm8339_vm9, %v5846_v1, %v5850_v63  ;;  %v5096_v35 = vshll.u32 %v10324_v55, 16  ;;  %v5867_v43 = vshrl.u32 %v5810_v33, 16  ;;  %v5079_v49 = vor.u32 %v5078_v30, %v5075_v53  ;;  %v5816_v38 = vld [vmem:[#allocation2 + $0x38] sm:$0xf]  ;;  %v10427_v53 = vld [vmem:[#allocation2 + $0x3c] sm:$0x1] }
 0x2be   :  { %v5865_v39 = vsel %vm8339_vm9, %v5860_v59, %v5864_v37  ;;  %v5089_v14 = vrot.slane %v5087_v26, 4  ;;  %v5870_v3 = vshll.u32 %v5810_v33, 16  ;;  %v5092_v2 = vrot.slane %v5090_v6, 5 }
 0x2bf   :  { %7898 = vmatmul.mubr.msk.bf16.gmra.mxu1 %vm11242_vm1, %v7263_v7  ;;  %v7340_v8 = vcombine.low %v5851_v12, %v5865_v39  ;;  %v5098_v24 = vrot.slane %v5096_v35, 5  ;;  %v5869_v42 = vrot.slane %v5867_v43, 4  ;;  %v5080_v28 = vrot.slane %v5079_v49, 4  ;;  %v5818_v35 = vld [vmem:[#allocation2 + $0x40] sm:$0xf]  ;;  %vm11255_vm1 = vmmov %vm11209_vm0 }
 0x2c0   :  { %v5872_v16 = vrot.slane %v5870_v3, 5  ;;  %v5876_v55 = vshll.u32 %v10403_v62, 16  ;;  %v5881_v31 = vshrl.u32 %v5812_v5, 16  ;;  %v5093_v19 = vor.u32 %v5092_v2, %v5089_v14 }
 0x2c1   :  { %7949 = vmatprep.mubr.msk.bf16.mxu0 %vm11243_vm2, %v7340_v8  ;;  %v5884_v44 = vshll.u32 %v5812_v5, 16  ;;  %v5890_v27 = vshll.u32 %v10410_v57, 16  ;;  %v5101_v10 = vshrl.u32 %v4900_v58, 16  ;;  %v5085_v34 = vsel %vm8339_vm9, %v5080_v28, %v5084_v56  ;;  %v10432_v5 = vld [vmem:[#allocation2 + $0x44] sm:$0x1]  ;;  %vm11256_vm2 = vmmov %vm11209_vm0 }
 0x2c2   :  { %v5873_v9 = vor.u32 %v5872_v16, %v5869_v42  ;;  %v5878_v22 = vrot.slane %v5876_v55, 5  ;;  %v5883_v50 = vrot.slane %v5881_v31, 4  ;;  %v5094_v48 = vrot.slane %v5093_v19, 4  ;;  %v5820_v16 = vld [vmem:[#allocation2 + $0x48] sm:$0xf] }
 0x2c3   :  { %v5886_v20 = vrot.slane %v5884_v44, 5  ;;  %v5892_v29 = vrot.slane %v5890_v27, 5  ;;  %v5103_v13 = vrot.slane %v5101_v10, 4  ;;  %v5104_v18 = vshll.u32 %v4900_v58, 16  ;;  %v8062_v19 = vld [vmem:[#allocation2 + $0x10] ss:$8 sps:$4 sm:$0xff]  }
 0x2c4   :  { %v5874_v11 = vrot.slane %v5873_v9, 4  ;;  %v5110_v25 = vshll.u32 %v10347_v46, 16  ;;  %v5115_v63 = vshrl.u32 %v4902_v47, 16  ;;  %v5099_v60 = vsel %vm8339_vm9, %v5094_v48, %v5098_v24  ;;  %v10440_v44 = vld [vmem:[#allocation2 + $0x4c] sm:$0x1] }
 0x2c5   :  { %v5887_v52 = vor.u32 %v5886_v20, %v5883_v50  ;;  %v5118_v21 = vshll.u32 %v4902_v47, 16  ;;  %v5124_v40 = vshll.u32 %v10357_v0, 16  ;;  %v7264_v4 = vcombine.low %v5085_v34, %v5099_v60  ;;  %v5822_v34 = vld [vmem:[#allocation2 + $0x60] sm:$0xf]  ;;  %v5824_v60 = vld [vmem:[#allocation2 + $0x68] sm:$0xf] }
 0x2c6   :  { %v5879_v15 = vsel %vm8339_vm9, %v5874_v11, %v5878_v22  ;;  %v5106_v23 = vrot.slane %v5104_v18, 5  ;;  %v5112_v17 = vrot.slane %v5110_v25, 5  ;;  %v5117_v46 = vrot.slane %v5115_v63, 4  ;;  %v10443_v18 = vld [vmem:[#allocation2 + $0x64] sm:$0x1] }
 0x2c7   :  { %v5888_v33 = vrot.slane %v5887_v52, 4  ;;  %v5120_v7 = vrot.slane %v5118_v21, 5  ;;  %v5126_v1 = vrot.slane %v5124_v40, 5  ;;  %7901 = vmatprep.mubr.msk.bf16.mxu1 %vm11244_vm3, %v7264_v4  ;;  %v5895_v59 = vshrl.u32 %v5814_v41, 16  ;;  %vm11257_vm3 = vmmov %vm11209_vm0 }
 0x2c8   :  { %v5107_v37 = vor.u32 %v5106_v23, %v5103_v13  ;;  %v5898_v0 = vshll.u32 %v5814_v41, 16  ;;  %v5904_v30 = vshll.u32 %v10422_v54, 16  ;;  %v5909_v12 = vshrl.u32 %v5816_v38, 16 }
 0x2c9   :  { %v5893_v56 = vsel %vm8339_vm9, %v5888_v33, %v5892_v29  ;;  %v5121_v26 = vor.u32 %v5120_v7, %v5117_v46  ;;  %v5912_v6 = vshll.u32 %v5816_v38, 16  ;;  %v5897_v49 = vrot.slane %v5895_v59, 4 }
 0x2ca   :  { %v7341_v43 = vcombine.low %v5879_v15, %v5893_v56  ;;  %v5108_v39 = vrot.slane %v5107_v37, 4  ;;  %v5900_v14 = vrot.slane %v5898_v0, 5  ;;  %v5906_v58 = vrot.slane %v5904_v30, 5  ;;  %v10452_v15 = vld [vmem:[#allocation2 + $0x6c] sm:$0x1] }
 0x2cb   :  { %v5122_v3 = vrot.slane %v5121_v26, 4  ;;  %v5911_v8 = vrot.slane %v5909_v12, 4  ;;  %v5914_v2 = vrot.slane %v5912_v6, 5  ;;  %v5918_v28 = vshll.u32 %v10427_v53, 16  ;;  %v10455_v30 = vld [vmem:[#allocation2 + $0x74] sm:$0x1] }
 0x2cc   :  { %7950 = vmatmul.mubr.msk.bf16.vlgmr.msra.gmra.mxu0 %vm11245_vm4, %v7341_v43  ;;  %v5113_v24 = vsel %vm8339_vm9, %v5108_v39, %v5112_v17  ;;  %v5901_v42 = vor.u32 %v5900_v14, %v5897_v49  ;;  %v5923_v55 = vshrl.u32 %v5818_v35, 16  ;;  %v5926_v27 = vshll.u32 %v5818_v35, 16  ;;  %v5826_v17 = vld [vmem:[#allocation2 + $0x70] sm:$0xf]  ;;  %v5828_v6 = vld [vmem:[#allocation2 + $0x78] sm:$0xf]  ;;  %vm11258_vm4 = vmmov %vm11209_vm0 }
 0x2cd   :  { %v5127_v31 = vsel %vm8339_vm9, %v5122_v3, %v5126_v1  ;;  %v5915_v47 = vor.u32 %v5914_v2, %v5911_v8  ;;  %v5932_v10 = vshll.u32 %v10432_v5, 16  ;;  %v5920_v50 = vrot.slane %v5918_v28, 5  ;;  %v8064_v39 = vld [vmem:[#allocation2 + $0x20] ss:$8 sps:$4 sm:$0xff]  }
 0x2ce   :  { %v7265_v9 = vcombine.low %v5113_v24, %v5127_v31  ;;  %v5902_v22 = vrot.slane %v5901_v42, 4  ;;  %v5925_v48 = vrot.slane %v5923_v55, 4  ;;  %v5928_v29 = vrot.slane %v5926_v27, 5  ;;  %v8068_v3 = vld [vmem:[%s11089_s4 + $0x80] sm:$0xff]   ;;  %v10464_v24 = vld [vmem:[#allocation2 + $0x7c] sm:$0x1] }
 0x2cf   :  { %v5916_v20 = vrot.slane %v5915_v47, 4  ;;  %v5934_v13 = vrot.slane %v5932_v10, 5  ;;  %v5937_v11 = vshrl.u32 %v5820_v16, 16  ;;  %v5940_v63 = vshll.u32 %v5820_v16, 16  ;;  %v8065_v16 = vld [vmem:[#allocation2 + $0x30] ss:$8 sps:$4 sm:$0xff]  }
 0x2d0   :  { %7902 = vmatmul.mubr.msk.bf16.gmra.mxu1 %vm11246_vm5, %v7265_v9  ;;  %v5907_v25 = vsel %vm8339_vm9, %v5902_v22, %v5906_v58  ;;  %v5946_v41 = vshll.u32 %v10440_v44, 16  ;;  %v5951_v52 = vshrl.u32 %v5822_v34, 16  ;;  %v5929_v40 = vor.u32 %v5928_v29, %v5925_v48  ;;  %v5830_v9 = vld [vmem:[#allocation2 + $0x80] sm:$0xf]  ;;  %v10470_v22 = vld [vmem:[#allocation2 + $0x84] sm:$0x1]  ;;  %vm11260_vm5 = vmmov %vm11209_vm0 }
 0x2d1   :  { %v5921_v21 = vsel %vm8339_vm9, %v5916_v20, %v5920_v50  ;;  %7929 = vmatprep.mubr.msk.bf16.mxu1 %vm11247_vm10, %v8062_v19  ;;  %v5939_v4 = vrot.slane %v5937_v11, 4  ;;  %v5954_v23 = vshll.u32 %v5822_v34, 16  ;;  %v5942_v33 = vrot.slane %v5940_v63, 5  ;;  %vm11261_vm10 = vmmov %vm11209_vm0 }
 0x2d2   :  { %v7342_v38 = vcombine.low %v5907_v25, %v5921_v21  ;;  %v5948_v46 = vrot.slane %v5946_v41, 5  ;;  %v5953_v7 = vrot.slane %v5951_v52, 4  ;;  %v5930_v1 = vrot.slane %v5929_v40, 4 }
 0x2d3   :  { %v5956_v37 = vrot.slane %v5954_v23, 5  ;;  %v5960_v59 = vshll.u32 %v10443_v18, 16  ;;  %v5965_v0 = vshrl.u32 %v5824_v60, 16  ;;  %v5943_v56 = vor.u32 %v5942_v33, %v5939_v4  ;;  %v10481_v23 = vld [vmem:[#allocation2 + $0x8c] sm:$0x1] }
 0x2d4   :  { %7953 = vmatprep.mubr.msk.bf16.mxu0 %vm11248_vm11, %v7342_v38  ;;  %v5968_v26 = vshll.u32 %v5824_v60, 16  ;;  %v5974_v12 = vshll.u32 %v10452_v15, 16  ;;  %v5979_v35 = vshrl.u32 %v5826_v17, 16  ;;  %v5935_v43 = vsel %vm8339_vm9, %v5930_v1, %v5934_v13  ;;  %v5832_v13 = vld [vmem:[#allocation2 + $0x88] sm:$0xf]  ;;  %vm11262_vm11 = vmmov %vm11209_vm0 }
 0x2d5   :  { %v5957_v49 = vor.u32 %v5956_v37, %v5953_v7  ;;  %v5967_v14 = vrot.slane %v5965_v0, 4  ;;  %v5944_v58 = vrot.slane %v5943_v56, 4  ;;  %v5962_v8 = vrot.slane %v5960_v59, 5  ;;  %v5834_v33 = vld [vmem:[#allocation2 + $0x90] sm:$0xf] }
 0x2d6   :  { %v5970_v2 = vrot.slane %v5968_v26, 5  ;;  %v5981_v42 = vrot.slane %v5979_v35, 4  ;;  %v5982_v55 = vshll.u32 %v5826_v17, 16  ;;  %v5988_v31 = vshll.u32 %v10455_v30, 16  ;;  %v8066_v56 = vld [vmem:[#allocation2 + $0x40] ss:$8 sps:$4 sm:$0xff]  }
 0x2d7   :  { %v5958_v28 = vrot.slane %v5957_v49, 4  ;;  %v5993_v47 = vshrl.u32 %v5828_v6, 16  ;;  %v5949_v19 = vsel %vm8339_vm9, %v5944_v58, %v5948_v46  ;;  %v5976_v10 = vrot.slane %v5974_v12, 5  ;;  %v5836_v49 = vld [vmem:[#allocation2 + $0x98] sm:$0xf] }
 0x2d8   :  { %7930 = vmatmul.mubr.msk.bf16.vlgmr.msra.gmra.mxu1 %vm11249_vm13, %v8064_v39  ;;  %v5971_v27 = vor.u32 %v5970_v2, %v5967_v14  ;;  %v5996_v34 = vshll.u32 %v5828_v6, 16  ;;  %v7343_v50 = vcombine.low %v5935_v43, %v5949_v19  ;;  %v5984_v20 = vrot.slane %v5982_v55, 5  ;;  %v8067_v39 = vld [vmem:[#allocation2 + $0x60] ss:$8 sps:$4 sm:$0xff]   ;;  %v10493_v19 = vld [vmem:[#allocation2 + $0x9c] sm:$0x1]  ;;  %vm11263_vm13 = vmmov %vm11209_vm0 }
 0x2d9   :  { %v5963_v48 = vsel %vm8339_vm9, %v5958_v28, %v5962_v8  ;;  %7966 = vmatpush3.bf16.msra.mxu1 %v10373_v36  ;;  %7933 = vmatprep.mubr.msk.bf16.mxu1 %vm11250_vm14, %v8065_v16  ;;  %v6002_v29 = vshll.u32 %v10464_v24, 16  ;;  %v5990_v25 = vrot.slane %v5988_v31, 5  ;;  %v5995_v63 = vrot.slane %v5993_v47, 4  ;;  %v10490_v8 = vld [vmem:[#allocation2 + $0x94] sm:$0x1]  ;;  %vm11264_vm14 = vmmov %vm11209_vm0 }
 0x2da   :  { %v5972_v11 = vrot.slane %v5971_v27, 4  ;;  %v5998_v41 = vrot.slane %v5996_v34, 5  ;;  %7967 = vmatprep.subr.bf16.mxu1 %v8068_v3  ;;  %7954 = vmatmul.mubr.msk.bf16.gmra.mxu0 %vm11251_vm15, %v7343_v50  ;;  %v5985_v60 = vor.u32 %v5984_v20, %v5981_v42  ;;  %v6007_v52 = vshrl.u32 %v5830_v9, 16  ;;  %vm11265_vm15 = vmmov %vm11209_vm0 }
 0x2db   :  { %v6010_v21 = vshll.u32 %v5830_v9, 16  ;;  %v6016_v40 = vshll.u32 %v10470_v22, 16  ;;  %v6021_v17 = vshrl.u32 %v5832_v13, 16  ;;  %v6024_v38 = vshll.u32 %v5832_v13, 16 }
 0x2dc   :  { %v5977_v36 = vsel %vm8339_vm9, %v5972_v11, %v5976_v10  ;;  %v5999_v4 = vor.u32 %v5998_v41, %v5995_v63  ;;  %v5986_v7 = vrot.slane %v5985_v60, 4  ;;  %v6009_v1 = vrot.slane %v6007_v52, 4  ;;  %v6240_v63 = vld [vmem:[#allocation2 + $0x10] sm:$0xe]  ;;  %v6241_v41 = vld [vmem:[#allocation2 + $0x18] sm:$0xe] }
 0x2dd   :  { %v7344_v46 = vcombine.low %v5963_v48, %v5977_v36  ;;  %v6012_v37 = vrot.slane %v6010_v21, 5  ;;  %7968 = vmatpush3.bf16.msra.mxu1 %v8068_v3  ;;  %v6004_v0 = vrot.slane %v6002_v29, 5  ;;  %v6023_v26 = vrot.slane %v6021_v17, 4  ;;  %v8069_v52 = vld [vmem:[#allocation2 + $0x70] ss:$8 sps:$4 sm:$0xff]  }
 0x2de   :  { %v6000_v59 = vrot.slane %v5999_v4, 4  ;;  %v6026_v12 = vrot.slane %v6024_v38, 5  ;;  %v5991_v6 = vsel %vm8339_vm9, %v5986_v7, %v5990_v25  ;;  %v6030_v43 = vshll.u32 %v10481_v23, 16  ;;  %v8070_v4 = vld [vmem:[#allocation2 + $0x80] ss:$8 sps:$4 sm:$0xff]  }
 0x2df   :  { %7957 = vmatprep.mubr.msk.bf16.mxu0 %vm11209_vm0, %v7344_v46  ;;  %v6013_v35 = vor.u32 %v6012_v37, %v6009_v1  ;;  %v6035_v14 = vshrl.u32 %v5834_v33, 16  ;;  %v6038_v2 = vshll.u32 %v5834_v33, 16  ;;  %v6018_v16 = vrot.slane %v6016_v40, 5 }
 0x2e0   :  { %v6005_v58 = vsel %vm8339_vm9, %v6000_v59, %v6004_v0  ;;  %7934 = vmatmul.mubr.msk.bf16.gmra.mxu1 %vm11252_vm6, %v8066_v56  ;;  %v6027_v3 = vor.u32 %v6026_v12, %v6023_v26  ;;  %v6032_v47 = vrot.slane %v6030_v43, 5  ;;  %v6049_v10 = vshrl.u32 %v5836_v49, 16  ;;  %v6242_v59 = vld [vmem:[#allocation2 + $0x20] sm:$0xe]  ;;  %v6243_v26 = vld [vmem:[#allocation2 + $0x28] sm:$0xe]  ;;  %vm11266_vm6 = vmmov %vm11209_vm0 }
 0x2e1   :  { %v7345_v42 = vcombine.low %v5991_v6, %v6005_v58  ;;  %v6014_v28 = vrot.slane %v6013_v35, 4  ;;  %7937 = vmatprep.mubr.msk.bf16.mxu1 %vm11253_vm7, %v8067_v39  ;;  %v6037_v55 = vrot.slane %v6035_v14, 4  ;;  %v6040_v27 = vrot.slane %v6038_v2, 5  ;;  %v6244_v12 = vld [vmem:[#allocation2 + $0x30] sm:$0xe]  ;;  %vm11290_vm7 = vmmov %vm11209_vm0 }
 0x2e2   :  { %v6028_v31 = vrot.slane %v6027_v3, 4  ;;  %v6044_v9 = vshll.u32 %v10490_v8, 16  ;;  %v6052_v50 = vshll.u32 %v5836_v49, 16  ;;  %v6058_v48 = vshll.u32 %v10493_v19, 16  ;;  %v8071_v6 = vld [vmem:[#allocation2 + $0x90] ss:$8 sps:$4 sm:$0xff]  }
 0x2e3   :  { %7958 = vmatmul.mubr.msk.bf16.gmra.mxu0 %vm11254_vm8, %v7345_v42  ;;  %v6019_v34 = vsel %vm8339_vm9, %v6014_v28, %v6018_v16  ;;  %v6041_v29 = vor.u32 %v6040_v27, %v6037_v55  ;;  %v6051_v13 = vrot.slane %v6049_v10, 4  ;;  %v7358_v17 = vrot.slane %v6240_v63, 9  ;;  %v6247_v55 = vld [vmem:[#allocation2 + $0x48] sm:$0xe]  ;;  %v6251_v63 = vld [vmem:[#allocation2 + $0x78] sm:$0xe]  ;;  %vm11291_vm8 = vmmov %vm11209_vm0 }
 0x2e4   :  { %v6033_v20 = vsel %vm8339_vm9, %v6028_v31, %v6032_v47  ;;  %v6054_v25 = vrot.slane %v6052_v50, 5  ;;  %v6046_v21 = vrot.slane %v6044_v9, 5  ;;  %v6060_v36 = vrot.slane %v6058_v48, 5  ;;  %v6249_v31 = vld [vmem:[#allocation2 + $0x68] sm:$0xe] }
 0x2e5   :  { %v7346_v11 = vcombine.low %v6019_v34, %v6033_v20  ;;  %v6042_v60 = vrot.slane %v6041_v29, 4  ;;  %v6290_v38 = vrot.slane %v10380_v45, 5  ;;  %v7359_v33 = vrot.slane %v6241_v41, 9  ;;  %v6253_v41 = vld [vmem:[#allocation2 + $0x88] sm:$0xe] }
 0x2e6   :  { %v6055_v40 = vor.u32 %v6054_v25, %v6051_v13  ;;  %v6294_v46 = vrot.slane %v10389_v61, 5  ;;  %v6245_v61 = vld [vmem:[#allocation2 + $0x38] sm:$0xe]  ;;  %v7360_v35 = vrot.slane %v6242_v59, 9  ;;  %v6298_v39 = vrot.slane %v10403_v62, 5 }
 0x2e7   :  { %7961 = vmatprep.mubr.msk.bf16.mxu0 %vm11255_vm1, %v7346_v11  ;;  %v6047_v7 = vsel %vm8339_vm9, %v6042_v60, %v6046_v21  ;;  %v6291_v56 = vsel %vm8551_vm12, %v7358_v17, %v6290_v38  ;;  %v7361_v32 = vrot.slane %v6243_v26, 9  ;;  %v6302_v49 = vrot.slane %v10410_v57, 5  ;;  %v6246_v62 = vld [vmem:[#allocation2 + $0x40] sm:$0xe]  ;;  %vm11293_vm1 = vmmov %vm11209_vm0 }
 0x2e8   :  { %7938 = vmatmul.mubr.msk.bf16.gmra.mxu1 %vm11256_vm2, %v8069_v52  ;;  %v6056_v1 = vrot.slane %v6055_v40, 4  ;;  %v6295_v45 = vsel %vm8551_vm12, %v7359_v33, %v6294_v46  ;;  %v7362_v14 = vrot.slane %v6244_v12, 9  ;;  %v6306_v58 = vrot.slane %v10422_v54, 5  ;;  %v6248_v54 = vld [vmem:[#allocation2 + $0x60] sm:$0xe]  ;;  %vm11299_vm2 = vmmov %vm11209_vm0 }
 0x2e9   :  { %7941 = vmatprep.mubr.msk.bf16.mxu1 %vm11257_vm3, %v8070_v4  ;;  %v7378_v43 = vcombine.low %v6291_v56, %v6295_v45  ;;  %v7363_v3 = vrot.slane %v6245_v61, 9  ;;  %v6310_v2 = vrot.slane %v10427_v53, 5  ;;  %v6299_v42 = vsel %vm8551_vm12, %v7360_v35, %v6298_v39  ;;  %vm11305_vm3 = vmmov %vm11209_vm0 }
 0x2ea   :  { %v6061_v37 = vsel %vm8339_vm9, %v6056_v1, %v6060_v36  ;;  %vm11259_vm9 = vmmov %vm11209_vm0  ;;  %v6303_v28 = vsel %vm8551_vm12, %v7361_v32, %v6302_v49  ;;  %v6307_v57 = vsel %vm8551_vm12, %v7362_v14, %v6306_v58  ;;  %v7364_v53 = vrot.slane %v6246_v62, 9 }
 0x2eb   :  { %v7347_v0 = vcombine.low %v6047_v7, %v6061_v37  ;;  %v6311_v16 = vsel %vm8551_vm12, %v7363_v3, %v6310_v2  ;;  %v7379_v47 = vcombine.low %v6299_v42, %v6303_v28  ;;  %v6314_v10 = vrot.slane %v10432_v5, 5  ;;  %v6250_v5 = vld [vmem:[#allocation2 + $0x70] sm:$0xe]  ;;  %v6255_v37 = vld [vmem:[#allocation2 + $0x98] sm:$0xe] }
 0x2ec   :  { %v7380_v27 = vcombine.low %v6307_v57, %v6311_v16  ;;  %v7365_v34 = vrot.slane %v6247_v55, 9  ;;  %v6318_v9 = vrot.slane %v10440_v44, 5  ;;  %v7366_v50 = vrot.slane %v6248_v54, 9 }
 0x2ed   :  { %7962 = vmatmul.mubr.msk.bf16.gmra.mxu0 %vm11258_vm4, %v7347_v0  ;;  %v6322_v48 = vrot.slane %v10443_v18, 5  ;;  %v7367_v20 = vrot.slane %v6249_v31, 9  ;;  %v6326_v29 = vrot.slane %v10452_v15, 5  ;;  %v6315_v13 = vsel %vm8551_vm12, %v7364_v53, %v6314_v10  ;;  %v6252_v18 = vld [vmem:[#allocation2 + $0x80] sm:$0xe]  ;;  %vm11311_vm4 = vmmov %vm11209_vm0 }
 0x2ee   :  { %v6319_v11 = vsel %vm8551_vm12, %v7365_v34, %v6318_v9  ;;  %v7368_v15 = vrot.slane %v6250_v5, 9  ;;  %v6330_v21 = vrot.slane %v10455_v30, 5  ;;  %v7369_v40 = vrot.slane %v6251_v63, 9  ;;  %v6254_v30 = vld [vmem:[#allocation2 + $0x90] sm:$0xe] }
 0x2ef   :  { %v6323_v44 = vsel %vm8551_vm12, %v7366_v50, %v6322_v48  ;;  %v6327_v25 = vsel %vm8551_vm12, %v7367_v20, %v6326_v29  ;;  %v7381_v60 = vcombine.low %v6315_v13, %v6319_v11  ;;  %v6334_v36 = vrot.slane %v10464_v24, 5 }
 0x2f0   :  { %7942 = vmatmul.mubr.msk.bf16.gmra.mxu1 %vm11259_vm9, %v8071_v6  ;;  %v7382_v52 = vcombine.low %v6323_v44, %v6327_v25  ;;  %v7370_v4 = vrot.slane %v6252_v18, 9  ;;  %v6338_v17 = vrot.slane %v10470_v22, 5  ;;  %v7371_v38 = vrot.slane %v6253_v41, 9  ;;  %vm11313_vm9 = vmmov %vm11209_vm0 }
 0x2f1   :  { %7969 = vmatprep.mubr.msk.bf16.mxu1 %vm11260_vm5, %v7378_v43  ;;  %v6342_v33 = vrot.slane %v10481_v23, 5  ;;  %v6331_v46 = vsel %vm8551_vm12, %v7368_v15, %v6330_v21  ;;  %v6335_v7 = vsel %vm8551_vm12, %v7369_v40, %v6334_v36  ;;  %v7372_v59 = vrot.slane %v6254_v30, 9  ;;  %vm11317_vm5 = vmmov %vm11209_vm0 }
 0x2f2   :  { %v6339_v24 = vsel %vm8551_vm12, %v7370_v4, %v6338_v17  ;;  %v7383_v22 = vcombine.low %v6331_v46, %v6335_v7  ;;  %v6346_v23 = vrot.slane %v10490_v8, 5  ;;  %v7373_v56 = vrot.slane %v6255_v37, 9 }
 0x2f3   :  { %v6343_v1 = vsel %vm8551_vm12, %v7371_v38, %v6342_v33  ;;  %v6350_v45 = vrot.slane %v10493_v19, 5 }
 0x2f4   :  { %v7384_v0 = vcombine.low %v6339_v24, %v6343_v1  ;;  %v6347_v26 = vsel %vm8551_vm12, %v7372_v59, %v6346_v23 }
 0x2f5   :  { %v6351_v12 = vsel %vm8551_vm12, %v7373_v56, %v6350_v45  ;;  %vm11289_vm12 = vmmov %vm11209_vm0 }
 0x2f6   :  { %v7385_v61 = vcombine.low %v6347_v26, %v6351_v12 }
 0x2f8   :  { %7970 = vmatmul.mubr.msk.bf16.vlgmr.msra.gmra.mxu1 %vm11261_vm10, %v7379_v47  ;;  %vm11320_vm10 = vmmov %vm11209_vm0 }
 0x2f9   :  { %7973 = vmatprep.mubr.msk.bf16.mxu1 %vm11262_vm11, %v7380_v27  ;;  %vm11321_vm11 = vmmov %vm11209_vm0 }
 0x300   :  { %7974 = vmatmul.mubr.msk.bf16.gmra.mxu1 %vm11263_vm13, %v7381_v60  ;;  %vm11322_vm13 = vmmov %vm11209_vm0 }
 0x301   :  { %7977 = vmatprep.mubr.msk.bf16.mxu1 %vm11264_vm14, %v7382_v52  ;;  %vm11323_vm14 = vmmov %vm11209_vm0 }
 0x308   :  { %7978 = vmatmul.mubr.msk.bf16.gmra.mxu1 %vm11265_vm15, %v7383_v22  ;;  %vm11324_vm15 = vmmov %vm11209_vm0 }
 0x309   :  { %7981 = vmatprep.mubr.msk.bf16.mxu1 %vm11209_vm0, %v7384_v0 }
 0x310   :  { %7982 = vmatmul.mubr.msk.bf16.gmra.mxu1 %vm11266_vm6, %v7385_v61  ;;  %vm11325_vm6 = vmmov %vm11209_vm0 }
 0x320   :  { %v7831_v6 = vpop.f32.mrf.mxu0 }
 0x322   :  { %v4309_v35 = vpop.f32.mrf.mxu0 }
 0x324   :  { %v7832_v43 = vpop.f32.mrf.mxu0 }
 0x326   :  { %v4312_v8 = vpop.f32.mrf.mxu0 }
 0x328   :  { %v7835_v39 = vpop.f32.mrf.mxu0 }
 0x32a   :  { %v4325_v32 = vpop.f32.mrf.mxu0 }
 0x32c   :  { %v7836_v19 = vpop.f32.mrf.mxu0 }
 0x32d   :  { %v7811_v49 = vpop.f32.mrf.mxu1 }
 0x32e   :  { %v4318_v14 = vadd.f32 %v7831_v6, %v7811_v49  ;;  %v4328_v58 = vpop.f32.mrf.mxu0 }
 0x32f   :  { %v4136_v3 = vpop.f32.mrf.mxu1 }
 0x330   :  { %v4310_v2 = vadd.f32 %v4309_v35, %v4136_v3  ;;  %v7839_v42 = vpop.f32.mrf.mxu0 }
 0x331   :  { %v7812_v28 = vpop.f32.mrf.mxu1 }
 0x332   :  { %v4321_v62 = vadd.f32 %v7832_v43, %v7812_v28  ;;  %v4341_v51 = vpop.f32.mrf.mxu0 }
 0x333   :  { %v4139_v57 = vpop.f32.mrf.mxu1 }
 0x334   :  { %v4313_v16 = vadd.f32 %v4312_v8, %v4139_v57  ;;  %v7840_v55 = vpop.f32.mrf.mxu0 }
 0x336   :  { %v4344_v54 = vpop.f32.mrf.mxu0  ;;  %v7815_v31 = vpop.f32.mrf.mxu1 }
 0x337   :  { %v4334_v47 = vadd.f32 %v7835_v39, %v7815_v31 }
 0x338   :  { %v7843_v53 = vpop.f32.mrf.mxu0  ;;  %v4152_v27 = vpop.f32.mrf.mxu1 }
 0x339   :  { %v4326_v10 = vadd.f32 %v4325_v32, %v4152_v27 }
 0x33a   :  { %v4357_v34 = vpop.f32.mrf.mxu0  ;;  %v7816_v9 = vpop.f32.mrf.mxu1 }
 0x33b   :  { %v4337_v50 = vadd.f32 %v7836_v19, %v7816_v9 }
 0x33c   :  { %v7844_v48 = vpop.f32.mrf.mxu0  ;;  %v4155_v20 = vpop.f32.mrf.mxu1 }
 0x33d   :  { %v4329_v29 = vadd.f32 %v4328_v58, %v4155_v20 }
 0x33e   :  { %v4360_v13 = vpop.f32.mrf.mxu0 }
 0x33f   :  { %v7819_v11 = vpop.f32.mrf.mxu1 }
 0x340   :  { %v4350_v5 = vadd.f32 %v7839_v42, %v7819_v11  ;;  %v7871_v44 = vpop.f32.mrf.mxu0 }
 0x341   :  { %v4168_v25 = vpop.f32.mrf.mxu1 }
 0x342   :  { %v4342_v63 = vadd.f32 %v4341_v51, %v4168_v25  ;;  %v10567_v18 = vpop.f32.mrf.mxu0 }
 0x343   :  { %v7820_v41 = vpop.f32.mrf.mxu1 }
 0x344   :  { %v4353_v60 = vadd.f32 %v7840_v55, %v7820_v41  ;;  %v10569_v15 = vpop.f32.mrf.mxu0 }
 0x345   :  { %v4171_v52 = vpop.f32.mrf.mxu1 }
 0x346   :  { %v4345_v21 = vadd.f32 %v4344_v54, %v4171_v52  ;;  %v10571_v40 = vpop.f32.mrf.mxu0 }
 0x347   :  { %v7823_v36 = vpop.f32.mrf.mxu1 }
 0x348   :  { %v4366_v4 = vadd.f32 %v7843_v53, %v7823_v36  ;;  %v7875_v17 = vpop.f32.mrf.mxu0 }
 0x349   :  { %v4184_v38 = vpop.f32.mrf.mxu1 }
 0x34a   :  { %v4358_v33 = vadd.f32 %v4357_v34, %v4184_v38  ;;  %v10573_v46 = vpop.f32.mrf.mxu0 }
 0x34b   :  { %v7824_v7 = vpop.f32.mrf.mxu1 }
 0x34c   :  { %v4369_v30 = vadd.f32 %v7844_v48, %v7824_v7  ;;  %v10575_v24 = vpop.f32.mrf.mxu0 }
 0x34d   :  { %v4187_v1 = vpop.f32.mrf.mxu1 }
 0x34e   :  { %v4361_v37 = vadd.f32 %v4360_v13, %v4187_v1  ;;  %v10577_v22 = vpop.f32.mrf.mxu0 }
 0x34f   :  { %v7851_v59 = vpop.f32.mrf.mxu1 }
 0x350   :  { %v4648_v0 = vadd.f32 %v7851_v59, %v4318_v14 }
 0x351   :  { %v4583_v23 = vpop.f32.mrf.mxu1  ;;  %v7879_v56 = vpop.f32.mrf.mxu0 }
 0x352   :  { %v10579_v45 = vadd.f32 %v4583_v23, %v4310_v2  ;;  %v4858_v26 = vadd.f32 %v7871_v44, %v4648_v0 }
 0x353   :  { %v7852_v12 = vpop.f32.mrf.mxu1  ;;  %v10581_v61 = vpop.f32.mrf.mxu0 }
 0x354   :  { %v10583_v6 = vadd.f32 %v7852_v12, %v4321_v62 }
 0x355   :  { %v4586_v35 = vpop.f32.mrf.mxu1  ;;  %v10585_v43 = vpop.f32.mrf.mxu0 }
 0x356   :  { %v10587_v8 = vadd.f32 %v4586_v35, %v4313_v16 }
 0x357   :  { %v7855_v39 = vpop.f32.mrf.mxu1  ;;  %v10589_v32 = vpop.f32.mrf.mxu0 }
 0x358   :  { %v4652_v19 = vadd.f32 %v7855_v39, %v4334_v47 }
 0x359   :  { %v4599_v49 = vpop.f32.mrf.mxu1  ;;  %v7883_v14 = vpop.f32.mrf.mxu0 }
 0x35a   :  { %v10591_v58 = vadd.f32 %v4599_v49, %v4326_v10  ;;  %v4862_v3 = vadd.f32 %v7875_v17, %v4652_v19 }
 0x35b   :  { %v7856_v2 = vpop.f32.mrf.mxu1  ;;  %v10593_v42 = vpop.f32.mrf.mxu0 }
 0x35c   :  { %v10595_v28 = vadd.f32 %v7856_v2, %v4337_v50 }
 0x35d   :  { %v4602_v62 = vpop.f32.mrf.mxu1  ;;  %v10597_v51 = vpop.f32.mrf.mxu0 }
 0x35e   :  { %11267 = vst [vmem:[#allocation14_spill] sm:$0xff] %v10597_v51  ;;  %v10599_v57 = vadd.f32 %v4602_v62, %v4329_v29 }
 0x35f   :  { %v7859_v16 = vpop.f32.mrf.mxu1  ;;  %v10601_v55 = vpop.f32.mrf.mxu0 }
 0x360   :  { %11268 = vst [vmem:[#allocation11_spill] sm:$0xff] %v10601_v55  ;;  %v4656_v54 = vadd.f32 %v7859_v16, %v4350_v5  ;;  %v4856_v55 = vadd.f32 %v10567_v18, %v10579_v45 }
 0x361   :  { %v4615_v31 = vpop.f32.mrf.mxu1  ;;  %v10603_v47 = vpop.f32.mrf.mxu0 }
 0x362   :  { %v10605_v53 = vadd.f32 %v4615_v31, %v4342_v63  ;;  %v4866_v27 = vadd.f32 %v7879_v56, %v4656_v54 }
 0x363   :  { %v7860_v10 = vpop.f32.mrf.mxu1  ;;  %v10607_v34 = vpop.f32.mrf.mxu0 }
 0x364   :  { %v10609_v9 = vadd.f32 %v7860_v10, %v4353_v60 }
 0x365   :  { %v4618_v50 = vpop.f32.mrf.mxu1  ;;  %v10611_v48 = vpop.f32.mrf.mxu0 }
 0x366   :  { %v10613_v20 = vadd.f32 %v4618_v50, %v4345_v21 }
 0x367   :  { %v7863_v29 = vpop.f32.mrf.mxu1  ;;  %v10615_v13 = vpop.f32.mrf.mxu0 }
 0x368   :  { %v4660_v11 = vadd.f32 %v7863_v29, %v4366_v4 }
 0x369   :  { %v4631_v5 = vpop.f32.mrf.mxu1  ;;  %v10617_v44 = vpop.f32.mrf.mxu0 }
 0x36a   :  { %v10619_v25 = vadd.f32 %v4631_v5, %v4358_v33  ;;  %v4870_v63 = vadd.f32 %v7883_v14, %v4660_v11 }
 0x36b   :  { %v7864_v41 = vpop.f32.mrf.mxu1  ;;  %v10623_v60 = vpop.f32.mrf.mxu0 }
 0x36c   :  { %v10621_v52 = vadd.f32 %v7864_v41, %v4369_v30 }
 0x36d   :  { %v4634_v36 = vpop.f32.mrf.mxu1  ;;  %v10627_v7 = vpop.f32.mrf.mxu0 }
 0x36e   :  { %11269 = vst [vmem:[#allocation16_spill] sm:$0xff] %v10621_v52  ;;  %v10625_v17 = vadd.f32 %v4634_v36, %v4361_v37 }
 0x36f   :  { %v7891_v21 = vpop.f32.mrf.mxu1  ;;  %v10629_v59 = vpop.f32.mrf.mxu0 }
 0x370   :  { %11270 = vst [vmem:[#allocation22_spill] sm:$0xff] %v10625_v17  ;;  %v5292_v38 = vadd.f32 %v7891_v21, %v4858_v26 }
 0x371   :  { %v5227_v1 = vpop.f32.mrf.mxu1  ;;  %v10631_v23 = vpop.f32.mrf.mxu0 }
 0x372   :  { %11271 = vst [vmem:[#allocation33_spill] sm:$0xff] %v10631_v23  ;;  %v5290_v23 = vadd.f32 %v5227_v1, %v4856_v55 }
 0x373   :  { %v7892_v4 = vpop.f32.mrf.mxu1  ;;  %v10637_v35 = vpop.f32.mrf.mxu0 }
 0x374   :  { %v5580_v45 = vadd.f32 %v10607_v34, %v5290_v23  ;;  %v4863_v34 = vadd.f32 %v10575_v24, %v10595_v28 }
 0x375   :  { %v5230_v0 = vpop.f32.mrf.mxu1  ;;  %v10639_v26 = vpop.f32.mrf.mxu0 }
 0x376   :  { %11272 = vst [vmem:[#allocation35_spill] sm:$0xff] %v10639_v26 }
 0x377   :  { %v7895_v33 = vpop.f32.mrf.mxu1  ;;  %v10643_v49 = vpop.f32.mrf.mxu0 }
 0x378   :  { %v10633_v56 = vadd.f32 %v7895_v33, %v4862_v3  ;;  %11274 = vst [vmem:[#allocation17_spill] sm:$0xff] %v10643_v49 }
 0x379   :  { %v5243_v30 = vpop.f32.mrf.mxu1  ;;  %v10647_v2 = vpop.f32.mrf.mxu0 }
 0x37a   :  { %11275 = vst [vmem:[#allocation21_spill] sm:$0xff] %v10647_v2  ;;  %v5586_v24 = vadd.f32 %v10617_v44, %v10633_v56 }
 0x37b   :  { %v10635_v12 = vpop.f32.mrf.mxu1  ;;  %v10651_v3 = vpop.f32.mrf.mxu0 }
 0x37c   :  { %11276 = vst [vmem:[#allocation27_spill] sm:$0xff] %v10651_v3 }
 0x37d   :  { %v5246_v37 = vpop.f32.mrf.mxu1  ;;  %v10655_v54 = vpop.f32.mrf.mxu0 }
 0x37e   :  { %11277 = vst [vmem:[#allocation13_spill] sm:$0xff] %v10655_v54 }
 0x37f   :  { %v7899_v39 = vpop.f32.mrf.mxu1 }
 0x380   :  { %v10641_v19 = vadd.f32 %v7899_v39, %v4866_v27  ;;  %v10661_v27 = vpop.f32.mrf.mxu0 }
 0x381   :  { %v10645_v14 = vpop.f32.mrf.mxu1  ;;  %11280 = vst [vmem:[#allocation15_spill] sm:$0xff] %v10661_v27 }
 0x382   :  { %11273 = vst [vmem:[#allocation20_spill] sm:$0xff] %v10641_v19  ;;  %v4857_v19 = vadd.f32 %v10571_v40, %v10587_v8  ;;  %v5582_v40 = vadd.f32 %v10603_v47, %v5292_v38 }
 0x383   :  { %v10649_v62 = vpop.f32.mrf.mxu1 }
 0x385   :  { %v10653_v16 = vpop.f32.mrf.mxu1 }
 0x38c   :  { %v7951_v5 = vpop.f32.mrf.mxu0 }
 0x38e   :  { %v6161_v21 = vpop.f32.mrf.mxu0 }
 0x390   :  { %v7903_v31 = vpop.f32.mrf.mxu1  ;;  %v7952_v2 = vpop.f32.mrf.mxu0 }
 0x391   :  { %v10657_v10 = vadd.f32 %v7903_v31, %v4870_v63 }
 0x392   :  { %v10659_v50 = vpop.f32.mrf.mxu1  ;;  %v6164_v51 = vpop.f32.mrf.mxu0 }
 0x393   :  { %11278 = vst [vmem:[#allocation19_spill] sm:$0xff] %v10657_v10  ;;  %11279 = vst [vmem:[#allocation34_spill] sm:$0xff] %v10659_v50 }
 0x394   :  { %v10663_v29 = vpop.f32.mrf.mxu1 }
 0x395   :  { %11281 = vst [vmem:[#allocation12_spill] sm:$0xff] %v10663_v29 }
 0x396   :  { %v10665_v11 = vpop.f32.mrf.mxu1 }
 0x397   :  { %11282 = vst [vmem:[#allocation30_spill] sm:$0xff] %v10665_v11 }
 0x398   :  { %v7931_v41 = vpop.f32.mrf.mxu1 }
 0x39a   :  { %v5727_v36 = vpop.f32.mrf.mxu1  ;;  %v10669_v10 = vpop.f32.mrf.mxu0 }
 0x39b   :  { %11283 = vst [vmem:[#allocation25_spill] sm:$0xff] %v10669_v10  ;;  %v5291_v10 = vadd.f32 %v5230_v0, %v4857_v19  ;;  %v5790_v8 = vadd.f32 %v5727_v36, %v5580_v45 }
 0x39c   :  { %v7932_v33 = vpop.f32.mrf.mxu1  ;;  %v6177_v11 = vpop.f32.mrf.mxu0 }
 0x39d   :  { %v5581_v1 = vadd.f32 %v10615_v13, %v5291_v10  ;;  %v5297_v13 = vadd.f32 %v10635_v12, %v4863_v34  ;;  %v4864_v10 = vadd.f32 %v10581_v61, %v10605_v53  ;;  %v4865_v61 = vadd.f32 %v10589_v32, %v10613_v20 }
 0x39e   :  { %v5730_v39 = vpop.f32.mrf.mxu1  ;;  %v10681_v17 = vpop.f32.mrf.mxu0 }
 0x39f   :  { %v5299_v32 = vadd.f32 %v10653_v16, %v4865_v61 }
 0x3a0   :  { %v7935_v3 = vpop.f32.mrf.mxu1 }
 0x3a1   :  { %v5796_v53 = vadd.f32 %v7935_v3, %v5586_v24 }
 0x3a2   :  { %v5743_v54 = vpop.f32.mrf.mxu1 }
 0x3a4   :  { %v10667_v63 = vpop.f32.mrf.mxu1 }
 0x3a6   :  { %v5746_v31 = vpop.f32.mrf.mxu1 }
 0x3a8   :  { %v10671_v27 = vpop.f32.mrf.mxu1 }
 0x3a9   :  { %11284 = vst [vmem:[#allocation36_spill] sm:$0xff] %v10671_v27  ;;  %v4859_v27 = vadd.f32 %v10569_v15, %v10583_v6  ;;  %v4861_v15 = vadd.f32 %v10577_v22, %v10599_v57 }
 0x3aa   :  { %v10673_v29 = vpop.f32.mrf.mxu1 }
 0x3ab   :  { %11285 = vst [vmem:[#allocation29_spill] sm:$0xff] %v10673_v29  ;;  %v5293_v18 = vadd.f32 %v7892_v4, %v4859_v27  ;;  %v5791_v4 = vadd.f32 %v5730_v39, %v5581_v1 }
 0x3ac   :  { %v10675_v52 = vpop.f32.mrf.mxu1 }
 0x3ad   :  { %11286 = vst [vmem:[#allocation26_spill] sm:$0xff] %v10675_v52  ;;  %v4860_v52 = vadd.f32 %v10573_v46, %v10591_v58  ;;  %v5792_v58 = vadd.f32 %v7931_v41, %v5582_v40  ;;  %v5583_v0 = vadd.f32 %v10611_v48, %v5293_v18  ;;  %v6225_v41 = vadd.f32 %v6164_v51, %v5791_v4 }
 0x3ae   :  { %v10677_v26 = vpop.f32.mrf.mxu1  ;;  %v5587_v51 = vadd.f32 %v10627_v7, %v5297_v13  ;;  %v4868_v18 = vadd.f32 %v10593_v42, %v10619_v25 }
 0x3af   :  { %11287 = vst [vmem:[#allocation24_spill] sm:$0xff] %v10677_v26  ;;  %v6180_v26 = vpop.f32.mrf.mxu0  ;;  %v5793_v38 = vadd.f32 %v7932_v33, %v5583_v0  ;;  %v6226_v27 = vadd.f32 %v7951_v5, %v5792_v58  ;;  %v11296_v58 = vld [vmem:[#allocation20_spill] sm:$0xff]  ;;  %v11297_v0 = vld [vmem:[#allocation33_spill] sm:$0xff] }
 0x3b0   :  { %v10683_v49 = vpop.f32.mrf.mxu1  ;;  %v5797_v7 = vadd.f32 %v10667_v63, %v5587_v51  ;;  %v5590_v4 = vadd.f32 %v11297_v0, %v11296_v58  ;;  %v11307_v51 = vld [vmem:[#allocation14_spill] sm:$0xff] }
 0x3b1   :  { %11288 = vst [vmem:[#allocation31_spill] sm:$0xff] %v10683_v49  ;;  %v5294_v49 = vadd.f32 %v5243_v30, %v4860_v52  ;;  %v10702_v6 = vpop.f32.mrf.mxu0  ;;  %v5295_v52 = vadd.f32 %v5246_v37, %v4861_v15  ;;  %v6224_v30 = vadd.f32 %v6161_v21, %v5790_v8  ;;  %v5298_v37 = vadd.f32 %v10645_v14, %v4864_v10  ;;  %v11294_v8 = vld [vmem:[#allocation25_spill] sm:$0xff]  ;;  %v11295_v15 = vld [vmem:[#allocation34_spill] sm:$0xff] }
 0x3b2   :  { %v10687_v50 = vpop.f32.mrf.mxu1  ;;  %v6227_v12 = vadd.f32 %v7952_v2, %v5793_v38  ;;  %v4867_v21 = vadd.f32 %v10585_v43, %v10609_v9  ;;  %v11292_v16 = vld [vmem:[#allocation29_spill] sm:$0xff] }
 0x3b3   :  { %v5584_v23 = vadd.f32 %v10623_v60, %v5294_v49  ;;  %v6193_v19 = vpop.f32.mrf.mxu0  ;;  %v5585_v28 = vadd.f32 %v10629_v59, %v5295_v52 }
 0x3b4   :  { %v10693_v29 = vpop.f32.mrf.mxu1 }
 0x3b5   :  { %v5794_v22 = vadd.f32 %v5743_v54, %v5584_v23  ;;  %v10723_v5 = vpop.f32.mrf.mxu0  ;;  %v5795_v56 = vadd.f32 %v5746_v31, %v5585_v28  ;;  %v5301_v31 = vadd.f32 %v10649_v62, %v4867_v21  ;;  %v11298_v62 = vld [vmem:[#allocation17_spill] sm:$0xff]  ;;  %v11309_v21 = vld [vmem:[#allocation26_spill] sm:$0xff] }
 0x3b6   :  { %v10696_v55 = vpop.f32.mrf.mxu1  ;;  %v5589_v34 = vadd.f32 %v11298_v62, %v5299_v32 }
 0x3b7   :  { %v6228_v44 = vadd.f32 %v6177_v11, %v5794_v22  ;;  %v5588_v11 = vadd.f32 %v10637_v35, %v5298_v37  ;;  %v6196_v45 = vpop.f32.mrf.mxu0  ;;  %v6230_v35 = vadd.f32 %v11294_v8, %v5796_v53  ;;  %v6229_v1 = vadd.f32 %v6180_v26, %v5795_v56  ;;  %v11301_v26 = vld [vmem:[#allocation11_spill] sm:$0xff]  ;;  %v11306_v53 = vld [vmem:[#allocation16_spill] sm:$0xff] }
 0x3b8   :  { %v7971_v46 = vpop.f32.mrf.mxu1  ;;  %v11314_v8 = vld [vmem:[#allocation19_spill] sm:$0xff] }
 0x3b9   :  { %v10717_v49 = vadd.f32 %v7971_v46, %v6226_v27  ;;  %v5798_v40 = vadd.f32 %v11292_v16, %v5588_v11  ;;  %v5302_v46 = vadd.f32 %v11295_v15, %v4868_v18  ;;  %v7963_v22 = vpop.f32.mrf.mxu0  ;;  %v11303_v27 = vld [vmem:[#allocation35_spill] sm:$0xff] }
 0x3ba   :  { %v6451_v47 = vpop.f32.mrf.mxu1  ;;  %v11316_v15 = vld [vmem:[#allocation15_spill] sm:$0xff] }
 0x3bb   :  { %v10711_v48 = vadd.f32 %v6451_v47, %v6224_v30  ;;  %v6533_v33 = vsel %vm11291_vm8, %v10717_v49, 0.0  ;;  %v6231_v47 = vadd.f32 %v10681_v17, %v5797_v7  ;;  %v11300_v30 = vld [vmem:[#allocation22_spill] sm:$0xff]  ;;  %v6232_v17 = vadd.f32 %v6193_v19, %v5798_v40  ;;  %v6209_v18 = vpop.f32.mrf.mxu0  ;;  %vm11328_vm8 = vmmov %vm11209_vm0 }
 0x3bc   :  { %v7972_v57 = vpop.f32.mrf.mxu1  ;;  %v4869_v13 = vadd.f32 %v11301_v26, %v11300_v30 }
 0x3bd   :  { %v6530_v59 = vsel %vm11289_vm12, %v10711_v48, 0.0  ;;  %v10728_v14 = vadd.f32 %v7972_v57, %v6227_v12  ;;  %v11302_v57 = vld [vmem:[#allocation36_spill] sm:$0xff]  ;;  %vm11326_vm12 = vmmov %vm11209_vm0 }
 0x3be   :  { %v6454_v60 = vpop.f32.mrf.mxu1  ;;  %v5800_v10 = vadd.f32 %v11302_v57, %v5590_v4 }
 0x3bf   :  { %v10719_v54 = vadd.f32 %v6454_v60, %v6225_v41  ;;  %v6535_v63 = vsel %vm11293_vm1, %v10728_v14, 0.0  ;;  %v5591_v41 = vadd.f32 %v11303_v27, %v5301_v31  ;;  %v11304_v60 = vld [vmem:[#allocation24_spill] sm:$0xff]  ;;  %vm11329_vm1 = vmmov %vm11209_vm0 }
 0x3c0   :  { %v7975_v36 = vpop.f32.mrf.mxu1  ;;  %v5799_v37 = vadd.f32 %v11304_v60, %v5589_v34  ;;  %v6234_v40 = vadd.f32 %v10702_v6, %v5800_v10 }
 0x3c1   :  { %v6531_v2 = vsel %vm11290_vm7, %v10719_v54, 0.0  ;;  %v10752_v25 = vadd.f32 %v7975_v36, %v6230_v35  ;;  %v4871_v36 = vadd.f32 %v11307_v51, %v11306_v53  ;;  %v5801_v32 = vadd.f32 %v11309_v21, %v5591_v41  ;;  %v11315_v35 = vld [vmem:[#allocation21_spill] sm:$0xff]  ;;  %vm11327_vm7 = vmmov %vm11209_vm0 }
 0x3c2   :  { %v6532_v20 = vadd.f32 %v6531_v2, %v6530_v59  ;;  %v6467_v3 = vpop.f32.mrf.mxu1 }
 0x3c3   :  { %v10739_v39 = vadd.f32 %v6467_v3, %v6228_v44  ;;  %v11308_v44 = vld [vmem:[#allocation30_spill] sm:$0xff]  ;;  %v6541_v7 = vsel %vm11311_vm4, %v10752_v25, 0.0  ;;  %v6235_v34 = vadd.f32 %v10723_v5, %v5801_v32  ;;  %vm11332_vm4 = vmmov %vm11209_vm0 }
 0x3c4   :  { %v6534_v43 = vadd.f32 %v6533_v33, %v6532_v20  ;;  %v7976_v9 = vpop.f32.mrf.mxu1  ;;  %v5303_v56 = vadd.f32 %v11308_v44, %v4869_v13  ;;  %v11310_v20 = vld [vmem:[#allocation27_spill] sm:$0xff]  ;;  %v11312_v33 = vld [vmem:[#allocation12_spill] sm:$0xff] }
 0x3c5   :  { %v6537_v23 = vsel %vm11299_vm2, %v10739_v39, 0.0  ;;  %v10764_v12 = vadd.f32 %v7976_v9, %v6231_v47  ;;  %v5592_v3 = vadd.f32 %v11310_v20, %v5302_v46  ;;  %v5305_v31 = vadd.f32 %v11312_v33, %v4871_v36  ;;  %v11319_v47 = vld [vmem:[#allocation13_spill] sm:$0xff]  ;;  %vm11330_vm2 = vmmov %vm11209_vm0 }
 0x3c6   :  { %v6536_v52 = vadd.f32 %v6535_v63, %v6534_v43  ;;  %v6470_v42 = vpop.f32.mrf.mxu1  ;;  %v6233_v63 = vadd.f32 %v6196_v45, %v5799_v37  ;;  %v5593_v46 = vadd.f32 %v11316_v15, %v5303_v56 }
 0x3c7   :  { %v10757_v38 = vadd.f32 %v6470_v42, %v6229_v1  ;;  %v5802_v9 = vadd.f32 %v10687_v50, %v5592_v3  ;;  %v6543_v16 = vsel %vm11313_vm9, %v10764_v12, 0.0  ;;  %v5594_v1 = vadd.f32 %v11315_v35, %v11314_v8  ;;  %v11318_v42 = vld [vmem:[#allocation31_spill] sm:$0xff]  ;;  %vm11333_vm9 = vmmov %vm11209_vm0 }
 0x3c8   :  { %v6538_v24 = vadd.f32 %v6537_v23, %v6536_v52  ;;  %v7979_v28 = vpop.f32.mrf.mxu1  ;;  %v7964_v52 = vpop.f32.mrf.mxu0  ;;  %v5595_v6 = vadd.f32 %v11319_v47, %v5305_v31  ;;  %v5803_v26 = vadd.f32 %v10696_v55, %v5593_v46 }
 0x3c9   :  { %v6539_v61 = vsel %vm11305_vm3, %v10757_v38, 0.0  ;;  %v6524_v4 = vadd.f32 %v7979_v28, %v6234_v40  ;;  %v5804_v23 = vadd.f32 %v11318_v42, %v5594_v1  ;;  %v6236_v10 = vadd.f32 %v6209_v18, %v5802_v9  ;;  %vm11331_vm3 = vmmov %vm11209_vm0 }
 0x3ca   :  { %v6540_v59 = vadd.f32 %v6539_v61, %v6538_v24  ;;  %v6483_v2 = vpop.f32.mrf.mxu1  ;;  %v5805_v24 = vadd.f32 %v10693_v29, %v5595_v6  ;;  %v6212_v60 = vpop.f32.mrf.mxu0 }
 0x3cb   :  { %v10775_v11 = vadd.f32 %v6483_v2, %v6232_v17  ;;  %v6549_v5 = vsel %vm11321_vm11, %v6524_v4, 0.0  ;;  %v6238_v53 = vadd.f32 %v7963_v22, %v5804_v23  ;;  %v6237_v51 = vadd.f32 %v6212_v60, %v5803_v26  ;;  %vm11336_vm11 = vmmov %vm11209_vm0 }
 0x3cc   :  { %v6542_v19 = vadd.f32 %v6541_v7, %v6540_v59  ;;  %v7980_v43 = vpop.f32.mrf.mxu1  ;;  %v6239_v59 = vadd.f32 %v7964_v52, %v5805_v24 }
 0x3cd   :  { %v6545_v62 = vsel %vm11317_vm5, %v10775_v11, 0.0  ;;  %v6525_v13 = vadd.f32 %v7980_v43, %v6235_v34  ;;  %vm11334_vm5 = vmmov %vm11209_vm0 }
 0x3ce   :  { %v6544_v58 = vadd.f32 %v6543_v16, %v6542_v19  ;;  %v6486_v0 = vpop.f32.mrf.mxu1 }
 0x3cf   :  { %v6523_v50 = vadd.f32 %v6486_v0, %v6233_v63  ;;  %v6551_v17 = vsel %vm11322_vm13, %v6525_v13, 0.0  ;;  %vm11337_vm13 = vmmov %vm11209_vm0 }
 0x3d0   :  { %v6546_v45 = vadd.f32 %v6545_v62, %v6544_v58  ;;  %v7983_v30 = vpop.f32.mrf.mxu1 }
 0x3d1   :  { %v6547_v57 = vsel %vm11320_vm10, %v6523_v50, 0.0  ;;  %v6528_v44 = vadd.f32 %v7983_v30, %v6238_v53  ;;  %vm11335_vm10 = vmmov %vm11209_vm0 }
 0x3d2   :  { %v6548_v27 = vadd.f32 %v6547_v57, %v6546_v45  ;;  %v6499_v41 = vpop.f32.mrf.mxu1 }
 0x3d3   :  { %v6526_v28 = vadd.f32 %v6499_v41, %v6236_v10  ;;  %v6557_v3 = vsel %vm11209_vm0, %v6528_v44, 0.0 }
 0x3d4   :  { %v6550_v37 = vadd.f32 %v6549_v5, %v6548_v27  ;;  %v7984_v61 = vpop.f32.mrf.mxu1 }
 0x3d5   :  { %v6553_v56 = vsel %vm11323_vm14, %v6526_v28, 0.0  ;;  %v6529_v32 = vadd.f32 %v7984_v61, %v6239_v59  ;;  %vm11338_vm14 = vmmov %vm11209_vm0 }
 0x3d6   :  { %v6552_v36 = vadd.f32 %v6551_v17, %v6550_v37  ;;  %v6502_v55 = vpop.f32.mrf.mxu1 }
 0x3d7   :  { %v6527_v2 = vadd.f32 %v6502_v55, %v6237_v51  ;;  %v6559_v33 = vsel %vm11325_vm6, %v6529_v32, 0.0  ;;  %vm11340_vm6 = vmmov %vm11209_vm0 }
 0x3d8   :  { %v6554_v21 = vadd.f32 %v6553_v56, %v6552_v36 }
 0x3d9   :  { %v6555_v29 = vsel %vm11324_vm15, %v6527_v2, 0.0  ;;  %vm11339_vm15 = vmmov %vm11209_vm0 }
 0x3da   :  { %v6556_v20 = vadd.f32 %v6555_v29, %v6554_v21 }
 0x3dc   :  { %v6558_v7 = vadd.f32 %v6557_v3, %v6556_v20 }
 0x3de   :  { %v6560_v31 = vadd.f32 %v6559_v33, %v6558_v7 }
 0x3e0   :  { %v6561_v22 = vrot.slane %v6560_v31, 4 }
 0x3e2   :  { %v6562_v18 = vadd.f32 %v6561_v22, %v6560_v31 }
 0x3e4   :  { %v6563_v19 = vrot.slane %v6562_v18, 2 }
 0x3e6   :  { %v6564_v43 = vadd.f32 %v6563_v19, %v6562_v18 }
 0x3e8   :  { %v6565_v9 = vrot.slane %v6564_v43, 1 }
 0x3ea   :  { %v6566_v16 = vadd.f32 %v6565_v9, %v6564_v43 }
 0x3ec   :  { %v6567_v40 = vmul.f32 0.0078125, %v6566_v16 }
 0x3ee   :  { %v10800_v63 = vsub.f32 %v10711_v48, %v6567_v40  ;;  %v10803_v8 = vsub.f32 %v10719_v54, %v6567_v40  ;;  %v10806_v35 = vsub.f32 %v10717_v49, %v6567_v40  ;;  %v10809_v1 = vsub.f32 %v10728_v14, %v6567_v40 }
 0x3ef   :  { %v10812_v15 = vsub.f32 %v10739_v39, %v6567_v40  ;;  %v10815_v46 = vsub.f32 %v10757_v38, %v6567_v40  ;;  %v10818_v58 = vsub.f32 %v10752_v25, %v6567_v40  ;;  %v10821_v48 = vsub.f32 %v10764_v12, %v6567_v40 }
 0x3f0   :  { %v10824_v54 = vsub.f32 %v10775_v11, %v6567_v40  ;;  %v10826_v49 = vsub.f32 %v6523_v50, %v6567_v40  ;;  %v10828_v0 = vsub.f32 %v6524_v4, %v6567_v40  ;;  %v10830_v14 = vsub.f32 %v6525_v13, %v6567_v40 }
 0x3f1   :  { %v10832_v39 = vsub.f32 %v6526_v28, %v6567_v40  ;;  %v10834_v62 = vsub.f32 %v6527_v2, %v6567_v40  ;;  %v10836_v38 = vsub.f32 %v6528_v44, %v6567_v40  ;;  %v10838_v25 = vsub.f32 %v6529_v32, %v6567_v40 }
 0x3f2   :  { %v6584_v12 = vmul.f32 %v10800_v63, %v10800_v63  ;;  %v6585_v11 = vmul.f32 %v10803_v8, %v10803_v8  ;;  %v6586_v4 = vmul.f32 %v10806_v35, %v10806_v35  ;;  %v6587_v34 = vmul.f32 %v10809_v1, %v10809_v1 }
 0x3f3   :  { %v6588_v23 = vmul.f32 %v10812_v15, %v10812_v15  ;;  %v6589_v45 = vmul.f32 %v10815_v46, %v10815_v46  ;;  %v6590_v13 = vmul.f32 %v10818_v58, %v10818_v58  ;;  %v6591_v27 = vmul.f32 %v10821_v48, %v10821_v48 }
 0x3f4   :  { %v6600_v50 = vsel %vm11326_vm12, %v6584_v12, 0.0  ;;  %v6601_v52 = vsel %vm11327_vm7, %v6585_v11, 0.0  ;;  %v6603_v47 = vsel %vm11328_vm8, %v6586_v4, 0.0  ;;  %v6605_v30 = vsel %vm11329_vm1, %v6587_v34, 0.0 }
 0x3f5   :  { %v6602_v42 = vadd.f32 %v6601_v52, %v6600_v50  ;;  %v6607_v57 = vsel %vm11330_vm2, %v6588_v23, 0.0  ;;  %v6609_v41 = vsel %vm11331_vm3, %v6589_v45, 0.0  ;;  %v6592_v5 = vmul.f32 %v10824_v54, %v10824_v54  ;;  %v6638_v23 = vld [vmem:[%s11090_s5] sm:$0x1] }
 0x3f6   :  { %v6611_v28 = vsel %vm11332_vm4, %v6590_v13, 0.0  ;;  %v6593_v37 = vmul.f32 %v10826_v49, %v10826_v49  ;;  %v6613_v61 = vsel %vm11333_vm9, %v6591_v27, 0.0  ;;  %v6594_v53 = vmul.f32 %v10828_v0, %v10828_v0  ;;  %v11341_v45 = vld [vmem:[#allocation10_spill] sm:$0xff] }
 0x3f7   :  { %v6604_v6 = vadd.f32 %v6603_v47, %v6602_v42  ;;  %v6615_v51 = vsel %vm11334_vm5, %v6592_v5, 0.0  ;;  %v6595_v55 = vmul.f32 %v10830_v14, %v10830_v14  ;;  %v6596_v59 = vmul.f32 %v10832_v39, %v10832_v39 }
 0x3f8   :  { %v6617_v44 = vsel %vm11335_vm10, %v6593_v37, 0.0  ;;  %v6619_v2 = vsel %vm11336_vm11, %v6594_v53, 0.0  ;;  %v6597_v32 = vmul.f32 %v10834_v62, %v10834_v62  ;;  %v6598_v3 = vmul.f32 %v10836_v38, %v10836_v38 }
 0x3f9   :  { %v6606_v26 = vadd.f32 %v6605_v30, %v6604_v6  ;;  %v6621_v29 = vsel %vm11337_vm13, %v6595_v55, 0.0  ;;  %v6623_v7 = vsel %vm11338_vm14, %v6596_v59, 0.0  ;;  %v6599_v31 = vmul.f32 %v10838_v25, %v10838_v25  ;;  %v8145_v55 = vld [vmem:[%s11085_s0 + $0x18] sm:$0xff]  ;;  %v8146_v59 = vld [vmem:[%s11085_s0 + $0x20] sm:$0xff] }
 0x3fa   :  { %v6625_v22 = vsel %vm11339_vm15, %v6597_v32, 0.0  ;;  %v6627_v19 = vsel %vm11209_vm0, %v6598_v3, 0.0  ;;  %v11342_v30 = vsub.s32 0, %v11341_v45  ;;  %v8147_v32 = vld [vmem:[%s11085_s0 + $0x28] sm:$0xff]  ;;  %vm11343_vm15 = vmmov %vm11209_vm0 }
 0x3fb   :  { %v6608_v10 = vadd.f32 %v6607_v57, %v6606_v26  ;;  %v6629_v9 = vsel %vm11340_vm6, %v6599_v31, 0.0  ;;  %vm11344_vm6 = vmmov %vm11209_vm0 }
 0x3fd   :  { %v6610_v24 = vadd.f32 %v6609_v41, %v6608_v10 }
 0x3ff   :  { %v6612_v60 = vadd.f32 %v6611_v28, %v6610_v24 }
 0x401   :  { %v6614_v17 = vadd.f32 %v6613_v61, %v6612_v60  ;;  %v7396_v60 = vld [vmem:[%s11091_s6] ss:$0 sm:$0xff] }
 0x403   :  { %v6616_v36 = vadd.f32 %v6615_v51, %v6614_v17 }
 0x405   :  { %v6618_v56 = vadd.f32 %v6617_v44, %v6616_v36 }
 0x407   :  { %v6620_v21 = vadd.f32 %v6619_v2, %v6618_v56 }
 0x409   :  { %v6622_v20 = vadd.f32 %v6621_v29, %v6620_v21 }
 0x40b   :  { %v6624_v33 = vadd.f32 %v6623_v7, %v6622_v20  ;;  %v8148_v20 = vld [vmem:[%s11085_s0 + $0x30] sm:$0xff] }
 0x40d   :  { %v6626_v18 = vadd.f32 %v6625_v22, %v6624_v33 }
 0x40f   :  { %v6628_v43 = vadd.f32 %v6627_v19, %v6626_v18  ;;  %v8149_v19 = vld [vmem:[%s11085_s0 + $0x38] sm:$0xff] }
 0x411   :  { %v6630_v16 = vadd.f32 %v6629_v9, %v6628_v43 }
 0x413   :  { %v6631_v40 = vrot.slane %v6630_v16, 4 }
 0x415   :  { %v6632_v12 = vadd.f32 %v6631_v40, %v6630_v16 }
 0x417   :  { %v6633_v11 = vrot.slane %v6632_v12, 2 }
 0x419   :  { %v6634_v4 = vadd.f32 %v6633_v11, %v6632_v12  ;;  %v8150_v12 = vld [vmem:[%s11085_s0 + $0x40] sm:$0xff] }
 0x41b   :  { %v6635_v34 = vrot.slane %v6634_v4, 1 }
 0x41d   :  { %v6636_v50 = vadd.f32 %v6635_v34, %v6634_v4 }
 0x41f   :  { %v6637_v52 = vmul.f32 0.0078125, %v6636_v50  ;;  %v8151_v50 = vld [vmem:[%s11085_s0 + $0x48] sm:$0xff] }
 0x421   :  { %v6639_v42 = vadd.f32 1e-05, %v6637_v52 }
 0x423   :  { %8106 = vrsqrt.f32 %v6639_v42 }
 0x430   :  { %v8107_v47 = vpop.eup %8106 }
 0x431   :  { %v6641_v6 = vmul.f32 %v8107_v47, %v6638_v23  ;;  %v8152_v47 = vld [vmem:[%s11085_s0 + $0x50] sm:$0xff] }
 0x433   :  { %v6646_v26 = vrot.slane %v6641_v6, %v11342_v30 }
 0x435   :  { %v6648_v13 = vmul.f32 %v6646_v26, %v10800_v63  ;;  %v6649_v57 = vmul.f32 %v6646_v26, %v10803_v8  ;;  %v6650_v10 = vmul.f32 %v6646_v26, %v10806_v35  ;;  %v6651_v27 = vmul.f32 %v6646_v26, %v10809_v1 }
 0x436   :  { %v6652_v41 = vmul.f32 %v6646_v26, %v10812_v15  ;;  %v6653_v24 = vmul.f32 %v6646_v26, %v10815_v46  ;;  %v6654_v5 = vmul.f32 %v6646_v26, %v10818_v58  ;;  %v6655_v28 = vmul.f32 %v6646_v26, %v10821_v48 }
 0x437   :  { %v6656_v63 = vmul.f32 %v6646_v26, %v10824_v54  ;;  %v6657_v8 = vmul.f32 %v6646_v26, %v10826_v49  ;;  %v6658_v35 = vmul.f32 %v6646_v26, %v10828_v0  ;;  %v6659_v1 = vmul.f32 %v6646_v26, %v10830_v14  ;;  %v8142_v49 = vld [vmem:[%s11085_s0] sm:$0xff]  ;;  %v8143_v14 = vld [vmem:[%s11085_s0 + $0x8] sm:$0xff] }
 0x438   :  { %v6660_v15 = vmul.f32 %v6646_v26, %v10832_v39  ;;  %v6661_v46 = vmul.f32 %v6646_v26, %v10834_v62  ;;  %v6662_v58 = vmul.f32 %v6646_v26, %v10836_v38  ;;  %v6663_v48 = vmul.f32 %v6646_v26, %v10838_v25  ;;  %v8144_v62 = vld [vmem:[%s11085_s0 + $0x10] sm:$0xff] }
 0x439   :  { %v6671_v37 = vadd.f32 %v7396_v60, %v6648_v13  ;;  %v6672_v61 = vadd.f32 %v7396_v60, %v6649_v57  ;;  %v6673_v17 = vadd.f32 %v7396_v60, %v6650_v10  ;;  %v6674_v53 = vadd.f32 %v7396_v60, %v6651_v27  ;;  %v8153_v57 = vld [vmem:[%s11085_s0 + $0x58] sm:$0xff] }
 0x43a   :  { %v6675_v51 = vadd.f32 %v7396_v60, %v6652_v41  ;;  %v6676_v54 = vadd.f32 %v7396_v60, %v6653_v24  ;;  %v6677_v36 = vadd.f32 %v7396_v60, %v6654_v5  ;;  %v6678_v25 = vadd.f32 %v7396_v60, %v6655_v28  ;;  %v8154_v24 = vld [vmem:[%s11085_s0 + $0x60] sm:$0xff] }
 0x43b   :  { %v10915_v0 = vadd.f32 %v8142_v49, %v6671_v37  ;;  %v10920_v39 = vadd.f32 %v8143_v14, %v6672_v61  ;;  %v10925_v38 = vadd.f32 %v8144_v62, %v6673_v17  ;;  %v10930_v44 = vadd.f32 %v8145_v55, %v6674_v53  ;;  %v8157_v37 = vld [vmem:[%s11085_s0 + $0x78] sm:$0xff] }
 0x43c   :  { %v6679_v56 = vadd.f32 %v7396_v60, %v6656_v63  ;;  %v10935_v2 = vadd.f32 %v8146_v59, %v6675_v51  ;;  %v6680_v21 = vadd.f32 %v7396_v60, %v6657_v8  ;;  %v10940_v29 = vadd.f32 %v8147_v32, %v6676_v54 }
 0x43d   :  { %v10945_v3 = vadd.f32 %v8148_v20, %v6677_v36  ;;  %v6681_v7 = vadd.f32 %v7396_v60, %v6658_v35  ;;  %v6703_v33 = vmin.f32 %v10915_v0, 0.0  ;;  %v6704_v31 = vmin.f32 %v10920_v39, 0.0 }
 0x43e   :  { %v6705_v22 = vmin.f32 %v10925_v38, 0.0  ;;  %v6682_v18 = vadd.f32 %v7396_v60, %v6659_v1  ;;  %v10953_v43 = vadd.f32 %v8149_v19, %v6678_v25  ;;  %v6706_v9 = vmin.f32 %v10930_v44, 0.0 }
 0x43f   :  { %v6683_v16 = vadd.f32 %v7396_v60, %v6660_v15  ;;  %v6684_v40 = vadd.f32 %v7396_v60, %v6661_v46  ;;  %v10959_v11 = vadd.f32 %v8150_v12, %v6679_v56  ;;  %v6707_v4 = vmin.f32 %v10935_v2, 0.0  ;;  %v8156_v15 = vld [vmem:[%s11085_s0 + $0x70] sm:$0xff] }
 0x440   :  { %v6685_v34 = vadd.f32 %v7396_v60, %v6662_v58  ;;  %v10965_v52 = vadd.f32 %v8151_v50, %v6680_v21  ;;  %v6708_v42 = vmin.f32 %v10940_v29, 0.0  ;;  %v6709_v23 = vmin.f32 %v10945_v3, 0.0 }
 0x441   :  { %v10972_v6 = vadd.f32 %v8152_v47, %v6681_v7  ;;  %v6719_v45 = vmul.f32 1.442695, %v6703_v33  ;;  %v6721_v30 = vmul.f32 1.442695, %v6704_v31  ;;  %v6723_v26 = vmul.f32 1.442695, %v6705_v22 }
 0x442   :  { %v6686_v13 = vadd.f32 %v7396_v60, %v6663_v48  ;;  %v10977_v10 = vadd.f32 %v8153_v57, %v6682_v18  ;;  %v6710_v27 = vmin.f32 %v10953_v43, 0.0  ;;  %v6725_v41 = vmul.f32 1.442695, %v6706_v9  ;;  %v8155_v60 = vld [vmem:[%s11085_s0 + $0x68] sm:$0xff]  ;;  %s8181_s0 = smov [#allocation3]  }
 0x443   :  { %v10983_v5 = vadd.f32 %v8154_v24, %v6683_v16  ;;  %v6711_v28 = vmin.f32 %v10959_v11, 0.0  ;;  %8108 = vpow2.f32 %v6719_v45  ;;  %v6727_v63 = vmul.f32 1.442695, %v6707_v4  ;;  %s6852_s17 = sshll.u32 %s8181_s0, 4  ;;  %s6853_s17 = int_to_ptr.vmem [resolvable:$true] %s6852_s17 }
 0x444   :  { %v10989_v8 = vadd.f32 %v8155_v60, %v6684_v40  ;;  %v6712_v35 = vmin.f32 %v10965_v52, 0.0  ;;  %8110 = vpow2.f32 %v6721_v30  ;;  %v6729_v1 = vmul.f32 1.442695, %v6708_v42  ;;  %s8158_s18 = scalar_lea.vmem %s6853_s17, 2048  ;;  %p8163_p1 = scmp.lt.s32.totalorder %s6853_s17, %s6853_s17 }
 0x445   :  { %v10995_v46 = vadd.f32 %v8156_v15, %v6685_v34  ;;  %v6713_v58 = vmin.f32 %v10972_v6, 0.0  ;;  %8112 = vpow2.f32 %v6723_v26  ;;  %v6731_v48 = vmul.f32 1.442695, %v6709_v23  ;;  %p8159_p0 = scmp.ne.s32.totalorder %s6853_s17, %s8158_s18  ;;  %p8164_p2 = scmp.lt.s32.totalorder %s8158_s18, %s8158_s18 }
 0x446   :  { %v11001_v61 = vadd.f32 %v8157_v37, %v6686_v13  ;;  %v6714_v17 = vmin.f32 %v10977_v10, 0.0  ;;  %8114 = vpow2.f32 %v6725_v41  ;;  %v6733_v53 = vmul.f32 1.442695, %v6710_v27 }
 0x447   :  { %v6715_v51 = vmin.f32 %v10983_v5, 0.0  ;;  %8116 = vpow2.f32 %v6727_v63  ;;  %v6735_v54 = vmul.f32 1.442695, %v6711_v28  ;;  %v6716_v36 = vmin.f32 %v10989_v8, 0.0  ;;  %p8165_p3 = por %p8164_p2, %p8163_p1 }
 0x448   :  { %8118 = vpow2.f32 %v6729_v1  ;;  %v6737_v49 = vmul.f32 1.442695, %v6712_v35  ;;  %v6717_v14 = vmin.f32 %v10995_v46, 0.0  ;;  %v6739_v62 = vmul.f32 1.442695, %v6713_v58 }
 0x449   :  { %8120 = vpow2.f32 %v6731_v48  ;;  %v6718_v25 = vmin.f32 %v11001_v61, 0.0  ;;  %v6741_v55 = vmul.f32 1.442695, %v6714_v17  ;;  %v6743_v56 = vmul.f32 1.442695, %v6715_v51  ;;  %p8166_p4 = pnand %p8165_p3, %p8159_p0 }
 0x44a   :  { %8122 = vpow2.f32 %v6733_v53  ;;  %v6745_v59 = vmul.f32 1.442695, %v6716_v36  ;;  %v6747_v21 = vmul.f32 1.442695, %v6717_v14  ;;  %vm6783_vm12 = vcmp.gt.f32.partialorder %v10915_v0, 0.0 }
 0x44b   :  { %8124 = vpow2.f32 %v6735_v54  ;;  %v6749_v32 = vmul.f32 1.442695, %v6718_v25  ;;  %vm6784_vm7 = vcmp.gt.f32.partialorder %v10920_v39, 0.0  ;;  %vm6785_vm8 = vcmp.gt.f32.partialorder %v10925_v38, 0.0 }
 0x44c   :  { %8126 = vpow2.f32 %v6737_v49  ;;  %vm6786_vm1 = vcmp.gt.f32.partialorder %v10930_v44, 0.0  ;;  %vm6787_vm2 = vcmp.gt.f32.partialorder %v10935_v2, 0.0  ;;  %vm6788_vm3 = vcmp.gt.f32.partialorder %v10940_v29, 0.0 }
 0x44d   :  { %8128 = vpow2.f32 %v6739_v62  ;;  %vm6789_vm4 = vcmp.gt.f32.partialorder %v10945_v3, 0.0  ;;  %vm6790_vm9 = vcmp.gt.f32.partialorder %v10953_v43, 0.0  ;;  %vm6791_vm5 = vcmp.gt.f32.partialorder %v10959_v11, 0.0 }
 0x44e   :  { %8130 = vpow2.f32 %v6741_v55  ;;  %vm6792_vm10 = vcmp.gt.f32.partialorder %v10965_v52, 0.0  ;;  %vm6793_vm11 = vcmp.gt.f32.partialorder %v10972_v6, 0.0  ;;  %vm6794_vm13 = vcmp.gt.f32.partialorder %v10977_v10, 0.0 }
 0x44f   :  { %8132 = vpow2.f32 %v6743_v56  ;;  %vm6795_vm14 = vcmp.gt.f32.partialorder %v10983_v5, 0.0 }
 0x450   :  { %v8109_v20 = vpop.eup %8108  ;;  %8134 = vpow2.f32 %v6745_v59 }
 0x451   :  { %v8111_v7 = vpop.eup %8110  ;;  %8136 = vpow2.f32 %v6747_v21  ;;  %v7397_v33 = vadd.f32 -1.0, %v8109_v20 }
 0x452   :  { %v8113_v31 = vpop.eup %8112  ;;  %8138 = vpow2.f32 %v6749_v32  ;;  %v7398_v22 = vadd.f32 -1.0, %v8111_v7 }
 0x453   :  { %v8115_v18 = vpop.eup %8114  ;;  %v7399_v19 = vadd.f32 -1.0, %v8113_v31  ;;  %v6767_v9 = vmul.f32 1.6732632, %v7397_v33 }
 0x454   :  { %v8117_v16 = vpop.eup %8116  ;;  %v7400_v40 = vadd.f32 -1.0, %v8115_v18  ;;  %v6768_v12 = vmul.f32 1.6732632, %v7398_v22 }
 0x455   :  { %v8119_v4 = vpop.eup %8118  ;;  %v7401_v34 = vadd.f32 -1.0, %v8117_v16  ;;  %v6769_v50 = vmul.f32 1.6732632, %v7399_v19  ;;  %v6799_v42 = vsel %vm6783_vm12, %v10915_v0, %v6767_v9  ;;  %vm11345_vm12 = vmmov %vm11209_vm0 }
 0x456   :  { %v8121_v23 = vpop.eup %8120  ;;  %v7402_v47 = vadd.f32 -1.0, %v8119_v4  ;;  %v6770_v45 = vmul.f32 1.6732632, %v7400_v40  ;;  %v6800_v30 = vsel %vm6784_vm7, %v10920_v39, %v6768_v12  ;;  %v6815_v26 = vmul.f32 1.050701, %v6799_v42  ;;  %vm11346_vm7 = vmmov %vm11209_vm0 }
 0x457   :  { %v8123_v13 = vpop.eup %8122  ;;  %v7403_v57 = vadd.f32 -1.0, %v8121_v23  ;;  %v6771_v27 = vmul.f32 1.6732632, %v7401_v34  ;;  %v6801_v41 = vsel %vm6785_vm8, %v10925_v38, %v6769_v50  ;;  %v6816_v0 = vmul.f32 1.050701, %v6800_v30  ;;  %vm11347_vm8 = vmmov %vm11209_vm0 }
 0x458   :  { %v8125_v24 = vpop.eup %8124  ;;  %v7404_v28 = vadd.f32 -1.0, %v8123_v13  ;;  %v6772_v63 = vmul.f32 1.6732632, %v7402_v47  ;;  %v6802_v39 = vsel %vm6786_vm1, %v10930_v44, %v6770_v45  ;;  %v6817_v60 = vmul.f32 1.050701, %v6801_v41  ;;  %6831 = vst.msk [vmem:[#allocation3] sm:$0xff] %vm11343_vm15, %v6815_v26  ;;  %vm11348_vm1 = vmmov %vm11209_vm0 }
 0x459   :  { %v8127_v35 = vpop.eup %8126  ;;  %v7405_v1 = vadd.f32 -1.0, %v8125_v24  ;;  %v6773_v15 = vmul.f32 1.6732632, %v7403_v57  ;;  %v6803_v38 = vsel %vm6787_vm2, %v10935_v2, %v6771_v27  ;;  %v6818_v58 = vmul.f32 1.050701, %v6802_v39  ;;  %6832 = vst.msk [vmem:[#allocation3 + $0x8] sm:$0xff] %vm11209_vm0, %v6816_v0  ;;  %vm11349_vm2 = vmmov %vm11209_vm0 }
 0x45a   :  { %v8129_v48 = vpop.eup %8128  ;;  %v7406_v37 = vadd.f32 -1.0, %v8127_v35  ;;  %v6774_v17 = vmul.f32 1.6732632, %v7404_v28  ;;  %v6804_v44 = vsel %vm6788_vm3, %v10940_v29, %v6772_v63  ;;  %v6819_v53 = vmul.f32 1.050701, %v6803_v38  ;;  %6833 = vst.msk [vmem:[#allocation3 + $0x10] sm:$0xff] %vm11344_vm6, %v6817_v60  ;;  %vm11350_vm3 = vmmov %vm11209_vm0 }
 0x45b   :  { %v8131_v51 = vpop.eup %8130  ;;  %v7407_v54 = vadd.f32 -1.0, %v8129_v48  ;;  %v6775_v36 = vmul.f32 1.6732632, %v7405_v1  ;;  %v6805_v2 = vsel %vm6789_vm4, %v10945_v3, %v6773_v15  ;;  %v6820_v49 = vmul.f32 1.050701, %v6804_v44  ;;  %6834 = vst.msk [vmem:[#allocation3 + $0x18] sm:$0xff] %vm11345_vm12, %v6818_v58  ;;  %vm11355_vm15 = vmmov %vm11209_vm0 }
 0x45c   :  { %v8133_v14 = vpop.eup %8132  ;;  %v7408_v62 = vadd.f32 -1.0, %v8131_v51  ;;  %v6776_v25 = vmul.f32 1.6732632, %v7406_v37  ;;  %v6806_v29 = vsel %vm6790_vm9, %v10953_v43, %v6774_v17  ;;  %v6821_v55 = vmul.f32 1.050701, %v6805_v2  ;;  %6835 = vst.msk [vmem:[#allocation3 + $0x20] sm:$0xff] %vm11346_vm7, %v6819_v53  ;;  %vm11351_vm9 = vmmov %vm11209_vm0 }
 0x45d   :  { %v8135_v56 = vpop.eup %8134  ;;  %v7409_v59 = vadd.f32 -1.0, %v8133_v14  ;;  %v6777_v21 = vmul.f32 1.6732632, %v7407_v54  ;;  %v6807_v3 = vsel %vm6791_vm5, %v10959_v11, %v6775_v36  ;;  %v6822_v32 = vmul.f32 1.050701, %v6806_v29  ;;  %6836 = vst.msk [vmem:[#allocation3 + $0x28] sm:$0xff] %vm11347_vm8, %v6820_v49  ;;  %vm11356_vm6 = vmmov %vm11209_vm0 }
 0x45e   :  { %v8137_v20 = vpop.eup %8136  ;;  %v7410_v7 = vadd.f32 -1.0, %v8135_v56  ;;  %v6778_v33 = vmul.f32 1.6732632, %v7408_v62  ;;  %v6808_v43 = vsel %vm6792_vm10, %v10965_v52, %v6776_v25  ;;  %v6823_v31 = vmul.f32 1.050701, %v6807_v3  ;;  %6837 = vst.msk [vmem:[#allocation3 + $0x30] sm:$0xff] %vm11348_vm1, %v6821_v55  ;;  %vm11352_vm10 = vmmov %vm11209_vm0 }
 0x45f   :  { %v8139_v22 = vpop.eup %8138  ;;  %v7411_v18 = vadd.f32 -1.0, %v8137_v20  ;;  %v6779_v19 = vmul.f32 1.6732632, %v7409_v59  ;;  %v6809_v11 = vsel %vm6793_vm11, %v10972_v6, %v6777_v21  ;;  %v6824_v9 = vmul.f32 1.050701, %v6808_v43  ;;  %6838 = vst.msk [vmem:[#allocation3 + $0x38] sm:$0xff] %vm11349_vm2, %v6822_v32 }
 0x460   :  { %v7412_v16 = vadd.f32 -1.0, %v8139_v22  ;;  %v6780_v40 = vmul.f32 1.6732632, %v7410_v7  ;;  %v6810_v12 = vsel %vm6794_vm13, %v10977_v10, %v6778_v33  ;;  %v6825_v52 = vmul.f32 1.050701, %v6809_v11  ;;  %6839 = vst.msk [vmem:[#allocation3 + $0x40] sm:$0xff] %vm11350_vm3, %v6823_v31  ;;  %vm11353_vm13 = vmmov %vm11209_vm0 }
 0x461   :  { %v6781_v4 = vmul.f32 1.6732632, %v7411_v18  ;;  %vm6796_vm4 = vcmp.gt.f32.partialorder %v10989_v8, 0.0  ;;  %v6811_v34 = vsel %vm6795_vm14, %v10983_v5, %v6779_v19  ;;  %v6826_v6 = vmul.f32 1.050701, %v6810_v12  ;;  %6840 = vst.msk [vmem:[#allocation3 + $0x48] sm:$0xff] %vm11351_vm9, %v6824_v9  ;;  %vm11354_vm14 = vmmov %vm11209_vm0 }
 0x462   :  { %v6782_v50 = vmul.f32 1.6732632, %v7412_v16  ;;  %vm6797_vm5 = vcmp.gt.f32.partialorder %v10995_v46, 0.0  ;;  %v6812_v42 = vsel %vm6796_vm4, %v10989_v8, %v6780_v40  ;;  %v6827_v23 = vmul.f32 1.050701, %v6811_v34  ;;  %6841 = vst.msk [vmem:[#allocation3 + $0x50] sm:$0xff] %vm11352_vm10, %v6825_v52 }
 0x463   :  { %vm6798_vm11 = vcmp.gt.f32.partialorder %v11001_v61, 0.0  ;;  %v6813_v10 = vsel %vm6797_vm5, %v10995_v46, %v6781_v4  ;;  %v6828_v47 = vmul.f32 1.050701, %v6812_v42  ;;  %6842 = vst.msk [vmem:[#allocation3 + $0x58] sm:$0xff] %vm11353_vm13, %v6826_v6 }
 0x464   :  { %v6814_v5 = vsel %vm6798_vm11, %v11001_v61, %v6782_v50  ;;  %v6829_v45 = vmul.f32 1.050701, %v6813_v10  ;;  %6843 = vst.msk [vmem:[#allocation3 + $0x60] sm:$0xff] %vm11354_vm14, %v6827_v23 }
 0x465   :  { %v6830_v30 = vmul.f32 1.050701, %v6814_v5  ;;  %6844 = vst.msk [vmem:[#allocation3 + $0x68] sm:$0xff] %vm11355_vm15, %v6828_v47 }
 0x466   :  { %6845 = vst.msk [vmem:[#allocation3 + $0x70] sm:$0xff] %vm11209_vm0, %v6829_v45 }
 0x467   :  { %6846 = vst.msk [vmem:[#allocation3 + $0x78] sm:$0xff] %vm11356_vm6, %v6830_v30 }
 0x468   :  { %8169 = shalt.err (!%p8166_p4)
}
 0x469   :  { %s8182_s19 = smov 128   ;;  %s8183_s20 = smov 8  }
 0x46a   :  { %6858 = dma.vmem_to_hbm [thread:$0]  %s6853_s17, 2048, %s11092_s7, [#allocation4], %s8182_s19, %s8182_s19, %s8183_s20  }
 0x46b   :  { %8178 = dma.done.wait [#allocation4], 2048  }
 0x46c   :  { %8179 = vsyncadd [#allocation4], 4294965248 }
 0x46d   :  { %6862 = vsyncpa [#allocation4], 1 }

</bundles_post_ra>
